<compile_context>
chip_gen: v7x
topology: tpu7x:2x2x1
jax: 0.10.0
libtpu: 0.0.40
codegen_flags: <defaults>
</compile_context>

<pallas_src>
import jax
import jax.numpy as jnp
from jax.experimental import pallas as pl
from jax.experimental.pallas import tpu as pltpu

HIDDEN = 512
MAX_TILE_B = 1024  # multiple of 256 (v6e/v7x MXU M), 128 (v5e MXU M), 16 (bf16 pack)


def _round_up(x: int, m: int) -> int:
    return -(-x // m) * m


def _pick_tile_b(batch: int) -> int:
    """Adaptive batch tile: multiple of 256, large enough to amortize the
    per-grid-step overhead, and (for multi-tile batches) an even tile count so
    v7x's two TensorCores are both used."""
    b256 = _round_up(batch, 256)
    if b256 <= MAX_TILE_B:
        return b256                       # whole batch in a single tile
    for t in (1024, 768, 512, 256):       # largest tile giving an even #tiles
        if (_round_up(batch, t) // t) % 2 == 0:
            return t
    return MAX_TILE_B


def _qnet_kernel(s_ref, a_ref,
                 w1_ref, b1_ref,
                 w2_ref, b2_ref,
                 w3h_ref, w3a_ref, b3_ref,
                 w4_ref, b4_ref,
                 w5t_ref, b5_ref,
                 out_ref):
    f32, bf16 = jnp.float32, jnp.bfloat16

    s = s_ref[...].astype(bf16)        # (TILE_B, obs)
    a = a_ref[...].astype(bf16)        # (TILE_B, act)

    # q_net_obs_only: Linear(obs,512) -> ReLU -> Linear(512,512)
    h1 = jnp.dot(s, w1_ref[...], preferred_element_type=f32) + b1_ref[...]
    h1 = jnp.maximum(h1, 0.0).astype(bf16)           # ReLU fused with bf16 cast
    h2 = jnp.dot(h1, w2_ref[...], preferred_element_type=f32) + b2_ref[...]
    h2 = h2.astype(bf16)                              # no ReLU here (matches module)

    # q_net: Linear(512+act,512) applied to concat([h2, a]) in exact split form.
    h3 = (jnp.dot(h2, w3h_ref[...], preferred_element_type=f32)
          + jnp.dot(a, w3a_ref[...], preferred_element_type=f32)
          + b3_ref[...])
    h3 = jnp.maximum(h3, 0.0).astype(bf16)

    # Linear(512,512) -> ReLU
    h4 = jnp.dot(h3, w4_ref[...], preferred_element_type=f32) + b4_ref[...]
    h4 = jnp.maximum(h4, 0.0).astype(bf16)

    # Linear(512,1): contract w5 (1,512) against h4 (TILE_B,512) on the feature
    # axis -> lane-dense (1, TILE_B) row (same contraction pattern as decode
    # attention scores), avoiding a (TILE_B,1) masked 1-lane store.
    q = jnp.einsum("od,bd->ob", w5t_ref[...], h4,
                   preferred_element_type=f32) + b5_ref[...]
    out_ref[...] = q.astype(out_ref.dtype)


@jax.jit
def qnet_forward(s, a, params):
    """s: (B, obs_dims) f32, a: (B, action_dims) f32 -> (B, 1) f32."""
    B, obs_dims = s.shape
    act_dims = a.shape[1]

    tile_b = _pick_tile_b(B)
    n_tiles = _round_up(B, tile_b) // tile_b
    B_pad = n_tiles * tile_b
    if B_pad != B:
        s = jnp.pad(s, ((0, B_pad - B), (0, 0)))
        a = jnp.pad(a, ((0, B_pad - B), (0, 0)))

    args = (s, a,
            params["w1"], params["b1"],
            params["w2"], params["b2"],
            params["w3h"], params["w3a"], params["b3"],
            params["w4"], params["b4"],
            params["w5t"], params["b5"])

    def batch_spec(x):
        return pl.BlockSpec((tile_b, x.shape[1]), lambda i: (i, 0))

    def resident_spec(x):  # constant block index -> DMA'd once, stays in VMEM
        return pl.BlockSpec(x.shape, lambda i: (0,) * x.ndim)

    in_specs = [batch_spec(s), batch_spec(a)] + [resident_spec(w) for w in args[2:]]

    weight_bytes = sum(int(w.size) * w.dtype.itemsize for w in args[2:])
    flops = 2 * B_pad * HIDDEN * (obs_dims + HIDDEN + HIDDEN + act_dims + HIDDEN + 1)
    bytes_accessed = weight_bytes + B_pad * (obs_dims + act_dims + 1) * 4

    out = pl.pallas_call(
        _qnet_kernel,
        out_shape=jax.ShapeDtypeStruct((1, B_pad), jnp.float32),
        grid=(n_tiles,),
        in_specs=in_specs,
        out_specs=pl.BlockSpec((1, tile_b), lambda i: (0, i)),
        compiler_params=pltpu.CompilerParams(
            dimension_semantics=("parallel",),
            vmem_limit_bytes=32 * 1024 * 1024),
        cost_estimate=pl.CostEstimate(
            flops=flops, transcendentals=0, bytes_accessed=bytes_accessed),
    )(*args)
    return out.reshape(B_pad, 1)[:B]


def init_params(key, obs_dims, action_dims):
    """PyTorch-style U(-1/sqrt(fan_in), 1/sqrt(fan_in)) init; weights in bf16."""
    def linear(k, fan_in, fan_out):
        kw, kb = jax.random.split(k)
        bound = 1.0 / jnp.sqrt(jnp.float32(fan_in))
        w = jax.random.uniform(kw, (fan_in, fan_out), jnp.float32, -bound, bound)
        b = jax.random.uniform(kb, (1, fan_out), jnp.float32, -bound, bound)
        return w, b

    bf16 = jnp.bfloat16
    k1, k2, k3, k4, k5 = jax.random.split(key, 5)
    w1, b1 = linear(k1, obs_dims, HIDDEN)
    w2, b2 = linear(k2, HIDDEN, HIDDEN)
    # Third linear has fan_in = 512 + action_dims; split its weight rows so the
    # concat([h2, a]) @ W3 becomes h2 @ W3_h + a @ W3_a (exact).
    w3_full, b3 = linear(k3, HIDDEN + action_dims, HIDDEN)
    w3h, w3a = w3_full[:HIDDEN], w3_full[HIDDEN:]
    w4, b4 = linear(k4, HIDDEN, HIDDEN)
    w5, b5 = linear(k5, HIDDEN, 1)
    return dict(
        w1=w1.astype(bf16), b1=b1,
        w2=w2.astype(bf16), b2=b2,
        w3h=w3h.astype(bf16), w3a=w3a.astype(bf16), b3=b3,
        w4=w4.astype(bf16), b4=b4,
        w5t=jnp.transpose(w5).astype(bf16), b5=b5,   # (1,512) bf16, (1,1) f32
    )


def qnet_ref(s, a, p):
    """Pure-JAX reference mirroring the kernel's mixed-precision math."""
    f32, bf16 = jnp.float32, jnp.bfloat16
    sb, ab = s.astype(bf16), a.astype(bf16)
    h1 = jnp.maximum(jnp.dot(sb, p["w1"], preferred_element_type=f32) + p["b1"],
                     0.0).astype(bf16)
    h2 = (jnp.dot(h1, p["w2"], preferred_element_type=f32) + p["b2"]).astype(bf16)
    h3 = jnp.maximum(jnp.dot(h2, p["w3h"], preferred_element_type=f32)
                     + jnp.dot(ab, p["w3a"], preferred_element_type=f32)
                     + p["b3"], 0.0).astype(bf16)
    h4 = jnp.maximum(jnp.dot(h3, p["w4"], preferred_element_type=f32) + p["b4"],
                     0.0).astype(bf16)
    q = jnp.einsum("od,bd->ob", p["w5t"], h4, preferred_element_type=f32) + p["b5"]
    return q.reshape(-1, 1)


if __name__ == "__main__":
    obs_dims, action_dims, batch = 16, 4, 2
    key = jax.random.PRNGKey(0)
    kp, ks, ka = jax.random.split(key, 3)

    params = init_params(kp, obs_dims, action_dims)
    s = jax.random.normal(ks, (batch, obs_dims), jnp.float32)
    a = jax.random.normal(ka, (batch, action_dims), jnp.float32)

    out = qnet_forward(s, a, params)
    jax.block_until_ready(out)
    ref = qnet_ref(s, a, params)
    assert out.shape == (batch, 1), out.shape
    assert jnp.allclose(out, ref, atol=5e-3, rtol=5e-3), (out, ref)

    # Also exercise the large-batch path (TILE_B=1024, 2 tiles, lane-dense out).
    big = 2048
    kbs, kba = jax.random.split(ka)
    sb = jax.random.normal(kbs, (big, obs_dims), jnp.float32)
    ab = jax.random.normal(kba, (big, action_dims), jnp.float32)
    out_big = qnet_forward(sb, ab, params)
    jax.block_until_ready(out_big)
    ref_big = qnet_ref(sb, ab, params)
    assert out_big.shape == (big, 1), out_big.shape
    assert jnp.allclose(out_big, ref_big, atol=5e-3, rtol=5e-3)

    print("KERNEL_OK")
</pallas_src>

<mosaic_0001>
module attributes {stable_mosaic.version = 11 : i64} {
  func.func @_qnet_kernel(%arg0: i32, %arg1: memref<256x16xf32, #tpu.memory_space<vmem>>, %arg2: memref<256x4xf32, #tpu.memory_space<vmem>>, %arg3: memref<16x512xbf16, #tpu.memory_space<vmem>>, %arg4: memref<1x512xf32, #tpu.memory_space<vmem>>, %arg5: memref<512x512xbf16, #tpu.memory_space<vmem>>, %arg6: memref<1x512xf32, #tpu.memory_space<vmem>>, %arg7: memref<512x512xbf16, #tpu.memory_space<vmem>>, %arg8: memref<4x512xbf16, #tpu.memory_space<vmem>>, %arg9: memref<1x512xf32, #tpu.memory_space<vmem>>, %arg10: memref<512x512xbf16, #tpu.memory_space<vmem>>, %arg11: memref<1x512xf32, #tpu.memory_space<vmem>>, %arg12: memref<1x512xbf16, #tpu.memory_space<vmem>>, %arg13: memref<1x1xf32, #tpu.memory_space<vmem>>, %arg14: memref<1x256xf32, #tpu.memory_space<vmem>>) attributes {dimension_semantics = [#tpu.dimension_semantics<parallel>], iteration_bounds = array<i64: 1>, scalar_prefetch = 0 : i64, scratch_operands = 0 : i64, tpu.core_type = #tpu.core_type<tc>, window_params = [{transform_indices = @transform_0, window_bounds = array<i64: 256, 16>}, {transform_indices = @transform_1, window_bounds = array<i64: 256, 4>}, {pipeline_mode = #tpu.pipeline_mode<synchronous>, transform_indices = @transform_2, window_bounds = array<i64: 16, 512>}, {pipeline_mode = #tpu.pipeline_mode<synchronous>, transform_indices = @transform_3, window_bounds = array<i64: 1, 512>}, {pipeline_mode = #tpu.pipeline_mode<synchronous>, transform_indices = @transform_4, window_bounds = array<i64: 512, 512>}, {pipeline_mode = #tpu.pipeline_mode<synchronous>, transform_indices = @transform_5, window_bounds = array<i64: 1, 512>}, {pipeline_mode = #tpu.pipeline_mode<synchronous>, transform_indices = @transform_6, window_bounds = array<i64: 512, 512>}, {pipeline_mode = #tpu.pipeline_mode<synchronous>, transform_indices = @transform_7, window_bounds = array<i64: 4, 512>}, {pipeline_mode = #tpu.pipeline_mode<synchronous>, transform_indices = @transform_8, window_bounds = array<i64: 1, 512>}, {pipeline_mode = #tpu.pipeline_mode<synchronous>, transform_indices = @transform_9, window_bounds = array<i64: 512, 512>}, {pipeline_mode = #tpu.pipeline_mode<synchronous>, transform_indices = @transform_10, window_bounds = array<i64: 1, 512>}, {pipeline_mode = #tpu.pipeline_mode<synchronous>, transform_indices = @transform_11, window_bounds = array<i64: 1, 512>}, {pipeline_mode = #tpu.pipeline_mode<synchronous>, transform_indices = @transform_12, window_bounds = array<i64: 1, 1>}, {transform_indices = @transform_13, window_bounds = array<i64: 1, 256>}]} {
    %c0 = arith.constant 0 : index
    %c0_0 = arith.constant 0 : index
    %0 = vector.load %arg1[%c0, %c0_0] : memref<256x16xf32, #tpu.memory_space<vmem>>, vector<256x16xf32>
    %1 = arith.truncf %0 : vector<256x16xf32> to vector<256x16xbf16>
    %c0_1 = arith.constant 0 : index
    %c0_2 = arith.constant 0 : index
    %2 = vector.load %arg2[%c0_1, %c0_2] : memref<256x4xf32, #tpu.memory_space<vmem>>, vector<256x4xf32>
    %3 = arith.truncf %2 : vector<256x4xf32> to vector<256x4xbf16>
    %c0_3 = arith.constant 0 : index
    %c0_4 = arith.constant 0 : index
    %4 = vector.load %arg3[%c0_3, %c0_4] : memref<16x512xbf16, #tpu.memory_space<vmem>>, vector<16x512xbf16>
    %cst = arith.constant dense<0.000000e+00> : vector<256x512xf32>
    %5 = tpu.matmul %1, %4, %cst {dimension_numbers = #tpu.dot_dimension_numbers<[1], [0], [0], [1], [0, 0, 1, 1], [], []>} : vector<256x16xbf16>, vector<16x512xbf16>, vector<256x512xf32> -> vector<256x512xf32>
    %c0_5 = arith.constant 0 : index
    %c0_6 = arith.constant 0 : index
    %6 = vector.load %arg4[%c0_5, %c0_6] : memref<1x512xf32, #tpu.memory_space<vmem>>, vector<1x512xf32>
    %7 = vector.broadcast %6 : vector<1x512xf32> to vector<256x512xf32>
    %8 = arith.addf %5, %7 : vector<256x512xf32>
    %cst_7 = arith.constant 0.000000e+00 : f32
    %9 = vector.broadcast %cst_7 : f32 to vector<256x512xf32>
    %10 = arith.maximumf %8, %9 : vector<256x512xf32>
    %11 = arith.truncf %10 : vector<256x512xf32> to vector<256x512xbf16>
    %c0_8 = arith.constant 0 : index
    %c0_9 = arith.constant 0 : index
    %12 = vector.load %arg5[%c0_8, %c0_9] : memref<512x512xbf16, #tpu.memory_space<vmem>>, vector<512x512xbf16>
    %cst_10 = arith.constant dense<0.000000e+00> : vector<256x512xf32>
    %13 = tpu.matmul %11, %12, %cst_10 {dimension_numbers = #tpu.dot_dimension_numbers<[1], [0], [0], [1], [0, 0, 1, 1], [], []>} : vector<256x512xbf16>, vector<512x512xbf16>, vector<256x512xf32> -> vector<256x512xf32>
    %c0_11 = arith.constant 0 : index
    %c0_12 = arith.constant 0 : index
    %14 = vector.load %arg6[%c0_11, %c0_12] : memref<1x512xf32, #tpu.memory_space<vmem>>, vector<1x512xf32>
    %15 = vector.broadcast %14 : vector<1x512xf32> to vector<256x512xf32>
    %16 = arith.addf %13, %15 : vector<256x512xf32>
    %17 = arith.truncf %16 : vector<256x512xf32> to vector<256x512xbf16>
    %c0_13 = arith.constant 0 : index
    %c0_14 = arith.constant 0 : index
    %18 = vector.load %arg7[%c0_13, %c0_14] : memref<512x512xbf16, #tpu.memory_space<vmem>>, vector<512x512xbf16>
    %cst_15 = arith.constant dense<0.000000e+00> : vector<256x512xf32>
    %19 = tpu.matmul %17, %18, %cst_15 {dimension_numbers = #tpu.dot_dimension_numbers<[1], [0], [0], [1], [0, 0, 1, 1], [], []>} : vector<256x512xbf16>, vector<512x512xbf16>, vector<256x512xf32> -> vector<256x512xf32>
    %c0_16 = arith.constant 0 : index
    %c0_17 = arith.constant 0 : index
    %20 = vector.load %arg8[%c0_16, %c0_17] : memref<4x512xbf16, #tpu.memory_space<vmem>>, vector<4x512xbf16>
    %cst_18 = arith.constant dense<0.000000e+00> : vector<256x512xf32>
    %21 = tpu.matmul %3, %20, %cst_18 {dimension_numbers = #tpu.dot_dimension_numbers<[1], [0], [0], [1], [0, 0, 1, 1], [], []>} : vector<256x4xbf16>, vector<4x512xbf16>, vector<256x512xf32> -> vector<256x512xf32>
    %22 = arith.addf %19, %21 : vector<256x512xf32>
    %c0_19 = arith.constant 0 : index
    %c0_20 = arith.constant 0 : index
    %23 = vector.load %arg9[%c0_19, %c0_20] : memref<1x512xf32, #tpu.memory_space<vmem>>, vector<1x512xf32>
    %24 = vector.broadcast %23 : vector<1x512xf32> to vector<256x512xf32>
    %25 = arith.addf %22, %24 : vector<256x512xf32>
    %cst_21 = arith.constant 0.000000e+00 : f32
    %26 = vector.broadcast %cst_21 : f32 to vector<256x512xf32>
    %27 = arith.maximumf %25, %26 : vector<256x512xf32>
    %28 = arith.truncf %27 : vector<256x512xf32> to vector<256x512xbf16>
    %c0_22 = arith.constant 0 : index
    %c0_23 = arith.constant 0 : index
    %29 = vector.load %arg10[%c0_22, %c0_23] : memref<512x512xbf16, #tpu.memory_space<vmem>>, vector<512x512xbf16>
    %cst_24 = arith.constant dense<0.000000e+00> : vector<256x512xf32>
    %30 = tpu.matmul %28, %29, %cst_24 {dimension_numbers = #tpu.dot_dimension_numbers<[1], [0], [0], [1], [0, 0, 1, 1], [], []>} : vector<256x512xbf16>, vector<512x512xbf16>, vector<256x512xf32> -> vector<256x512xf32>
    %c0_25 = arith.constant 0 : index
    %c0_26 = arith.constant 0 : index
    %31 = vector.load %arg11[%c0_25, %c0_26] : memref<1x512xf32, #tpu.memory_space<vmem>>, vector<1x512xf32>
    %32 = vector.broadcast %31 : vector<1x512xf32> to vector<256x512xf32>
    %33 = arith.addf %30, %32 : vector<256x512xf32>
    %cst_27 = arith.constant 0.000000e+00 : f32
    %34 = vector.broadcast %cst_27 : f32 to vector<256x512xf32>
    %35 = arith.maximumf %33, %34 : vector<256x512xf32>
    %36 = arith.truncf %35 : vector<256x512xf32> to vector<256x512xbf16>
    %c0_28 = arith.constant 0 : index
    %c0_29 = arith.constant 0 : index
    %37 = vector.load %arg12[%c0_28, %c0_29] : memref<1x512xbf16, #tpu.memory_space<vmem>>, vector<1x512xbf16>
    "tpu.trace_start"() <{level = 10 : i32, message = "od,bd->ob"}> : () -> ()
    %cst_30 = arith.constant dense<0.000000e+00> : vector<1x256xf32>
    %38 = tpu.matmul %37, %36, %cst_30 {dimension_numbers = #tpu.dot_dimension_numbers<[1], [1], [0], [0], [0, 0, 1, 0], [], []>} : vector<1x512xbf16>, vector<256x512xbf16>, vector<1x256xf32> -> vector<1x256xf32>
    "tpu.trace_stop"() : () -> ()
    %c0_31 = arith.constant 0 : index
    %c0_32 = arith.constant 0 : index
    %39 = vector.load %arg13[%c0_31, %c0_32] : memref<1x1xf32, #tpu.memory_space<vmem>>, vector<1x1xf32>
    %40 = vector.broadcast %39 : vector<1x1xf32> to vector<1x256xf32>
    %41 = arith.addf %38, %40 : vector<1x256xf32>
    %c0_33 = arith.constant 0 : index
    %c0_34 = arith.constant 0 : index
    %42 = vector.load %arg14[%c0_33, %c0_34] : memref<1x256xf32, #tpu.memory_space<vmem>>, vector<1x256xf32>
    tpu.vector_store %arg14[%c0_33, %c0_34], %41 {strides = array<i32>} : memref<1x256xf32, #tpu.memory_space<vmem>>, vector<1x256xf32>,
    return
  }
  func.func @transform_0(%arg0: i32) -> (i32, i32) {
    %c0_i32 = arith.constant 0 : i32
    %c0_i32_0 = arith.constant 0 : i32
    return %arg0, %c0_i32 : i32, i32
  }
  func.func @transform_1(%arg0: i32) -> (i32, i32) {
    %c0_i32 = arith.constant 0 : i32
    %c0_i32_0 = arith.constant 0 : i32
    return %arg0, %c0_i32 : i32, i32
  }
  func.func @transform_2(%arg0: i32) -> (i32, i32) {
    %c0_i32 = arith.constant 0 : i32
    %c0_i32_0 = arith.constant 0 : i32
    %c0_i32_1 = arith.constant 0 : i32
    return %c0_i32, %c0_i32_0 : i32, i32
  }
  func.func @transform_3(%arg0: i32) -> (i32, i32) {
    %c0_i32 = arith.constant 0 : i32
    %c0_i32_0 = arith.constant 0 : i32
    %c0_i32_1 = arith.constant 0 : i32
    return %c0_i32, %c0_i32_0 : i32, i32
  }
  func.func @transform_4(%arg0: i32) -> (i32, i32) {
    %c0_i32 = arith.constant 0 : i32
    %c0_i32_0 = arith.constant 0 : i32
    %c0_i32_1 = arith.constant 0 : i32
    return %c0_i32, %c0_i32_0 : i32, i32
  }
  func.func @transform_5(%arg0: i32) -> (i32, i32) {
    %c0_i32 = arith.constant 0 : i32
    %c0_i32_0 = arith.constant 0 : i32
    %c0_i32_1 = arith.constant 0 : i32
    return %c0_i32, %c0_i32_0 : i32, i32
  }
  func.func @transform_6(%arg0: i32) -> (i32, i32) {
    %c0_i32 = arith.constant 0 : i32
    %c0_i32_0 = arith.constant 0 : i32
    %c0_i32_1 = arith.constant 0 : i32
    return %c0_i32, %c0_i32_0 : i32, i32
  }
  func.func @transform_7(%arg0: i32) -> (i32, i32) {
    %c0_i32 = arith.constant 0 : i32
    %c0_i32_0 = arith.constant 0 : i32
    %c0_i32_1 = arith.constant 0 : i32
    return %c0_i32, %c0_i32_0 : i32, i32
  }
  func.func @transform_8(%arg0: i32) -> (i32, i32) {
    %c0_i32 = arith.constant 0 : i32
    %c0_i32_0 = arith.constant 0 : i32
    %c0_i32_1 = arith.constant 0 : i32
    return %c0_i32, %c0_i32_0 : i32, i32
  }
  func.func @transform_9(%arg0: i32) -> (i32, i32) {
    %c0_i32 = arith.constant 0 : i32
    %c0_i32_0 = arith.constant 0 : i32
    %c0_i32_1 = arith.constant 0 : i32
    return %c0_i32, %c0_i32_0 : i32, i32
  }
  func.func @transform_10(%arg0: i32) -> (i32, i32) {
    %c0_i32 = arith.constant 0 : i32
    %c0_i32_0 = arith.constant 0 : i32
    %c0_i32_1 = arith.constant 0 : i32
    return %c0_i32, %c0_i32_0 : i32, i32
  }
  func.func @transform_11(%arg0: i32) -> (i32, i32) {
    %c0_i32 = arith.constant 0 : i32
    %c0_i32_0 = arith.constant 0 : i32
    %c0_i32_1 = arith.constant 0 : i32
    return %c0_i32, %c0_i32_0 : i32, i32
  }
  func.func @transform_12(%arg0: i32) -> (i32, i32) {
    %c0_i32 = arith.constant 0 : i32
    %c0_i32_0 = arith.constant 0 : i32
    %c0_i32_1 = arith.constant 0 : i32
    return %c0_i32, %c0_i32_0 : i32, i32
  }
  func.func @transform_13(%arg0: i32) -> (i32, i32) {
    %c0_i32 = arith.constant 0 : i32
    %c0_i32_0 = arith.constant 0 : i32
    return %c0_i32, %arg0 : i32, i32
  }
}

</mosaic_0001>

<bundles_post_ra>
// kernel: qnet_forward.1
= control target key start
LH: loop header
LB: loop body
LE: loop exit
PB: predicated region body
PF: predicated region fallthrough
CT: control target
= control target key end

     0   :  { %s10218_s0 = inlined_call_operand.vmem [shape: f32[256,16], index: 0, kind: input, shape index: {}]   ;;  %s10219_s1 = inlined_call_operand.vmem [shape: f32[256,4], index: 1, kind: input, shape index: {}]   ;;  %s10220_s2 = inlined_call_operand.vmem [shape: bf16[16,512], index: 2, kind: input, shape index: {}]   ;;  %s10221_s3 = inlined_call_operand.vmem [shape: f32[1,512], index: 3, kind: input, shape index: {}]   ;;  %s10222_s4 = inlined_call_operand.hbm [shape: bf16[512,512], index: 4, kind: input, shape index: {}]   ;;  %s10223_s5 = inlined_call_operand.vmem [shape: f32[1,512], index: 5, kind: input, shape index: {}]   ;;  %s10224_s6 = inlined_call_operand.hbm [shape: bf16[512,512], index: 6, kind: input, shape index: {}]   ;;  %s10225_s7 = inlined_call_operand.vmem [shape: bf16[4,512], index: 7, kind: input, shape index: {}]   ;;  %s10226_s8 = inlined_call_operand.vmem [shape: f32[1,512], index: 8, kind: input, shape index: {}]   ;;  %s10227_s9 = inlined_call_operand.hbm [shape: bf16[512,512], index: 9, kind: input, shape index: {}]   ;;  %s10228_s10 = inlined_call_operand.vmem [shape: f32[1,512], index: 10, kind: input, shape index: {}]   ;;  %s10229_s11 = inlined_call_operand.vmem [shape: bf16[1,512], index: 11, kind: input, shape index: {}]   ;;  %s10230_s12 = inlined_call_operand.<no memory space> [shape: f32[1,1], index: 12, kind: input, shape index: {}]   ;;  %s10231_s13 = inlined_call_operand.vmem [shape: f32[1,256], index: 13, kind: output, shape index: {}]  }
   0x1   :  { %v18_v0 = vstv %s10230_s12 }
   0x2   :  { %19 = vst [vmem:[#allocation2] sm:$0x1] %v18_v0 }
   0x3   :  { %20 = vsyncpa [#allocation4], 0 }
   0x4   :  { %21 = vsyncpa [#allocation6], 0  ;;  %s8626_s27 = smov [#allocation5]   ;;  %s8627_s29 = smov [#allocation3]  }
   0x5   :  { %s49_s28 = sshll.u32 %s8626_s27, 4  ;;  %s35_s30 = sshll.u32 %s8627_s29, 4  ;;  %s50_s28 = int_to_ptr.vmem [resolvable:$true] %s49_s28  ;;  %s8707_s30 = int_to_ptr.vmem [resolvable:$true] %s35_s30 }
   0x6   :  { %s8556_s16 = scalar_lea.hbm %s10224_s6, 16384 }
   0x7   :  { %p8557_p0 = scmp.ne.s32.totalorder %s10224_s6, %s8556_s16  ;;  %p8560_p1 = scmp.lt.u32.totalorder %s8556_s16, %s10224_s6 }
   0x9   :  { %p8562_p2 = pnand %p8560_p1, %p8557_p0 }
   0xb   :  { %8565 = shalt.err (!%p8562_p2)
}
   0xc   :  { %s8566_s20 = scalar_lea.vmem %s50_s28, 16384  ;;  %p8571_p4 = scmp.lt.s32.totalorder %s50_s28, %s50_s28 }
   0xd   :  { %p8567_p3 = scmp.ne.s32.totalorder %s50_s28, %s8566_s20  ;;  %p8572_p5 = scmp.lt.s32.totalorder %s8566_s20, %s8566_s20 }
   0xf   :  { %p8573_p6 = por %p8572_p5, %p8571_p4 }
  0x11   :  { %p8574_p7 = pnand %p8573_p6, %p8567_p3 }
  0x13   :  { %8577 = shalt.err (!%p8574_p7)
}
  0x14   :  { %s8628_s21 = smov 256   ;;  %s8629_s22 = smov 16  }
  0x15   :  { %55 = dma.hbm_to_vmem [thread:$0]  %s10224_s6, 16384, %s50_s28, [#allocation6], %s8628_s21, %s8628_s21, %s8629_s22  }
  0x16   :  { %s8578_s27 = scalar_lea.hbm %s10222_s4, 16384 }
  0x17   :  { %p8579_p8 = scmp.ne.s32.totalorder %s10222_s4, %s8578_s27  ;;  %p8582_p9 = scmp.lt.u32.totalorder %s8578_s27, %s10222_s4 }
  0x19   :  { %p8584_p10 = pnand %p8582_p9, %p8579_p8 }
  0x1b   :  { %8587 = shalt.err (!%p8584_p10)
}
  0x1c   :  { %s8588_s17 = scalar_lea.vmem %s8707_s30, 16384  ;;  %p8593_p12 = scmp.lt.s32.totalorder %s8707_s30, %s8707_s30 }
  0x1d   :  { %p8589_p11 = scmp.ne.s32.totalorder %s8707_s30, %s8588_s17  ;;  %p8594_p13 = scmp.lt.s32.totalorder %s8588_s17, %s8588_s17 }
  0x1f   :  { %p8595_p0 = por %p8594_p13, %p8593_p12 }
  0x21   :  { %p8596_p1 = pnand %p8595_p0, %p8589_p11 }
  0x23   :  { %8599 = shalt.err (!%p8596_p1)
}
  0x24   :  { %41 = dma.hbm_to_vmem [thread:$0]  %s10222_s4, 16384, %s8707_s30, [#allocation4], %s8628_s21, %s8628_s21, %s8629_s22  }
  0x25   :  { %s8630_s18 = smov [#allocation7]   ;;  %s8600_s23 = scalar_lea.hbm %s10227_s9, 16384 }
  0x26   :  { %s65_s19 = sshll.u32 %s8630_s18, 4  ;;  %p8601_p2 = scmp.ne.s32.totalorder %s10227_s9, %s8600_s23  ;;  %s66_s19 = int_to_ptr.vmem [resolvable:$true] %s65_s19 }
  0x27   :  { %p8604_p3 = scmp.lt.u32.totalorder %s8600_s23, %s10227_s9 }
  0x29   :  { %p8606_p4 = pnand %p8604_p3, %p8601_p2 }
  0x2b   :  { %8609 = shalt.err (!%p8606_p4)
}
  0x2c   :  { %s8610_s29 = scalar_lea.vmem %s66_s19, 16384  ;;  %p8615_p6 = scmp.lt.s32.totalorder %s66_s19, %s66_s19 }
  0x2d   :  { %p8611_p5 = scmp.ne.s32.totalorder %s66_s19, %s8610_s29  ;;  %p8616_p7 = scmp.lt.s32.totalorder %s8610_s29, %s8610_s29 }
  0x2f   :  { %p8617_p8 = por %p8616_p7, %p8615_p6 }
  0x31   :  { %p8618_p9 = pnand %p8617_p8, %p8611_p5 }
  0x33   :  { %8621 = shalt.err (!%p8618_p9)
}
  0x34   :  { %71 = dma.hbm_to_vmem [thread:$0]  %s10227_s9, 16384, %s66_s19, [#allocation6], %s8628_s21, %s8628_s21, %s8629_s22  }
  0x35   :  { %8622 = dma.done.wait [#allocation4], 16384  }
  0x36   :  { %8623 = vsyncadd [#allocation4], 4294950912 }
  0x37   :  { %8624 = dma.done.wait [#allocation6], 32768  }
  0x38   :  { %8625 = vsyncadd [#allocation6], 4294934528  ;;  %v8631_v1 = vmov 0   ;;  %v7973_v2 = vld [vmem:[%s10220_s2 + $0x4] ss:$16 sps:$4 sm:$0xff]   ;;  %v89_v5 = vld [vmem:[%s10218_s0 + $0x8] sm:$0xff] }
  0x39   :  { %311 = vmatprep.mubr.bf16.mxu0 %v8631_v1  ;;  %504 = vmatprep.mubr.bf16.mxu1 %v8631_v1  ;;  %v7975_v3 = vld [vmem:[%s10220_s2] ss:$16 sps:$4 sm:$0xff]   ;;  %vm230_vm0 = vcmask 130048   ;;  %v91_v8 = vld [vmem:[%s10218_s0 + $0x18] sm:$0xff]  ;;  %v93_v16 = vld [vmem:[%s10218_s0 + $0x28] sm:$0xff]  ;;  %vm2679_vm1 = vcmask 1041408  }
  0x3a   :  { %7972 = vset.pattern.permute.xlu0 %v8631_v1  ;;  %v88_v4 = vld [vmem:[%s10218_s0] sm:$0xff]  ;;  %279 = vmatprep.subr.bf16.mxu0 %v7973_v2  ;;  %v90_v7 = vld [vmem:[%s10218_s0 + $0x10] sm:$0xff]  ;;  %v7976_v10 = vld [vmem:[%s10220_s2 + $0xc] ss:$16 sps:$4 sm:$0xff]   ;;  %vm2630_vm2 = vcmask 31744  }
  0x3b   :  { %v120_v6 = vpack.c.bf16 %v89_v5, %v88_v4  ;;  %280 = vmatpush1.bf16.msra.mxu0 %v7975_v3  ;;  %v121_v9 = vpack.c.bf16 %v91_v8, %v90_v7  ;;  %v7978_v11 = vld [vmem:[%s10220_s2 + $0x8] ss:$16 sps:$4 sm:$0xff]   ;;  %v7979_v12 = vld [vmem:[#allocation3] ss:$16 sps:$4 sm:$0xff]   ;;  %472 = vmatprep.subr.bf16.mxu1 %v7976_v10  ;;  %v8008_v28 = vld [vmem:[#allocation3 + $0xc] ss:$16 sps:$4 sm:$0xff]  }
  0x3c   :  { %v7981_v13 = vld [vmem:[#allocation3 + $0x4] ss:$16 sps:$4 sm:$0xff]   ;;  %473 = vmatpush1.bf16.msra.mxu1 %v7978_v11  ;;  %v7982_v17 = vld [vmem:[#allocation3 + $0x20] ss:$16 sps:$4 sm:$0xff]   ;;  %v8006_v27 = vld [vmem:[#allocation3 + $0x8] ss:$16 sps:$4 sm:$0xff]  }
  0x3d   :  { %1647 = vmatprep.subr.bf16.mxu0 %v7981_v13  ;;  %v7984_v14 = vld [vmem:[#allocation3 + $0x24] ss:$16 sps:$4 sm:$0xff]   ;;  %v7985_v20 = vld [vmem:[#allocation3 + $0x40] ss:$16 sps:$4 sm:$0xff]   ;;  %v8011_v30 = vld [vmem:[#allocation3 + $0x2c] ss:$16 sps:$4 sm:$0xff]   ;;  %2033 = vmatprep.subr.bf16.mxu1 %v8008_v28 }
  0x3e   :  { %6741 = vmatmul.mubr.msk.bf16.vlgmr.msra.gmra.mrb[0].mxu0 %vm230_vm0, %v120_v6  ;;  %v92_v15 = vld [vmem:[%s10218_s0 + $0x20] sm:$0xff]  ;;  %v94_v22 = vld [vmem:[%s10218_s0 + $0x30] sm:$0xff]  ;;  %v95_v23 = vld [vmem:[%s10218_s0 + $0x38] sm:$0xff] }
  0x3f   :  { %321 = vmatprep.mubr.bf16.mxu0 %v8631_v1  ;;  %1648 = vmatpush1.bf16.msra.mxu0 %v7979_v12  ;;  %v7987_v18 = vld [vmem:[#allocation3 + $0x44] ss:$16 sps:$4 sm:$0xff]   ;;  %v122_v19 = vpack.c.bf16 %v93_v16, %v92_v15  ;;  %v7988_v24 = vld [vmem:[#allocation3 + $0x60] ss:$16 sps:$4 sm:$0xff]   ;;  %v123_v26 = vpack.c.bf16 %v95_v23, %v94_v22  ;;  %v8009_v32 = vld [vmem:[#allocation3 + $0x28] ss:$16 sps:$4 sm:$0xff]  }
  0x40   :  { %6757 = vmatmul.mubr.msk.bf16.vlgmr.msra.gmra.mrb[0].mxu1 %vm230_vm0, %v120_v6  ;;  %1649 = vmatprep.subr.bf16.mxu0 %v7984_v14  ;;  %v7990_v21 = vld [vmem:[#allocation3 + $0x64] ss:$16 sps:$4 sm:$0xff]   ;;  %v7991_v29 = vld [vmem:[#allocation3 + $0x80] ss:$16 sps:$4 sm:$0xff]   ;;  %v8017_v34 = vld [vmem:[#allocation3 + $0x4c] ss:$16 sps:$4 sm:$0xff]  }
  0x41   :  { %514 = vmatprep.mubr.bf16.mxu1 %v8631_v1  ;;  %v7993_v25 = vld [vmem:[#allocation3 + $0x84] ss:$16 sps:$4 sm:$0xff]   ;;  %2034 = vmatpush1.bf16.msra.mxu1 %v8006_v27  ;;  %v7994_v36 = vld [vmem:[#allocation3 + $0xa0] ss:$16 sps:$4 sm:$0xff]   ;;  %v8015_v38 = vld [vmem:[#allocation3 + $0x48] ss:$16 sps:$4 sm:$0xff]  }
  0x42   :  { %v7996_v31 = vld [vmem:[#allocation3 + $0xa4] ss:$16 sps:$4 sm:$0xff]   ;;  %2035 = vmatprep.subr.bf16.mxu1 %v8011_v30  ;;  %v8020_v40 = vld [vmem:[#allocation3 + $0x6c] ss:$16 sps:$4 sm:$0xff]   ;;  %v7997_v41 = vld [vmem:[#allocation3 + $0xc0] ss:$16 sps:$4 sm:$0xff]  }
  0x43   :  { %1650 = vmatpush1.bf16.msra.mxu0 %v7982_v17  ;;  %v96_v33 = vld [vmem:[%s10218_s0 + $0x40] sm:$0xff]  ;;  %v97_v35 = vld [vmem:[%s10218_s0 + $0x48] sm:$0xff]  ;;  %v98_v44 = vld [vmem:[%s10218_s0 + $0x50] sm:$0xff] }
  0x44   :  { %1651 = vmatprep.subr.bf16.mxu0 %v7987_v18  ;;  %v7999_v37 = vld [vmem:[#allocation3 + $0xc4] ss:$16 sps:$4 sm:$0xff]   ;;  %v124_v39 = vpack.c.bf16 %v97_v35, %v96_v33  ;;  %v8018_v43 = vld [vmem:[#allocation3 + $0x68] ss:$16 sps:$4 sm:$0xff]   ;;  %v8026_v45 = vld [vmem:[#allocation3 + $0x8c] ss:$16 sps:$4 sm:$0xff]  }
  0x45   :  { %2036 = vmatpush1.bf16.msra.mxu1 %v8009_v32  ;;  %v8002_v42 = vld [vmem:[#allocation3 + $0xe4] ss:$16 sps:$4 sm:$0xff]   ;;  %v8000_v47 = vld [vmem:[#allocation3 + $0xe0] ss:$16 sps:$4 sm:$0xff]   ;;  %v8024_v49 = vld [vmem:[#allocation3 + $0x88] ss:$16 sps:$4 sm:$0xff]  }
  0x46   :  { %6742 = vmatmul.mubr.msk.bf16.gmra.mrb[4].mxu0 %vm230_vm0, %v121_v9  ;;  %2037 = vmatprep.subr.bf16.mxu1 %v8017_v34  ;;  %v99_v46 = vld [vmem:[%s10218_s0 + $0x58] sm:$0xff]  ;;  %v8003_v52 = vld [vmem:[#allocation3 + $0x100] ss:$16 sps:$4 sm:$0xff]   ;;  %v101_v57 = vld [vmem:[%s10218_s0 + $0x68] sm:$0xff] }
  0x47   :  { %331 = vmatprep.mubr.bf16.mxu0 %v8631_v1  ;;  %1652 = vmatpush1.bf16.msra.mxu0 %v7985_v20  ;;  %v8005_v48 = vld [vmem:[#allocation3 + $0x104] ss:$16 sps:$4 sm:$0xff]   ;;  %v125_v50 = vpack.c.bf16 %v99_v46, %v98_v44  ;;  %v8029_v51 = vld [vmem:[#allocation3 + $0xac] ss:$16 sps:$4 sm:$0xff]   ;;  %v8027_v54 = vld [vmem:[#allocation3 + $0xa8] ss:$16 sps:$4 sm:$0xff]  }
  0x48   :  { %6758 = vmatmul.mubr.msk.bf16.gmra.mrb[4].mxu1 %vm230_vm0, %v121_v9  ;;  %1653 = vmatprep.subr.bf16.mxu0 %v7990_v21  ;;  %v8014_v53 = vld [vmem:[#allocation3 + $0x124] ss:$16 sps:$4 sm:$0xff]   ;;  %v8035_v56 = vld [vmem:[#allocation3 + $0xcc] ss:$16 sps:$4 sm:$0xff]   ;;  %v8012_v58 = vld [vmem:[#allocation3 + $0x120] ss:$16 sps:$4 sm:$0xff]  }
  0x49   :  { %524 = vmatprep.mubr.bf16.mxu1 %v8631_v1  ;;  %2038 = vmatpush1.bf16.msra.mxu1 %v8015_v38  ;;  %v100_v55 = vld [vmem:[%s10218_s0 + $0x60] sm:$0xff]  ;;  %v8033_v60 = vld [vmem:[#allocation3 + $0xc8] ss:$16 sps:$4 sm:$0xff]   ;;  %v102_v4 = vld [vmem:[%s10218_s0 + $0x70] sm:$0xff] }
  0x4a   :  { %2039 = vmatprep.subr.bf16.mxu1 %v8020_v40  ;;  %v8023_v59 = vld [vmem:[#allocation3 + $0x144] ss:$16 sps:$4 sm:$0xff]   ;;  %v126_v61 = vpack.c.bf16 %v101_v57, %v100_v55  ;;  %v8021_v62 = vld [vmem:[#allocation3 + $0x140] ss:$16 sps:$4 sm:$0xff]   ;;  %v8038_v63 = vld [vmem:[#allocation3 + $0xec] ss:$16 sps:$4 sm:$0xff]   ;;  %v10232_v57 = vlaneseq }
  0x4b   :  { %1654 = vmatpush1.bf16.msra.mxu0 %v7988_v24  ;;  %v8032_v0 = vld [vmem:[#allocation3 + $0x164] ss:$16 sps:$4 sm:$0xff]   ;;  %v8036_v2 = vld [vmem:[#allocation3 + $0xe8] ss:$16 sps:$4 sm:$0xff]   ;;  %v8044_v3 = vld [vmem:[#allocation3 + $0x10c] ss:$16 sps:$4 sm:$0xff]  }
  0x4c   :  { %1655 = vmatprep.subr.bf16.mxu0 %v7993_v25  ;;  %v103_v5 = vld [vmem:[%s10218_s0 + $0x78] sm:$0xff]  ;;  %v8030_v6 = vld [vmem:[#allocation3 + $0x160] ss:$16 sps:$4 sm:$0xff]   ;;  %v105_v16 = vld [vmem:[%s10218_s0 + $0x88] sm:$0xff] }
  0x4d   :  { %2040 = vmatpush1.bf16.msra.mxu1 %v8018_v43  ;;  %v8041_v7 = vld [vmem:[#allocation3 + $0x184] ss:$16 sps:$4 sm:$0xff]   ;;  %v8042_v8 = vld [vmem:[#allocation3 + $0x108] ss:$16 sps:$4 sm:$0xff]   ;;  %v8047_v9 = vld [vmem:[#allocation3 + $0x12c] ss:$16 sps:$4 sm:$0xff]   ;;  %v127_v11 = vpack.c.bf16 %v103_v5, %v102_v4 }
  0x4e   :  { %6743 = vmatmul.mubr.msk.bf16.gmra.mrb[8].mxu0 %vm230_vm0, %v122_v19  ;;  %2041 = vmatprep.subr.bf16.mxu1 %v8026_v45  ;;  %v8039_v10 = vld [vmem:[#allocation3 + $0x180] ss:$16 sps:$4 sm:$0xff]   ;;  %v8050_v12 = vld [vmem:[#allocation3 + $0x1a4] ss:$16 sps:$4 sm:$0xff]   ;;  %v8045_v13 = vld [vmem:[#allocation3 + $0x128] ss:$16 sps:$4 sm:$0xff]  }
  0x4f   :  { %341 = vmatprep.mubr.bf16.mxu0 %v8631_v1  ;;  %1656 = vmatpush1.bf16.msra.mxu0 %v7991_v29  ;;  %v8053_v14 = vld [vmem:[#allocation3 + $0x14c] ss:$16 sps:$4 sm:$0xff]   ;;  %v8048_v17 = vld [vmem:[#allocation3 + $0x1a0] ss:$16 sps:$4 sm:$0xff]   ;;  %v8059_v18 = vld [vmem:[#allocation3 + $0x1c4] ss:$16 sps:$4 sm:$0xff]  }
  0x50   :  { %6759 = vmatmul.mubr.msk.bf16.gmra.mrb[8].mxu1 %vm230_vm0, %v122_v19  ;;  %1657 = vmatprep.subr.bf16.mxu0 %v7996_v31  ;;  %v104_v15 = vld [vmem:[%s10218_s0 + $0x80] sm:$0xff]  ;;  %v8051_v19 = vld [vmem:[#allocation3 + $0x148] ss:$16 sps:$4 sm:$0xff]   ;;  %v106_v25 = vld [vmem:[%s10218_s0 + $0x90] sm:$0xff] }
  0x51   :  { %534 = vmatprep.mubr.bf16.mxu1 %v8631_v1  ;;  %2042 = vmatpush1.bf16.msra.mxu1 %v8024_v49  ;;  %v8056_v20 = vld [vmem:[#allocation3 + $0x16c] ss:$16 sps:$4 sm:$0xff]   ;;  %v8057_v21 = vld [vmem:[#allocation3 + $0x1c0] ss:$16 sps:$4 sm:$0xff]   ;;  %v128_v22 = vpack.c.bf16 %v105_v16, %v104_v15  ;;  %v8054_v23 = vld [vmem:[#allocation3 + $0x168] ss:$16 sps:$4 sm:$0xff]  }
  0x52   :  { %2043 = vmatprep.subr.bf16.mxu1 %v8029_v51  ;;  %v8062_v24 = vld [vmem:[#allocation3 + $0x18c] ss:$16 sps:$4 sm:$0xff]   ;;  %v8060_v27 = vld [vmem:[#allocation3 + $0x188] ss:$16 sps:$4 sm:$0xff]   ;;  %v8066_v43 = vld [vmem:[#allocation3 + $0x1e0] ss:$16 sps:$4 sm:$0xff]  }
  0x53   :  { %1658 = vmatpush1.bf16.msra.mxu0 %v7994_v36  ;;  %v8065_v28 = vld [vmem:[#allocation3 + $0x1ac] ss:$16 sps:$4 sm:$0xff]   ;;  %v8063_v30 = vld [vmem:[#allocation3 + $0x1a8] ss:$16 sps:$4 sm:$0xff]  }
  0x54   :  { %1659 = vmatprep.subr.bf16.mxu0 %v7999_v37  ;;  %v108_v31 = vld [vmem:[%s10218_s0 + $0xa0] sm:$0xff]  ;;  %v109_v32 = vld [vmem:[%s10218_s0 + $0xa8] sm:$0xff]  ;;  %v110_v34 = vld [vmem:[%s10218_s0 + $0xb0] sm:$0xff] }
  0x55   :  { %2044 = vmatpush1.bf16.msra.mxu1 %v8027_v54  ;;  %v130_v33 = vpack.c.bf16 %v109_v32, %v108_v31  ;;  %v111_v35 = vld [vmem:[%s10218_s0 + $0xb8] sm:$0xff]  ;;  %v113_v40 = vld [vmem:[%s10218_s0 + $0xc8] sm:$0xff]  ;;  %v114_v46 = vld [vmem:[%s10218_s0 + $0xd0] sm:$0xff] }
  0x56   :  { %6744 = vmatmul.mubr.msk.bf16.gmra.mrb[12].mxu0 %vm230_vm0, %v123_v26  ;;  %2045 = vmatprep.subr.bf16.mxu1 %v8035_v56  ;;  %v131_v36 = vpack.c.bf16 %v111_v35, %v110_v34  ;;  %v8071_v37 = vld [vmem:[#allocation3 + $0x1cc] ss:$16 sps:$4 sm:$0xff]   ;;  %v8069_v38 = vld [vmem:[#allocation3 + $0x1c8] ss:$16 sps:$4 sm:$0xff]   ;;  %v8078_v31 = vld [vmem:[#allocation3 + $0x220] ss:$16 sps:$4 sm:$0xff]  }
  0x57   :  { %351 = vmatprep.mubr.bf16.mxu0 %v8631_v1  ;;  %1660 = vmatpush1.bf16.msra.mxu0 %v7997_v41  ;;  %v8068_v41 = vld [vmem:[#allocation3 + $0x1e4] ss:$16 sps:$4 sm:$0xff]   ;;  %v8072_v44 = vld [vmem:[#allocation3 + $0x1e8] ss:$16 sps:$4 sm:$0xff]   ;;  %v8104_v56 = vld [vmem:[#allocation3 + $0x20c] ss:$16 sps:$4 sm:$0xff]  }
  0x58   :  { %6760 = vmatmul.mubr.msk.bf16.gmra.mrb[12].mxu1 %vm230_vm0, %v123_v26  ;;  %1661 = vmatprep.subr.bf16.mxu0 %v8002_v42  ;;  %v107_v26 = vld [vmem:[%s10218_s0 + $0x98] sm:$0xff]  ;;  %v117_v51 = vld [vmem:[%s10218_s0 + $0xe8] sm:$0xff] }
  0x59   :  { %544 = vmatprep.mubr.bf16.mxu1 %v8631_v1  ;;  %2046 = vmatpush1.bf16.msra.mxu1 %v8033_v60  ;;  %v129_v29 = vpack.c.bf16 %v107_v26, %v106_v25  ;;  %v8074_v42 = vld [vmem:[#allocation3 + $0x1ec] ss:$16 sps:$4 sm:$0xff]   ;;  %v8083_v35 = vld [vmem:[#allocation3 + $0x244] ss:$16 sps:$4 sm:$0xff]  }
  0x5a   :  { %2047 = vmatprep.subr.bf16.mxu1 %v8038_v63  ;;  %v119_v54 = vld [vmem:[%s10218_s0 + $0xf8] sm:$0xff]  ;;  %v188_v60 = vld [vmem:[%s10221_s3] sm:$0xf] }
  0x5b   :  { %1662 = vmatpush1.bf16.msra.mxu0 %v8000_v47  ;;  %v115_v47 = vld [vmem:[%s10218_s0 + $0xd8] sm:$0xff] }
  0x5c   :  { %1663 = vmatprep.subr.bf16.mxu0 %v8005_v48  ;;  %v8077_v48 = vld [vmem:[#allocation3 + $0x204] ss:$16 sps:$4 sm:$0xff]   ;;  %v133_v49 = vpack.c.bf16 %v115_v47, %v114_v46  ;;  %v8107_v25 = vld [vmem:[#allocation3 + $0x22c] ss:$16 sps:$4 sm:$0xff]  }
  0x5d   :  { %2048 = vmatpush1.bf16.msra.mxu1 %v8036_v2 }
  0x5e   :  { %6745 = vmatmul.mubr.msk.bf16.gmra.mrb[16].mxu0 %vm230_vm0, %v124_v39  ;;  %2049 = vmatprep.subr.bf16.mxu1 %v8044_v3 }
  0x5f   :  { %361 = vmatprep.mubr.bf16.mxu0 %v8631_v1  ;;  %1664 = vmatpush1.bf16.msra.mxu0 %v8003_v52 }
  0x60   :  { %6761 = vmatmul.mubr.msk.bf16.gmra.mrb[16].mxu1 %vm230_vm0, %v124_v39  ;;  %1665 = vmatprep.subr.bf16.mxu0 %v8014_v53  ;;  %v112_v39 = vld [vmem:[%s10218_s0 + $0xc0] sm:$0xff]  ;;  %v118_v53 = vld [vmem:[%s10218_s0 + $0xf0] sm:$0xff] }
  0x61   :  { %554 = vmatprep.mubr.bf16.mxu1 %v8631_v1  ;;  %2050 = vmatpush1.bf16.msra.mxu1 %v8042_v8  ;;  %v132_v45 = vpack.c.bf16 %v113_v40, %v112_v39  ;;  %v135_v55 = vpack.c.bf16 %v119_v54, %v118_v53  ;;  %v8081_v53 = vld [vmem:[#allocation3 + $0x240] ss:$16 sps:$4 sm:$0xff]   ;;  %v8111_v54 = vld [vmem:[#allocation3 + $0x248] ss:$16 sps:$4 sm:$0xff]  }
  0x62   :  { %2051 = vmatprep.subr.bf16.mxu1 %v8047_v9 }
  0x63   :  { %1666 = vmatpush1.bf16.msra.mxu0 %v8012_v58  ;;  %v8933_v58 = vshrl.u32 %v10232_v57, 7 }
  0x64   :  { %1667 = vmatprep.subr.bf16.mxu0 %v8023_v59 }
  0x65   :  { %2052 = vmatpush1.bf16.msra.mxu1 %v8045_v13  ;;  %10236 = vst [vmem:[#allocation10_spill] sm:$0xff] %v8933_v58  ;;  %v8936_v59 = vsub.s32 0, %v8933_v58  ;;  %v8954_v8 = vsub.s32 2, %v8933_v58 }
  0x66   :  { %6746 = vmatmul.mubr.msk.bf16.gmra.mrb[20].mxu0 %vm230_vm0, %v125_v50  ;;  %2053 = vmatprep.subr.bf16.mxu1 %v8053_v14 }
  0x67   :  { %371 = vmatprep.mubr.bf16.mxu0 %v8631_v1  ;;  %1668 = vmatpush1.bf16.msra.mxu0 %v8021_v62  ;;  %v8945_v62 = vrot.slane %v188_v60, %v8936_v59  ;;  %v8961_v16 = vrot.slane %v188_v60, %v8954_v8 }
  0x68   :  { %6762 = vmatmul.mubr.msk.bf16.gmra.mrb[20].mxu1 %vm230_vm0, %v125_v50  ;;  %1669 = vmatprep.subr.bf16.mxu0 %v8032_v0  ;;  %v116_v50 = vld [vmem:[%s10218_s0 + $0xe0] sm:$0xff] }
  0x69   :  { %564 = vmatprep.mubr.bf16.mxu1 %v8631_v1  ;;  %2054 = vmatpush1.bf16.msra.mxu1 %v8051_v19  ;;  %v134_v52 = vpack.c.bf16 %v117_v51, %v116_v50  ;;  %v8075_v19 = vld [vmem:[#allocation3 + $0x200] ss:$16 sps:$4 sm:$0xff]  }
  0x6a   :  { %2055 = vmatprep.subr.bf16.mxu1 %v8056_v20  ;;  %v8102_v20 = vld [vmem:[#allocation3 + $0x208] ss:$16 sps:$4 sm:$0xff]  }
  0x6b   :  { %1670 = vmatpush1.bf16.msra.mxu0 %v8030_v6 }
  0x6c   :  { %1671 = vmatprep.subr.bf16.mxu0 %v8041_v7 }
  0x6d   :  { %2056 = vmatpush1.bf16.msra.mxu1 %v8054_v23 }
  0x6e   :  { %6747 = vmatmul.mubr.msk.bf16.gmra.mrb[24].mxu0 %vm230_vm0, %v126_v61  ;;  %2057 = vmatprep.subr.bf16.mxu1 %v8062_v24  ;;  %v8080_v24 = vld [vmem:[#allocation3 + $0x224] ss:$16 sps:$4 sm:$0xff]  }
  0x6f   :  { %381 = vmatprep.mubr.bf16.mxu0 %v8631_v1  ;;  %1672 = vmatpush1.bf16.msra.mxu0 %v8039_v10  ;;  %v8958_v10 = vsub.s32 3, %v8933_v58 }
  0x70   :  { %6763 = vmatmul.mubr.msk.bf16.gmra.mrb[24].mxu1 %vm230_vm0, %v126_v61  ;;  %1673 = vmatprep.subr.bf16.mxu0 %v8050_v12  ;;  %v8942_v61 = vsub.s32 1, %v8933_v58 }
  0x71   :  { %574 = vmatprep.mubr.bf16.mxu1 %v8631_v1  ;;  %2058 = vmatpush1.bf16.msra.mxu1 %v8060_v27  ;;  %10237 = vst [vmem:[#allocation11_spill] sm:$0xff] %v8958_v10 }
  0x72   :  { %2059 = vmatprep.subr.bf16.mxu1 %v8065_v28  ;;  %v8948_v63 = vrot.slane %v188_v60, %v8942_v61 }
  0x73   :  { %1674 = vmatpush1.bf16.msra.mxu0 %v8048_v17 }
  0x74   :  { %1675 = vmatprep.subr.bf16.mxu0 %v8059_v18 }
  0x75   :  { %2060 = vmatpush1.bf16.msra.mxu1 %v8063_v30 }
  0x76   :  { %6748 = vmatmul.mubr.msk.bf16.gmra.mrb[28].mxu0 %vm230_vm0, %v127_v11  ;;  %2061 = vmatprep.subr.bf16.mxu1 %v8071_v37 }
  0x77   :  { %391 = vmatprep.mubr.bf16.mxu0 %v8631_v1  ;;  %1676 = vmatpush1.bf16.msra.mxu0 %v8057_v21  ;;  %v8964_v21 = vrot.slane %v188_v60, %v8958_v10 }
  0x78   :  { %6764 = vmatmul.mubr.msk.bf16.gmra.mrb[28].mxu1 %vm230_vm0, %v127_v11  ;;  %1677 = vmatprep.subr.bf16.mxu0 %v8068_v41  ;;  %v8113_v41 = vld [vmem:[#allocation3 + $0x24c] ss:$16 sps:$4 sm:$0xff]  }
  0x79   :  { %584 = vmatprep.mubr.bf16.mxu1 %v8631_v1  ;;  %2062 = vmatpush1.bf16.msra.mxu1 %v8069_v38 }
  0x7a   :  { %2063 = vmatprep.subr.bf16.mxu1 %v8074_v42 }
  0x7b   :  { %1678 = vmatpush1.bf16.msra.mxu0 %v8066_v43 }
  0x7c   :  { %1840 = vmatprep.subr.bf16.mxu0 %v8077_v48 }
  0x7d   :  { %2064 = vmatpush1.bf16.msra.mxu1 %v8072_v44 }
  0x7e   :  { %6749 = vmatmul.mubr.msk.bf16.gmra.mrb[32].mxu0 %vm230_vm0, %v128_v22  ;;  %2226 = vmatprep.subr.bf16.mxu1 %v8104_v56 }
  0x7f   :  { %401 = vmatprep.mubr.bf16.mxu0 %v8631_v1 }
  0x80   :  { %6765 = vmatmul.mubr.msk.bf16.gmra.mrb[32].mxu1 %vm230_vm0, %v128_v22 }
  0x81   :  { %594 = vmatprep.mubr.bf16.mxu1 %v8631_v1 }
  0x86   :  { %6750 = vmatmul.mubr.msk.bf16.gmra.mrb[36].mxu0 %vm230_vm0, %v129_v29 }
  0x87   :  { %411 = vmatprep.mubr.bf16.mxu0 %v8631_v1 }
  0x88   :  { %6766 = vmatmul.mubr.msk.bf16.gmra.mrb[36].mxu1 %vm230_vm0, %v129_v29 }
  0x89   :  { %604 = vmatprep.mubr.bf16.mxu1 %v8631_v1 }
  0x8e   :  { %6751 = vmatmul.mubr.msk.bf16.gmra.mrb[40].mxu0 %vm230_vm0, %v130_v33 }
  0x8f   :  { %421 = vmatprep.mubr.bf16.mxu0 %v8631_v1 }
  0x90   :  { %6767 = vmatmul.mubr.msk.bf16.gmra.mrb[40].mxu1 %vm230_vm0, %v130_v33 }
  0x91   :  { %614 = vmatprep.mubr.bf16.mxu1 %v8631_v1 }
  0x96   :  { %6752 = vmatmul.mubr.msk.bf16.gmra.mrb[44].mxu0 %vm230_vm0, %v131_v36 }
  0x97   :  { %431 = vmatprep.mubr.bf16.mxu0 %v8631_v1 }
  0x98   :  { %6768 = vmatmul.mubr.msk.bf16.gmra.mrb[44].mxu1 %vm230_vm0, %v131_v36  ;;  %v8105_v36 = vld [vmem:[#allocation3 + $0x228] ss:$16 sps:$4 sm:$0xff]  }
  0x99   :  { %624 = vmatprep.mubr.bf16.mxu1 %v8631_v1 }
  0x9e   :  { %6753 = vmatmul.mubr.msk.bf16.gmra.mrb[48].mxu0 %vm230_vm0, %v132_v45 }
  0x9f   :  { %441 = vmatprep.mubr.bf16.mxu0 %v8631_v1 }
  0xa0   :  { %6769 = vmatmul.mubr.msk.bf16.gmra.mrb[48].mxu1 %vm230_vm0, %v132_v45 }
  0xa1   :  { %634 = vmatprep.mubr.bf16.mxu1 %v8631_v1 }
  0xa6   :  { %6754 = vmatmul.mubr.msk.bf16.gmra.mrb[52].mxu0 %vm230_vm0, %v133_v49 }
  0xa7   :  { %451 = vmatprep.mubr.bf16.mxu0 %v8631_v1 }
  0xa8   :  { %6770 = vmatmul.mubr.msk.bf16.gmra.mrb[52].mxu1 %vm230_vm0, %v133_v49 }
  0xa9   :  { %644 = vmatprep.mubr.bf16.mxu1 %v8631_v1 }
  0xae   :  { %6755 = vmatmul.mubr.msk.bf16.gmra.mrb[56].mxu0 %vm230_vm0, %v134_v52 }
  0xaf   :  { %461 = vmatprep.mubr.bf16.mxu0 %v8631_v1 }
  0xb0   :  { %6771 = vmatmul.mubr.msk.bf16.gmra.mrb[56].mxu1 %vm230_vm0, %v134_v52 }
  0xb1   :  { %654 = vmatprep.mubr.bf16.mxu1 %v8631_v1 }
  0xb6   :  { %6756 = vmatmul.mubr.msk.bf16.gmra.mrb[60].mxu0 %vm230_vm0, %v135_v55 }
  0xb8   :  { %6772 = vmatmul.mubr.msk.bf16.gmra.mrb[60].mxu1 %vm230_vm0, %v135_v55 }
 0x111   :  { %v313_v0 = vpop.f32.mrb[0].mxu0 }
 0x112   :  { %v314_v2 = vadd.f32 %v313_v0, %v8945_v62  ;;  %v315_v3 = vpop.f32.mrb[1].mxu0  ;;  %v8086_v0 = vld [vmem:[#allocation3 + $0x264] ss:$16 sps:$4 sm:$0xff]  }
 0x113   :  { %v316_v4 = vadd.f32 %v315_v3, %v8948_v63  ;;  %v317_v5 = vpop.f32.mrb[2].mxu0  ;;  %v506_v28 = vpop.f32.mrb[0].mxu1 }
 0x114   :  { %v318_v6 = vadd.f32 %v317_v5, %v8945_v62  ;;  %v319_v7 = vpop.f32.mrb[3].mxu0  ;;  %v665_v11 = vmax.f32 %v314_v2, 0.0  ;;  %v507_v32 = vadd.f32 %v506_v28, %v8961_v16  ;;  %v508_v33 = vpop.f32.mrb[1].mxu1  ;;  %v8116_v2 = vld [vmem:[#allocation3 + $0x26c] ss:$16 sps:$4 sm:$0xff]  }
 0x115   :  { %v320_v9 = vadd.f32 %v319_v7, %v8948_v63  ;;  %v666_v13 = vmax.f32 %v316_v4, 0.0  ;;  %v509_v37 = vadd.f32 %v508_v33, %v8964_v21  ;;  %v510_v38 = vpop.f32.mrb[2].mxu1 }
 0x116   :  { %v669_v12 = vmax.f32 %v318_v6, 0.0  ;;  %v667_v42 = vmax.f32 %v507_v32, 0.0  ;;  %v511_v43 = vadd.f32 %v510_v38, %v8961_v16  ;;  %v512_v44 = vpop.f32.mrb[3].mxu1 }
 0x117   :  { %v670_v14 = vmax.f32 %v320_v9, 0.0  ;;  %v668_v47 = vmax.f32 %v509_v37, 0.0  ;;  %v513_v48 = vadd.f32 %v512_v44, %v8964_v21  ;;  %v8120_v37 = vld [vmem:[#allocation3 + $0x288] ss:$16 sps:$4 sm:$0xff]  }
 0x118   :  { %v793_v15 = vpack.c.bf16 %v669_v12, %v665_v11  ;;  %v671_v50 = vmax.f32 %v511_v43, 0.0  ;;  %v8084_v12 = vld [vmem:[#allocation3 + $0x260] ss:$16 sps:$4 sm:$0xff]  }
 0x119   :  { %v323_v17 = vpop.f32.mrb[4].mxu0  ;;  %v794_v18 = vpack.c.bf16 %v670_v14, %v666_v13  ;;  %v672_v55 = vmax.f32 %v513_v48, 0.0 }
 0x11a   :  { %v324_v22 = vadd.f32 %v323_v17, %v8945_v62  ;;  %v325_v23 = vpop.f32.mrb[5].mxu0  ;;  %v8975_v3 = vpack.c.bf16 %v671_v50, %v667_v42  ;;  %v8089_v17 = vld [vmem:[#allocation3 + $0x284] ss:$16 sps:$4 sm:$0xff]   ;;  %v8125_v42 = vld [vmem:[#allocation3 + $0x2ac] ss:$16 sps:$4 sm:$0xff]  }
 0x11b   :  { %v326_v26 = vadd.f32 %v325_v23, %v8948_v63  ;;  %v327_v27 = vpop.f32.mrb[6].mxu0  ;;  %1679 = vmatprep.mubr.bf16.mxu0 %v794_v18  ;;  %2065 = vmatprep.mubr.bf16.mxu1 %v794_v18  ;;  %v516_v6 = vpop.f32.mrb[4].mxu1  ;;  %v8978_v7 = vpack.c.bf16 %v672_v55, %v668_v47  ;;  %v8114_v18 = vld [vmem:[#allocation3 + $0x268] ss:$16 sps:$4 sm:$0xff]   ;;  %v8090_v50 = vld [vmem:[#allocation3 + $0x2a0] ss:$16 sps:$4 sm:$0xff]  }
 0x11c   :  { %v328_v29 = vadd.f32 %v327_v27, %v8945_v62  ;;  %v329_v30 = vpop.f32.mrb[7].mxu0  ;;  %1680 = vmatmul.mubr.bf16.vlgmr.msra.gmra.mrb[64].mxu0 %v793_v15  ;;  %2066 = vmatmul.mubr.bf16.vlgmr.msra.gmra.mrb[64].mxu1 %v793_v15  ;;  %v673_v39 = vmax.f32 %v324_v22, 0.0  ;;  %v517_v13 = vadd.f32 %v516_v6, %v8961_v16  ;;  %v518_v14 = vpop.f32.mrb[5].mxu1  ;;  %v8123_v55 = vld [vmem:[#allocation3 + $0x2a8] ss:$16 sps:$4 sm:$0xff]  }
 0x11d   :  { %v330_v34 = vadd.f32 %v329_v30, %v8948_v63  ;;  %1841 = vmatpush1.bf16.msra.mxu0 %v8075_v19  ;;  %2227 = vmatpush1.bf16.msra.mxu1 %v8102_v20  ;;  %v674_v45 = vmax.f32 %v326_v26, 0.0  ;;  %v519_v19 = vadd.f32 %v518_v14, %v8964_v21  ;;  %v520_v20 = vpop.f32.mrb[6].mxu1 }
 0x11e   :  { %v677_v40 = vmax.f32 %v328_v29, 0.0  ;;  %1842 = vmatprep.subr.bf16.mxu0 %v8080_v24  ;;  %2228 = vmatprep.subr.bf16.mxu1 %v8107_v25  ;;  %v8122_v24 = vld [vmem:[#allocation3 + $0x28c] ss:$16 sps:$4 sm:$0xff]   ;;  %v675_v25 = vmax.f32 %v517_v13, 0.0  ;;  %v521_v26 = vadd.f32 %v520_v20, %v8961_v16  ;;  %v522_v27 = vpop.f32.mrb[7].mxu1 }
 0x11f   :  { %v678_v46 = vmax.f32 %v330_v34, 0.0  ;;  %v676_v30 = vmax.f32 %v519_v19, 0.0  ;;  %v8093_v20 = vld [vmem:[#allocation3 + $0x2c0] ss:$16 sps:$4 sm:$0xff]  }
 0x120   :  { %v797_v49 = vpack.c.bf16 %v677_v40, %v673_v39  ;;  %v679_v33 = vmax.f32 %v521_v26, 0.0  ;;  %v8098_v26 = vld [vmem:[#allocation3 + $0x2e4] ss:$16 sps:$4 sm:$0xff]  }
 0x121   :  { %v798_v51 = vpack.c.bf16 %v678_v46, %v674_v45  ;;  %v333_v52 = vpop.f32.mrb[8].mxu0  ;;  %1843 = vmatpush1.bf16.msra.mxu0 %v8078_v31  ;;  %2229 = vmatpush1.bf16.msra.mxu1 %v8105_v36  ;;  %v523_v31 = vadd.f32 %v522_v27, %v8964_v21  ;;  %v8087_v36 = vld [vmem:[#allocation3 + $0x280] ss:$16 sps:$4 sm:$0xff]   ;;  %v8134_v27 = vld [vmem:[#allocation3 + $0x2ec] ss:$16 sps:$4 sm:$0xff]  }
 0x122   :  { %v334_v56 = vadd.f32 %v333_v52, %v8945_v62  ;;  %v335_v60 = vpop.f32.mrb[9].mxu0  ;;  %1844 = vmatprep.subr.bf16.mxu0 %v8083_v35  ;;  %2230 = vmatprep.subr.bf16.mxu1 %v8113_v41  ;;  %v8092_v41 = vld [vmem:[#allocation3 + $0x2a4] ss:$16 sps:$4 sm:$0xff]   ;;  %v8987_v43 = vpack.c.bf16 %v679_v33, %v675_v25 }
 0x123   :  { %v336_v4 = vadd.f32 %v335_v60, %v8948_v63  ;;  %v337_v5 = vpop.f32.mrb[10].mxu0  ;;  %1689 = vmatprep.mubr.bf16.mxu0 %v798_v51  ;;  %2075 = vmatprep.mubr.bf16.mxu1 %v798_v51  ;;  %v680_v38 = vmax.f32 %v523_v31, 0.0  ;;  %v526_v47 = vpop.f32.mrb[8].mxu1 }
 0x124   :  { %v338_v9 = vadd.f32 %v337_v5, %v8945_v62  ;;  %v339_v11 = vpop.f32.mrb[11].mxu0  ;;  %1690 = vmatmul.mubr.bf16.gmra.mrb[68].mxu0 %v797_v49  ;;  %2076 = vmatmul.mubr.bf16.gmra.mrb[68].mxu1 %v797_v49  ;;  %v681_v22 = vmax.f32 %v334_v56, 0.0  ;;  %v527_v51 = vadd.f32 %v526_v47, %v8961_v16  ;;  %v528_v52 = vpop.f32.mrb[9].mxu1  ;;  %v8140_v47 = vld [vmem:[#allocation3 + $0x30c] ss:$16 sps:$4 sm:$0xff]  }
 0x125   :  { %v340_v15 = vadd.f32 %v339_v11, %v8948_v63  ;;  %1845 = vmatpush1.bf16.msra.mxu0 %v8081_v53  ;;  %2231 = vmatpush1.bf16.msra.mxu1 %v8111_v54  ;;  %v682_v28 = vmax.f32 %v336_v4, 0.0  ;;  %v8990_v46 = vpack.c.bf16 %v680_v38, %v676_v30  ;;  %v8095_v54 = vld [vmem:[#allocation3 + $0x2c4] ss:$16 sps:$4 sm:$0xff]   ;;  %v529_v56 = vadd.f32 %v528_v52, %v8964_v21  ;;  %v530_v60 = vpop.f32.mrb[10].mxu1  ;;  %v8131_v4 = vld [vmem:[#allocation3 + $0x2cc] ss:$16 sps:$4 sm:$0xff]  }
 0x126   :  { %v685_v23 = vmax.f32 %v338_v9, 0.0  ;;  %1846 = vmatprep.subr.bf16.mxu0 %v8086_v0  ;;  %2232 = vmatprep.subr.bf16.mxu1 %v8116_v2  ;;  %v683_v5 = vmax.f32 %v527_v51, 0.0  ;;  %v531_v6 = vadd.f32 %v530_v60, %v8961_v16  ;;  %v532_v9 = vpop.f32.mrb[11].mxu1 }
 0x127   :  { %v686_v29 = vmax.f32 %v340_v15, 0.0  ;;  %v684_v13 = vmax.f32 %v529_v56, 0.0  ;;  %v533_v14 = vadd.f32 %v532_v9, %v8964_v21 }
 0x128   :  { %v801_v32 = vpack.c.bf16 %v685_v23, %v681_v22  ;;  %v8129_v22 = vld [vmem:[#allocation3 + $0x2c8] ss:$16 sps:$4 sm:$0xff]  }
 0x129   :  { %v802_v34 = vpack.c.bf16 %v686_v29, %v682_v28  ;;  %v343_v35 = vpop.f32.mrb[12].mxu0  ;;  %1847 = vmatpush1.bf16.msra.mxu0 %v8084_v12  ;;  %2233 = vmatpush1.bf16.msra.mxu1 %v8114_v18  ;;  %v688_v23 = vmax.f32 %v533_v14, 0.0 }
 0x12a   :  { %v344_v39 = vadd.f32 %v343_v35, %v8945_v62  ;;  %v345_v40 = vpop.f32.mrb[13].mxu0  ;;  %1848 = vmatprep.subr.bf16.mxu0 %v8089_v17  ;;  %2234 = vmatprep.subr.bf16.mxu1 %v8122_v24  ;;  %v687_v17 = vmax.f32 %v531_v6, 0.0  ;;  %v8096_v35 = vld [vmem:[#allocation3 + $0x2e0] ss:$16 sps:$4 sm:$0xff]  }
 0x12b   :  { %v346_v44 = vadd.f32 %v345_v40, %v8948_v63  ;;  %v347_v45 = vpop.f32.mrb[14].mxu0  ;;  %1699 = vmatprep.mubr.bf16.mxu0 %v802_v34  ;;  %2085 = vmatprep.mubr.bf16.mxu1 %v802_v34  ;;  %v9002_v31 = vpack.c.bf16 %v688_v23, %v684_v13  ;;  %v8132_v40 = vld [vmem:[#allocation3 + $0x2e8] ss:$16 sps:$4 sm:$0xff]  }
 0x12c   :  { %v348_v48 = vadd.f32 %v347_v45, %v8945_v62  ;;  %v349_v49 = vpop.f32.mrb[15].mxu0  ;;  %1700 = vmatmul.mubr.bf16.gmra.mrb[72].mxu0 %v801_v32  ;;  %2086 = vmatmul.mubr.bf16.gmra.mrb[72].mxu1 %v801_v32  ;;  %v689_v0 = vmax.f32 %v344_v39, 0.0  ;;  %v8999_v28 = vpack.c.bf16 %v687_v17, %v683_v5  ;;  %v536_v32 = vpop.f32.mrb[12].mxu1  ;;  %v8101_v39 = vld [vmem:[#allocation3 + $0x304] ss:$16 sps:$4 sm:$0xff]  }
 0x12d   :  { %v350_v53 = vadd.f32 %v349_v49, %v8948_v63  ;;  %1849 = vmatpush1.bf16.msra.mxu0 %v8087_v36  ;;  %2235 = vmatpush1.bf16.msra.mxu1 %v8120_v37  ;;  %v690_v11 = vmax.f32 %v346_v44, 0.0  ;;  %v537_v36 = vadd.f32 %v536_v32, %v8961_v16  ;;  %v538_v37 = vpop.f32.mrb[13].mxu1 }
 0x12e   :  { %v693_v2 = vmax.f32 %v348_v48, 0.0  ;;  %1850 = vmatprep.subr.bf16.mxu0 %v8092_v41  ;;  %2236 = vmatprep.subr.bf16.mxu1 %v8125_v42  ;;  %v539_v41 = vadd.f32 %v538_v37, %v8964_v21  ;;  %v540_v42 = vpop.f32.mrb[14].mxu1 }
 0x12f   :  { %v694_v12 = vmax.f32 %v350_v53, 0.0  ;;  %v691_v48 = vmax.f32 %v537_v36, 0.0  ;;  %v541_v49 = vadd.f32 %v540_v42, %v8961_v16 }
 0x130   :  { %v805_v15 = vpack.c.bf16 %v693_v2, %v689_v0  ;;  %v692_v53 = vmax.f32 %v539_v41, 0.0  ;;  %v8099_v2 = vld [vmem:[#allocation3 + $0x300] ss:$16 sps:$4 sm:$0xff]  }
 0x131   :  { %v806_v18 = vpack.c.bf16 %v694_v12, %v690_v11  ;;  %v353_v19 = vpop.f32.mrb[16].mxu0  ;;  %1851 = vmatpush1.bf16.msra.mxu0 %v8090_v50  ;;  %2237 = vmatpush1.bf16.msra.mxu1 %v8123_v55  ;;  %v542_v50 = vpop.f32.mrb[15].mxu1  ;;  %v695_v56 = vmax.f32 %v541_v49, 0.0  ;;  %v8110_v11 = vld [vmem:[#allocation3 + $0x324] ss:$16 sps:$4 sm:$0xff]  }
 0x132   :  { %v354_v24 = vadd.f32 %v353_v19, %v8945_v62  ;;  %v355_v25 = vpop.f32.mrb[17].mxu0  ;;  %1852 = vmatprep.subr.bf16.mxu0 %v8095_v54  ;;  %2238 = vmatprep.subr.bf16.mxu1 %v8131_v4  ;;  %v543_v54 = vadd.f32 %v542_v50, %v8964_v21  ;;  %v8138_v4 = vld [vmem:[#allocation3 + $0x308] ss:$16 sps:$4 sm:$0xff]   ;;  %v8143_v12 = vld [vmem:[#allocation3 + $0x32c] ss:$16 sps:$4 sm:$0xff]  }
 0x133   :  { %v356_v29 = vadd.f32 %v355_v25, %v8948_v63  ;;  %v357_v30 = vpop.f32.mrb[18].mxu0  ;;  %1709 = vmatprep.mubr.bf16.mxu0 %v806_v18  ;;  %2095 = vmatprep.mubr.bf16.mxu1 %v806_v18  ;;  %v9011_v13 = vpack.c.bf16 %v695_v56, %v691_v48  ;;  %v546_v18 = vpop.f32.mrb[16].mxu1  ;;  %v8128_v49 = vld [vmem:[#allocation3 + $0x364] ss:$16 sps:$4 sm:$0xff]   ;;  %v8147_v50 = vld [vmem:[#allocation3 + $0x348] ss:$16 sps:$4 sm:$0xff]  }
 0x134   :  { %v358_v33 = vadd.f32 %v357_v30, %v8945_v62  ;;  %v359_v34 = vpop.f32.mrb[19].mxu0  ;;  %1710 = vmatmul.mubr.bf16.gmra.mrb[76].mxu0 %v805_v15  ;;  %2096 = vmatmul.mubr.bf16.gmra.mrb[76].mxu1 %v805_v15  ;;  %v697_v44 = vmax.f32 %v354_v24, 0.0  ;;  %v696_v5 = vmax.f32 %v543_v54, 0.0  ;;  %v547_v23 = vadd.f32 %v546_v18, %v8961_v16  ;;  %v548_v24 = vpop.f32.mrb[17].mxu1  ;;  %v8152_v54 = vld [vmem:[#allocation3 + $0x36c] ss:$16 sps:$4 sm:$0xff]  }
 0x135   :  { %v360_v38 = vadd.f32 %v359_v34, %v8948_v63  ;;  %1853 = vmatpush1.bf16.msra.mxu0 %v8093_v20  ;;  %2239 = vmatpush1.bf16.msra.mxu1 %v8129_v22  ;;  %v698_v51 = vmax.f32 %v356_v29, 0.0  ;;  %v8108_v22 = vld [vmem:[#allocation3 + $0x320] ss:$16 sps:$4 sm:$0xff]   ;;  %v549_v29 = vadd.f32 %v548_v24, %v8964_v21  ;;  %v550_v30 = vpop.f32.mrb[18].mxu1  ;;  %v8149_v34 = vld [vmem:[#allocation3 + $0x34c] ss:$16 sps:$4 sm:$0xff]  }
 0x136   :  { %v701_v45 = vmax.f32 %v358_v33, 0.0  ;;  %1854 = vmatprep.subr.bf16.mxu0 %v8098_v26  ;;  %2240 = vmatprep.subr.bf16.mxu1 %v8134_v27  ;;  %v9014_v17 = vpack.c.bf16 %v696_v5, %v692_v53  ;;  %v8119_v26 = vld [vmem:[#allocation3 + $0x344] ss:$16 sps:$4 sm:$0xff]   ;;  %v8141_v27 = vld [vmem:[#allocation3 + $0x328] ss:$16 sps:$4 sm:$0xff]   ;;  %v551_v36 = vadd.f32 %v550_v30, %v8961_v16  ;;  %v552_v37 = vpop.f32.mrb[19].mxu1 }
 0x137   :  { %v702_v52 = vmax.f32 %v360_v38, 0.0  ;;  %v553_v41 = vadd.f32 %v552_v37, %v8964_v21  ;;  %v8632_v18 = vmov 1983009808  }
 0x138   :  { %v809_v55 = vpack.c.bf16 %v701_v45, %v697_v44  ;;  %v8117_v44 = vld [vmem:[#allocation3 + $0x340] ss:$16 sps:$4 sm:$0xff]   ;;  %v703_v45 = vmax.f32 %v551_v36, 0.0 }
 0x139   :  { %v810_v60 = vpack.c.bf16 %v702_v52, %v698_v51  ;;  %v363_v0 = vpop.f32.mrb[20].mxu0  ;;  %1855 = vmatpush1.bf16.msra.mxu0 %v8096_v35  ;;  %2241 = vmatpush1.bf16.msra.mxu1 %v8132_v40  ;;  %v699_v35 = vmax.f32 %v547_v23, 0.0  ;;  %v700_v40 = vmax.f32 %v549_v29, 0.0  ;;  %v704_v51 = vmax.f32 %v553_v41, 0.0 }
 0x13a   :  { %v364_v6 = vadd.f32 %v363_v0, %v8945_v62  ;;  %v365_v9 = vpop.f32.mrb[21].mxu0  ;;  %1856 = vmatprep.subr.bf16.mxu0 %v8101_v39  ;;  %2242 = vmatprep.subr.bf16.mxu1 %v8140_v47 }
 0x13b   :  { %v366_v14 = vadd.f32 %v365_v9, %v8948_v63  ;;  %v367_v15 = vpop.f32.mrb[22].mxu0  ;;  %1719 = vmatprep.mubr.bf16.mxu0 %v810_v60  ;;  %2105 = vmatprep.mubr.bf16.mxu1 %v810_v60  ;;  %v9026_v0 = vpack.c.bf16 %v704_v51, %v700_v40  ;;  %v8156_v40 = vld [vmem:[#allocation3 + $0x388] ss:$16 sps:$4 sm:$0xff]  }
 0x13c   :  { %v368_v19 = vadd.f32 %v367_v15, %v8945_v62  ;;  %v369_v20 = vpop.f32.mrb[23].mxu0  ;;  %1720 = vmatmul.mubr.bf16.gmra.mrb[80].mxu0 %v809_v55  ;;  %2106 = vmatmul.mubr.bf16.gmra.mrb[80].mxu1 %v809_v55  ;;  %v705_v32 = vmax.f32 %v364_v6, 0.0  ;;  %v9023_v55 = vpack.c.bf16 %v703_v45, %v699_v35  ;;  %v8126_v6 = vld [vmem:[#allocation3 + $0x360] ss:$16 sps:$4 sm:$0xff]   ;;  %v8150_v15 = vld [vmem:[#allocation3 + $0x368] ss:$16 sps:$4 sm:$0xff]  }
 0x13d   :  { %v370_v25 = vadd.f32 %v369_v20, %v8948_v63  ;;  %1857 = vmatpush1.bf16.msra.mxu0 %v8099_v2  ;;  %2243 = vmatpush1.bf16.msra.mxu1 %v8138_v4  ;;  %v706_v38 = vmax.f32 %v366_v14, 0.0  ;;  %v556_v2 = vpop.f32.mrb[20].mxu1  ;;  %v8137_v14 = vld [vmem:[#allocation3 + $0x384] ss:$16 sps:$4 sm:$0xff]  }
 0x13e   :  { %v709_v33 = vmax.f32 %v368_v19, 0.0  ;;  %1858 = vmatprep.subr.bf16.mxu0 %v8110_v11  ;;  %2244 = vmatprep.subr.bf16.mxu1 %v8143_v12  ;;  %v557_v9 = vadd.f32 %v556_v2, %v8961_v16  ;;  %v558_v11 = vpop.f32.mrb[21].mxu1  ;;  %v2615_v19 = vunpack.c.l.s4 %v8632_v18 }
 0x13f   :  { %v710_v39 = vmax.f32 %v370_v25, 0.0  ;;  %v559_v20 = vadd.f32 %v558_v11, %v8964_v21  ;;  %v8158_v25 = vld [vmem:[#allocation3 + $0x38c] ss:$16 sps:$4 sm:$0xff]  }
 0x140   :  { %v813_v42 = vpack.c.bf16 %v709_v33, %v705_v32  ;;  %v2616_v41 = vunpack.c.0.s8 %v2615_v19  ;;  %v8167_v19 = vld [vmem:[#allocation3 + $0x3cc] ss:$16 sps:$4 sm:$0xff]  }
 0x141   :  { %v814_v47 = vpack.c.bf16 %v710_v39, %v706_v38  ;;  %v373_v48 = vpop.f32.mrb[24].mxu0  ;;  %1859 = vmatpush1.bf16.msra.mxu0 %v8108_v22  ;;  %2245 = vmatpush1.bf16.msra.mxu1 %v8141_v27  ;;  %v560_v22 = vpop.f32.mrb[22].mxu1  ;;  %v708_v33 = vmax.f32 %v559_v20, 0.0  ;;  %v8135_v39 = vld [vmem:[#allocation3 + $0x380] ss:$16 sps:$4 sm:$0xff]  }
 0x142   :  { %v374_v52 = vadd.f32 %v373_v48, %v8945_v62  ;;  %v375_v53 = vpop.f32.mrb[25].mxu0  ;;  %1860 = vmatprep.subr.bf16.mxu0 %v8119_v26  ;;  %2246 = vmatprep.subr.bf16.mxu1 %v8149_v34  ;;  %v707_v26 = vmax.f32 %v557_v9, 0.0  ;;  %v561_v27 = vadd.f32 %v560_v22, %v8961_v16  ;;  %v562_v29 = vpop.f32.mrb[23].mxu1  ;;  %v8161_v48 = vld [vmem:[#allocation3 + $0x3ac] ss:$16 sps:$4 sm:$0xff]   ;;  %v9044_v11 = vsub.s32 %v2616_v41, %v8933_v58 }
 0x143   :  { %v376_v56 = vadd.f32 %v375_v53, %v8948_v63  ;;  %v377_v60 = vpop.f32.mrb[26].mxu0  ;;  %1729 = vmatprep.mubr.bf16.mxu0 %v814_v47  ;;  %2115 = vmatprep.mubr.bf16.mxu1 %v814_v47  ;;  %v563_v34 = vadd.f32 %v562_v29, %v8964_v21  ;;  %v8146_v47 = vld [vmem:[#allocation3 + $0x3a4] ss:$16 sps:$4 sm:$0xff]   ;;  %v566_v53 = vpop.f32.mrb[24].mxu1  ;;  %v8159_v9 = vld [vmem:[#allocation3 + $0x3a8] ss:$16 sps:$4 sm:$0xff]  }
 0x144   :  { %v378_v4 = vadd.f32 %v377_v60, %v8945_v62  ;;  %v379_v5 = vpop.f32.mrb[27].mxu0  ;;  %1730 = vmatmul.mubr.bf16.gmra.mrb[84].mxu0 %v813_v42  ;;  %2116 = vmatmul.mubr.bf16.gmra.mrb[84].mxu1 %v813_v42  ;;  %v713_v23 = vmax.f32 %v374_v52, 0.0  ;;  %v711_v36 = vmax.f32 %v561_v27, 0.0  ;;  %v8144_v60 = vld [vmem:[#allocation3 + $0x3a0] ss:$16 sps:$4 sm:$0xff]   ;;  %v567_v2 = vadd.f32 %v566_v53, %v8961_v16 }
 0x145   :  { %v380_v12 = vadd.f32 %v379_v5, %v8948_v63  ;;  %1861 = vmatpush1.bf16.msra.mxu0 %v8117_v44  ;;  %2247 = vmatpush1.bf16.msra.mxu1 %v8147_v50  ;;  %v714_v30 = vmax.f32 %v376_v56, 0.0  ;;  %v712_v42 = vmax.f32 %v563_v34, 0.0  ;;  %v8164_v41 = vld [vmem:[#allocation3 + $0x3e4] ss:$16 sps:$4 sm:$0xff]  }
 0x146   :  { %v717_v24 = vmax.f32 %v378_v4, 0.0  ;;  %1862 = vmatprep.subr.bf16.mxu0 %v8128_v49  ;;  %2248 = vmatprep.subr.bf16.mxu1 %v8152_v54  ;;  %v9035_v49 = vpack.c.bf16 %v711_v36, %v707_v26  ;;  %v568_v4 = vpop.f32.mrb[25].mxu1  ;;  %v715_v20 = vmax.f32 %v567_v2, 0.0  ;;  %v8165_v36 = vld [vmem:[#allocation3 + $0x3c8] ss:$16 sps:$4 sm:$0xff]  }
 0x147   :  { %v718_v32 = vmax.f32 %v380_v12, 0.0  ;;  %v9038_v52 = vpack.c.bf16 %v712_v42, %v708_v33  ;;  %v569_v12 = vadd.f32 %v568_v4, %v8964_v21  ;;  %v8170_v42 = vld [vmem:[#allocation3 + $0x3ec] ss:$16 sps:$4 sm:$0xff]   ;;  %v8162_v2 = vld [vmem:[#allocation3 + $0x3e0] ss:$16 sps:$4 sm:$0xff]  }
 0x148   :  { %v817_v35 = vpack.c.bf16 %v717_v24, %v713_v23  ;;  %v8168_v4 = vld [vmem:[#allocation3 + $0x3e8] ss:$16 sps:$4 sm:$0xff]  }
 0x149   :  { %v818_v37 = vpack.c.bf16 %v718_v32, %v714_v30  ;;  %v383_v38 = vpop.f32.mrb[28].mxu0  ;;  %1863 = vmatpush1.bf16.msra.mxu0 %v8126_v6  ;;  %2249 = vmatpush1.bf16.msra.mxu1 %v8150_v15  ;;  %v8155_v6 = vld [vmem:[#allocation3 + $0x3c4] ss:$16 sps:$4 sm:$0xff]   ;;  %v716_v26 = vmax.f32 %v569_v12, 0.0 }
 0x14a   :  { %v384_v44 = vadd.f32 %v383_v38, %v8945_v62  ;;  %v385_v45 = vpop.f32.mrb[29].mxu0  ;;  %1864 = vmatprep.subr.bf16.mxu0 %v8137_v14  ;;  %2250 = vmatprep.subr.bf16.mxu1 %v8158_v25  ;;  %v570_v14 = vpop.f32.mrb[26].mxu1  ;;  %v9052_v30 = vld [vmem:[%s10225_s7] sm:$0xff] }
 0x14b   :  { %v386_v50 = vadd.f32 %v385_v45, %v8948_v63  ;;  %v387_v51 = vpop.f32.mrb[30].mxu0  ;;  %1739 = vmatprep.mubr.bf16.mxu0 %v818_v37  ;;  %2125 = vmatprep.mubr.bf16.mxu1 %v818_v37  ;;  %v571_v22 = vadd.f32 %v570_v14, %v8961_v16  ;;  %v572_v23 = vpop.f32.mrb[27].mxu1  ;;  %v9056_v37 = vrot.slane %v9052_v30, %v9044_v11 }
 0x14c   :  { %v388_v54 = vadd.f32 %v387_v51, %v8945_v62  ;;  %v389_v56 = vpop.f32.mrb[31].mxu0  ;;  %1740 = vmatmul.mubr.bf16.gmra.mrb[88].mxu0 %v817_v35  ;;  %2126 = vmatmul.mubr.bf16.gmra.mrb[88].mxu1 %v817_v35  ;;  %v721_v15 = vmax.f32 %v384_v44, 0.0  ;;  %v573_v27 = vadd.f32 %v572_v23, %v8964_v21  ;;  %v8153_v35 = vld [vmem:[#allocation3 + $0x3c0] ss:$16 sps:$4 sm:$0xff]  }
 0x14d   :  { %v390_v5 = vadd.f32 %v389_v56, %v8948_v63  ;;  %1865 = vmatpush1.bf16.msra.mxu0 %v8135_v39  ;;  %2251 = vmatpush1.bf16.msra.mxu1 %v8156_v40  ;;  %v722_v24 = vmax.f32 %v386_v50, 0.0  ;;  %v719_v32 = vmax.f32 %v571_v22, 0.0  ;;  %v576_v50 = vpop.f32.mrb[28].mxu1 }
 0x14e   :  { %v725_v18 = vmax.f32 %v388_v54, 0.0  ;;  %1866 = vmatprep.subr.bf16.mxu0 %v8146_v47  ;;  %2252 = vmatprep.subr.bf16.mxu1 %v8161_v48  ;;  %v720_v38 = vmax.f32 %v573_v27, 0.0  ;;  %v577_v54 = vadd.f32 %v576_v50, %v8961_v16  ;;  %v578_v56 = vpop.f32.mrb[29].mxu1 }
 0x14f   :  { %v726_v25 = vmax.f32 %v390_v5, 0.0  ;;  %v9059_v44 = vpack.c.bf16 %v719_v32, %v715_v20  ;;  %v2628_v5 = vcombine.high %v9056_v37, %v9056_v37 }
 0x150   :  { %v821_v29 = vpack.c.bf16 %v725_v18, %v721_v15  ;;  %v9062_v48 = vpack.c.bf16 %v720_v38, %v716_v26  ;;  %v723_v15 = vmax.f32 %v577_v54, 0.0 }
 0x151   :  { %v822_v33 = vpack.c.bf16 %v726_v25, %v722_v24  ;;  %v393_v34 = vpop.f32.mrb[32].mxu0  ;;  %1867 = vmatpush1.bf16.msra.mxu0 %v8144_v60  ;;  %2253 = vmatpush1.bf16.msra.mxu1 %v8159_v9  ;;  %v580_v9 = vpop.f32.mrb[30].mxu1 }
 0x152   :  { %v394_v39 = vadd.f32 %v393_v34, %v8945_v62  ;;  %v395_v40 = vpop.f32.mrb[33].mxu0  ;;  %1868 = vmatprep.subr.bf16.mxu0 %v8155_v6  ;;  %2254 = vmatprep.subr.bf16.mxu1 %v8167_v19  ;;  %v579_v6 = vadd.f32 %v578_v56, %v8964_v21  ;;  %v581_v18 = vadd.f32 %v580_v9, %v8961_v16  ;;  %v582_v19 = vpop.f32.mrb[31].mxu1 }
 0x153   :  { %v396_v45 = vadd.f32 %v395_v40, %v8948_v63  ;;  %v397_v47 = vpop.f32.mrb[34].mxu0  ;;  %1749 = vmatprep.mubr.bf16.mxu0 %v822_v33  ;;  %2135 = vmatprep.mubr.bf16.mxu1 %v822_v33  ;;  %v583_v24 = vadd.f32 %v582_v19, %v8964_v21  ;;  %v586_v40 = vpop.f32.mrb[32].mxu1 }
 0x154   :  { %v398_v51 = vadd.f32 %v397_v47, %v8945_v62  ;;  %v399_v53 = vpop.f32.mrb[35].mxu0  ;;  %1750 = vmatmul.mubr.bf16.gmra.mrb[92].mxu0 %v821_v29  ;;  %2136 = vmatmul.mubr.bf16.gmra.mrb[92].mxu1 %v821_v29  ;;  %v729_v12 = vmax.f32 %v394_v39, 0.0  ;;  %v724_v23 = vmax.f32 %v579_v6, 0.0  ;;  %v727_v26 = vmax.f32 %v581_v18, 0.0  ;;  %v588_v47 = vpop.f32.mrb[33].mxu1 }
 0x155   :  { %v400_v60 = vadd.f32 %v399_v53, %v8948_v63  ;;  %1869 = vmatpush1.bf16.msra.mxu0 %v8153_v35  ;;  %2255 = vmatpush1.bf16.msra.mxu1 %v8165_v36  ;;  %v730_v20 = vmax.f32 %v396_v45, 0.0  ;;  %v728_v32 = vmax.f32 %v583_v24, 0.0  ;;  %v587_v45 = vadd.f32 %v586_v40, %v8961_v16  ;;  %v590_v53 = vpop.f32.mrb[34].mxu1 }
 0x156   :  { %v733_v14 = vmax.f32 %v398_v51, 0.0  ;;  %1870 = vmatprep.subr.bf16.mxu0 %v8164_v41  ;;  %2256 = vmatprep.subr.bf16.mxu1 %v8170_v42  ;;  %v9074_v35 = vpack.c.bf16 %v727_v26, %v723_v15  ;;  %v589_v51 = vadd.f32 %v588_v47, %v8964_v21 }
 0x157   :  { %v734_v22 = vmax.f32 %v400_v60, 0.0  ;;  %v9077_v39 = vpack.c.bf16 %v728_v32, %v724_v23  ;;  %v731_v60 = vmax.f32 %v587_v45, 0.0 }
 0x158   :  { %v825_v25 = vpack.c.bf16 %v733_v14, %v729_v12  ;;  %v732_v9 = vmax.f32 %v589_v51, 0.0 }
 0x159   :  { %v826_v27 = vpack.c.bf16 %v734_v22, %v730_v20  ;;  %v403_v29 = vpop.f32.mrb[36].mxu0  ;;  %1871 = vmatpush1.bf16.msra.mxu0 %v8162_v2  ;;  %2257 = vmatpush1.bf16.msra.mxu1 %v8168_v4  ;;  %v591_v2 = vadd.f32 %v590_v53, %v8961_v16  ;;  %v592_v4 = vpop.f32.mrb[35].mxu1 }
 0x15a   :  { %v404_v33 = vadd.f32 %v403_v29, %v8945_v62  ;;  %v405_v34 = vpop.f32.mrb[37].mxu0  ;;  %6901 = vmatprep.subr.msk.bf16.mxu0 %vm2679_vm1, %v2628_v5  ;;  %v593_v12 = vadd.f32 %v592_v4, %v8964_v21 }
 0x15b   :  { %v406_v36 = vadd.f32 %v405_v34, %v8948_v63  ;;  %v407_v38 = vpop.f32.mrb[38].mxu0  ;;  %1759 = vmatprep.mubr.bf16.mxu0 %v826_v27  ;;  %2145 = vmatprep.mubr.bf16.mxu1 %v826_v27  ;;  %v735_v15 = vmax.f32 %v591_v2, 0.0  ;;  %v596_v29 = vpop.f32.mrb[36].mxu1 }
 0x15c   :  { %v408_v41 = vadd.f32 %v407_v38, %v8945_v62  ;;  %v409_v42 = vpop.f32.mrb[39].mxu0  ;;  %1760 = vmatmul.mubr.bf16.gmra.mrb[96].mxu0 %v825_v25  ;;  %2146 = vmatmul.mubr.bf16.gmra.mrb[96].mxu1 %v825_v25  ;;  %v737_v54 = vmax.f32 %v404_v33, 0.0  ;;  %v736_v20 = vmax.f32 %v593_v12, 0.0  ;;  %v597_v34 = vadd.f32 %v596_v29, %v8961_v16 }
 0x15d   :  { %v410_v50 = vadd.f32 %v409_v42, %v8948_v63  ;;  %v738_v5 = vmax.f32 %v406_v36, 0.0  ;;  %v9086_v24 = vpack.c.bf16 %v735_v15, %v731_v60  ;;  %v598_v36 = vpop.f32.mrb[37].mxu1 }
 0x15e   :  { %v741_v56 = vmax.f32 %v408_v41, 0.0  ;;  %v9089_v27 = vpack.c.bf16 %v736_v20, %v732_v9  ;;  %v599_v40 = vadd.f32 %v598_v36, %v8964_v21  ;;  %v600_v41 = vpop.f32.mrb[38].mxu1  ;;  %v739_v47 = vmax.f32 %v597_v34, 0.0 }
 0x15f   :  { %v742_v6 = vmax.f32 %v410_v50, 0.0  ;;  %v601_v50 = vadd.f32 %v600_v41, %v8961_v16  ;;  %v602_v51 = vpop.f32.mrb[39].mxu1 }
 0x160   :  { %v829_v14 = vpack.c.bf16 %v741_v56, %v737_v54  ;;  %v740_v56 = vmax.f32 %v599_v40, 0.0  ;;  %v603_v60 = vadd.f32 %v602_v51, %v8964_v21 }
 0x161   :  { %v830_v18 = vpack.c.bf16 %v742_v6, %v738_v5  ;;  %v413_v19 = vpop.f32.mrb[40].mxu0  ;;  %v743_v4 = vmax.f32 %v601_v50, 0.0 }
 0x162   :  { %v414_v22 = vadd.f32 %v413_v19, %v8945_v62  ;;  %v415_v23 = vpop.f32.mrb[41].mxu0  ;;  %v744_v9 = vmax.f32 %v603_v60, 0.0 }
 0x163   :  { %v416_v25 = vadd.f32 %v415_v23, %v8948_v63  ;;  %v417_v26 = vpop.f32.mrb[42].mxu0  ;;  %1769 = vmatprep.mubr.bf16.mxu0 %v830_v18  ;;  %2155 = vmatprep.mubr.bf16.mxu1 %v830_v18  ;;  %v9098_v15 = vpack.c.bf16 %v743_v4, %v739_v47 }
 0x164   :  { %v418_v32 = vadd.f32 %v417_v26, %v8945_v62  ;;  %v419_v33 = vpop.f32.mrb[43].mxu0  ;;  %1770 = vmatmul.mubr.bf16.gmra.mrb[100].mxu0 %v829_v14  ;;  %2156 = vmatmul.mubr.bf16.gmra.mrb[100].mxu1 %v829_v14  ;;  %v745_v42 = vmax.f32 %v414_v22, 0.0  ;;  %v9101_v20 = vpack.c.bf16 %v744_v9, %v740_v56  ;;  %v606_v22 = vpop.f32.mrb[40].mxu1 }
 0x165   :  { %v420_v38 = vadd.f32 %v419_v33, %v8948_v63  ;;  %v746_v53 = vmax.f32 %v416_v25, 0.0  ;;  %v607_v26 = vadd.f32 %v606_v22, %v8961_v16  ;;  %v608_v29 = vpop.f32.mrb[41].mxu1 }
 0x166   :  { %v749_v45 = vmax.f32 %v418_v32, 0.0  ;;  %v609_v33 = vadd.f32 %v608_v29, %v8964_v21  ;;  %v610_v34 = vpop.f32.mrb[42].mxu1 }
 0x167   :  { %v750_v54 = vmax.f32 %v420_v38, 0.0  ;;  %v747_v40 = vmax.f32 %v607_v26, 0.0  ;;  %v611_v41 = vadd.f32 %v610_v34, %v8961_v16 }
 0x168   :  { %v833_v2 = vpack.c.bf16 %v749_v45, %v745_v42  ;;  %v612_v42 = vpop.f32.mrb[43].mxu1  ;;  %v748_v50 = vmax.f32 %v609_v33, 0.0 }
 0x169   :  { %v834_v5 = vpack.c.bf16 %v750_v54, %v746_v53  ;;  %v423_v6 = vpop.f32.mrb[44].mxu0  ;;  %v613_v51 = vadd.f32 %v612_v42, %v8964_v21  ;;  %v751_v54 = vmax.f32 %v611_v41, 0.0 }
 0x16a   :  { %v424_v12 = vadd.f32 %v423_v6, %v8945_v62  ;;  %v425_v14 = vpop.f32.mrb[45].mxu0 }
 0x16b   :  { %v426_v18 = vadd.f32 %v425_v14, %v8948_v63  ;;  %v427_v19 = vpop.f32.mrb[46].mxu0  ;;  %1779 = vmatprep.mubr.bf16.mxu0 %v834_v5  ;;  %2165 = vmatprep.mubr.bf16.mxu1 %v834_v5  ;;  %v9110_v6 = vpack.c.bf16 %v751_v54, %v747_v40 }
 0x16c   :  { %v428_v23 = vadd.f32 %v427_v19, %v8945_v62  ;;  %v429_v25 = vpop.f32.mrb[47].mxu0  ;;  %1780 = vmatmul.mubr.bf16.gmra.mrb[104].mxu0 %v833_v2  ;;  %2166 = vmatmul.mubr.bf16.gmra.mrb[104].mxu1 %v833_v2  ;;  %v753_v36 = vmax.f32 %v424_v12, 0.0  ;;  %v752_v2 = vmax.f32 %v613_v51, 0.0 }
 0x16d   :  { %v430_v32 = vadd.f32 %v429_v25, %v8948_v63  ;;  %v754_v45 = vmax.f32 %v426_v18, 0.0  ;;  %v616_v18 = vpop.f32.mrb[44].mxu1 }
 0x16e   :  { %v757_v38 = vmax.f32 %v428_v23, 0.0  ;;  %v9113_v14 = vpack.c.bf16 %v752_v2, %v748_v50  ;;  %v617_v23 = vadd.f32 %v616_v18, %v8961_v16  ;;  %v618_v25 = vpop.f32.mrb[45].mxu1 }
 0x16f   :  { %v758_v47 = vmax.f32 %v430_v32, 0.0  ;;  %v619_v29 = vadd.f32 %v618_v25, %v8964_v21  ;;  %v620_v32 = vpop.f32.mrb[46].mxu1 }
 0x170   :  { %v837_v53 = vpack.c.bf16 %v757_v38, %v753_v36  ;;  %v755_v36 = vmax.f32 %v617_v23, 0.0  ;;  %v621_v38 = vadd.f32 %v620_v32, %v8961_v16  ;;  %v622_v40 = vpop.f32.mrb[47].mxu1 }
 0x171   :  { %v838_v56 = vpack.c.bf16 %v758_v47, %v754_v45  ;;  %v433_v60 = vpop.f32.mrb[48].mxu0  ;;  %v756_v45 = vmax.f32 %v619_v29, 0.0  ;;  %v623_v47 = vadd.f32 %v622_v40, %v8964_v21 }
 0x172   :  { %v434_v4 = vadd.f32 %v433_v60, %v8945_v62  ;;  %v435_v5 = vpop.f32.mrb[49].mxu0  ;;  %v759_v51 = vmax.f32 %v621_v38, 0.0 }
 0x173   :  { %v436_v9 = vadd.f32 %v435_v5, %v8948_v63  ;;  %v437_v12 = vpop.f32.mrb[50].mxu0  ;;  %1789 = vmatprep.mubr.bf16.mxu0 %v838_v56  ;;  %2175 = vmatprep.mubr.bf16.mxu1 %v838_v56  ;;  %v760_v56 = vmax.f32 %v623_v47, 0.0  ;;  %v626_v18 = vpop.f32.mrb[48].mxu1 }
 0x174   :  { %v438_v19 = vadd.f32 %v437_v12, %v8945_v62  ;;  %v439_v22 = vpop.f32.mrb[51].mxu0  ;;  %1790 = vmatmul.mubr.bf16.gmra.mrb[108].mxu0 %v837_v53  ;;  %2176 = vmatmul.mubr.bf16.gmra.mrb[108].mxu1 %v837_v53  ;;  %v761_v33 = vmax.f32 %v434_v4, 0.0  ;;  %v9122_v5 = vpack.c.bf16 %v759_v51, %v755_v36  ;;  %v627_v23 = vadd.f32 %v626_v18, %v8961_v16  ;;  %v628_v25 = vpop.f32.mrb[49].mxu1 }
 0x175   :  { %v440_v26 = vadd.f32 %v439_v22, %v8948_v63  ;;  %v762_v41 = vmax.f32 %v436_v9, 0.0  ;;  %v9125_v9 = vpack.c.bf16 %v760_v56, %v756_v45 }
 0x176   :  { %v765_v34 = vmax.f32 %v438_v19, 0.0  ;;  %v763_v38 = vmax.f32 %v627_v23, 0.0 }
 0x177   :  { %v766_v42 = vmax.f32 %v440_v26, 0.0  ;;  %v2613_v26 = vcombine.high %v9052_v30, %v9052_v30 }
 0x178   :  { %v841_v50 = vpack.c.bf16 %v765_v34, %v761_v33  ;;  %v629_v33 = vadd.f32 %v628_v25, %v8964_v21  ;;  %v630_v34 = vpop.f32.mrb[50].mxu1 }
 0x179   :  { %v842_v53 = vpack.c.bf16 %v766_v42, %v762_v41  ;;  %v443_v54 = vpop.f32.mrb[52].mxu0  ;;  %v631_v40 = vadd.f32 %v630_v34, %v8961_v16  ;;  %v632_v41 = vpop.f32.mrb[51].mxu1  ;;  %v9135_v42 = vrot.slane %v2613_v26, %v9044_v11 }
 0x17a   :  { %v444_v60 = vadd.f32 %v443_v54, %v8945_v62  ;;  %v445_v2 = vpop.f32.mrb[53].mxu0  ;;  %v633_v51 = vadd.f32 %v632_v41, %v8964_v21 }
 0x17b   :  { %v446_v4 = vadd.f32 %v445_v2, %v8948_v63  ;;  %v447_v12 = vpop.f32.mrb[54].mxu0  ;;  %1799 = vmatprep.mubr.bf16.mxu0 %v842_v53  ;;  %2185 = vmatprep.mubr.bf16.mxu1 %v842_v53  ;;  %v767_v53 = vmax.f32 %v631_v40, 0.0  ;;  %v2629_v54 = vcombine.high %v9135_v42, %v9135_v42  ;;  %v636_v23 = vpop.f32.mrb[52].mxu1 }
 0x17c   :  { %v448_v19 = vadd.f32 %v447_v12, %v8945_v62  ;;  %v449_v22 = vpop.f32.mrb[55].mxu0  ;;  %1800 = vmatmul.mubr.bf16.gmra.mrb[112].mxu0 %v841_v50  ;;  %2186 = vmatmul.mubr.bf16.gmra.mrb[112].mxu1 %v841_v50  ;;  %v769_v29 = vmax.f32 %v444_v60, 0.0  ;;  %v764_v50 = vmax.f32 %v629_v33, 0.0  ;;  %v768_v2 = vmax.f32 %v633_v51, 0.0 }
 0x17d   :  { %v450_v32 = vadd.f32 %v449_v22, %v8948_v63  ;;  %v770_v45 = vmax.f32 %v446_v4, 0.0  ;;  %6918 = vmatprep.subr.msk.bf16.mxu1 %vm2679_vm1, %v2629_v54 }
 0x17e   :  { %v773_v36 = vmax.f32 %v448_v19, 0.0  ;;  %v9141_v19 = vpack.c.bf16 %v767_v53, %v763_v38  ;;  %v9145_v22 = vpack.c.bf16 %v768_v2, %v764_v50 }
 0x17f   :  { %v774_v47 = vmax.f32 %v450_v32, 0.0  ;;  %v638_v32 = vpop.f32.mrb[53].mxu1 }
 0x180   :  { %v845_v30 = vpack.c.bf16 %v773_v36, %v769_v29  ;;  %v637_v29 = vadd.f32 %v636_v23, %v8961_v16  ;;  %v639_v34 = vadd.f32 %v638_v32, %v8964_v21  ;;  %v640_v36 = vpop.f32.mrb[54].mxu1 }
 0x181   :  { %v846_v56 = vpack.c.bf16 %v774_v47, %v770_v45  ;;  %v453_v60 = vpop.f32.mrb[56].mxu0  ;;  %v641_v45 = vadd.f32 %v640_v36, %v8961_v16  ;;  %v642_v47 = vpop.f32.mrb[55].mxu1 }
 0x182   :  { %v454_v12 = vadd.f32 %v453_v60, %v8945_v62  ;;  %v455_v18 = vpop.f32.mrb[57].mxu0  ;;  %v771_v41 = vmax.f32 %v637_v29, 0.0  ;;  %v772_v53 = vmax.f32 %v639_v34, 0.0  ;;  %v643_v54 = vadd.f32 %v642_v47, %v8964_v21 }
 0x183   :  { %v456_v11 = vadd.f32 %v455_v18, %v8948_v63  ;;  %v457_v4 = vpop.f32.mrb[58].mxu0  ;;  %1809 = vmatprep.mubr.bf16.mxu0 %v846_v56  ;;  %2195 = vmatprep.mubr.bf16.mxu1 %v846_v56  ;;  %v775_v56 = vmax.f32 %v641_v45, 0.0  ;;  %v646_v29 = vpop.f32.mrb[56].mxu1 }
 0x184   :  { %v458_v25 = vadd.f32 %v457_v4, %v8945_v62  ;;  %v459_v26 = vpop.f32.mrb[59].mxu0  ;;  %1810 = vmatmul.mubr.bf16.gmra.mrb[116].mxu0 %v845_v30  ;;  %2196 = vmatmul.mubr.bf16.gmra.mrb[116].mxu1 %v845_v30  ;;  %v777_v38 = vmax.f32 %v454_v12, 0.0  ;;  %v776_v18 = vmax.f32 %v643_v54, 0.0  ;;  %v647_v34 = vadd.f32 %v646_v29, %v8961_v16  ;;  %v648_v36 = vpop.f32.mrb[57].mxu1 }
 0x185   :  { %v460_v33 = vadd.f32 %v459_v26, %v8948_v63  ;;  %v778_v50 = vmax.f32 %v456_v11, 0.0  ;;  %v9154_v26 = vpack.c.bf16 %v775_v56, %v771_v41  ;;  %v650_v41 = vpop.f32.mrb[58].mxu1 }
 0x186   :  { %v781_v40 = vmax.f32 %v458_v25, 0.0  ;;  %v9157_v11 = vpack.c.bf16 %v776_v18, %v772_v53  ;;  %v652_v53 = vpop.f32.mrb[59].mxu1 }
 0x187   :  { %v782_v51 = vmax.f32 %v460_v33, 0.0 }
 0x188   :  { %v849_v30 = vpack.c.bf16 %v781_v40, %v777_v38  ;;  %v649_v40 = vadd.f32 %v648_v36, %v8964_v21 }
 0x189   :  { %v850_v60 = vpack.c.bf16 %v782_v51, %v778_v50  ;;  %v463_v2 = vpop.f32.mrb[60].mxu0  ;;  %v779_v50 = vmax.f32 %v647_v34, 0.0  ;;  %v651_v51 = vadd.f32 %v650_v41, %v8961_v16 }
 0x18a   :  { %v464_v4 = vadd.f32 %v463_v2, %v8945_v62  ;;  %v465_v23 = vpop.f32.mrb[61].mxu0 }
 0x18b   :  { %v466_v12 = vadd.f32 %v465_v23, %v8948_v63  ;;  %v467_v25 = vpop.f32.mrb[62].mxu0  ;;  %1819 = vmatprep.mubr.bf16.mxu0 %v850_v60  ;;  %2205 = vmatprep.mubr.bf16.mxu1 %v850_v60  ;;  %v653_v60 = vadd.f32 %v652_v53, %v8964_v21  ;;  %v783_v2 = vmax.f32 %v651_v51, 0.0 }
 0x18c   :  { %v468_v32 = vadd.f32 %v467_v25, %v8945_v62  ;;  %v469_v33 = vpop.f32.mrb[63].mxu0  ;;  %1820 = vmatmul.mubr.bf16.gmra.mrb[120].mxu0 %v849_v30  ;;  %2206 = vmatmul.mubr.bf16.gmra.mrb[120].mxu1 %v849_v30  ;;  %v785_v45 = vmax.f32 %v464_v4, 0.0  ;;  %v780_v62 = vmax.f32 %v649_v40, 0.0  ;;  %v656_v4 = vpop.f32.mrb[60].mxu1 }
 0x18d   :  { %v470_v38 = vadd.f32 %v469_v33, %v8948_v63  ;;  %v786_v54 = vmax.f32 %v466_v12, 0.0  ;;  %v784_v23 = vmax.f32 %v653_v60, 0.0  ;;  %v9165_v25 = vpack.c.bf16 %v783_v2, %v779_v50  ;;  %v658_v12 = vpop.f32.mrb[61].mxu1  ;;  %v8192_v60 = vld [vmem:[#allocation5 + $0xc4] ss:$16 sps:$4 sm:$0xff]  }
 0x18e   :  { %v789_v47 = vmax.f32 %v468_v32, 0.0  ;;  %v657_v29 = vadd.f32 %v656_v4, %v8961_v16  ;;  %v659_v32 = vadd.f32 %v658_v12, %v8964_v21  ;;  %v660_v33 = vpop.f32.mrb[62].mxu1  ;;  %v2681_v50 = vsel %vm2679_vm1, %v9056_v37, 0  ;;  %v8202_v37 = vld [vmem:[#allocation5 + $0x28] ss:$16 sps:$4 sm:$0xff]  }
 0x18f   :  { %v790_v56 = vmax.f32 %v470_v38, 0.0  ;;  %v9167_v63 = vpack.c.bf16 %v784_v23, %v780_v62  ;;  %v661_v36 = vadd.f32 %v660_v33, %v8961_v16  ;;  %v662_v38 = vpop.f32.mrb[63].mxu1  ;;  %v8174_v16 = vld [vmem:[#allocation5 + $0x4] ss:$16 sps:$4 sm:$0xff]   ;;  %v8187_v62 = vld [vmem:[#allocation5 + $0xa0] ss:$16 sps:$4 sm:$0xff]  }
 0x190   :  { %v853_v30 = vpack.c.bf16 %v789_v47, %v785_v45  ;;  %v787_v34 = vmax.f32 %v657_v29, 0.0  ;;  %v788_v40 = vmax.f32 %v659_v32, 0.0  ;;  %v663_v41 = vadd.f32 %v662_v38, %v8964_v21  ;;  %v8201_v21 = vld [vmem:[#allocation5 + $0xc] ss:$16 sps:$4 sm:$0xff]   ;;  %v8193_v32 = vld [vmem:[#allocation5 + $0xe0] ss:$16 sps:$4 sm:$0xff]  }
 0x191   :  { %v854_v18 = vpack.c.bf16 %v790_v56, %v786_v54  ;;  %v791_v45 = vmax.f32 %v661_v36, 0.0  ;;  %v142_v54 = vld [vmem:[%s10219_s1 + $0x30] sm:$0xff]  ;;  %v143_v56 = vld [vmem:[%s10219_s1 + $0x38] sm:$0xff]  ;;  %v144_v29 = vld [vmem:[%s10219_s1 + $0x40] sm:$0xff] }
 0x192   :  { %v792_v47 = vmax.f32 %v663_v41, 0.0  ;;  %v171_v2 = vpack.c.bf16 %v143_v56, %v142_v54  ;;  %v8228_v23 = vld [vmem:[#allocation5 + $0xcc] ss:$16 sps:$4 sm:$0xff]   ;;  %v8198_v33 = vld [vmem:[#allocation5 + $0x104] ss:$16 sps:$4 sm:$0xff]  }
 0x193   :  { %1829 = vmatprep.mubr.bf16.mxu0 %v854_v18  ;;  %2215 = vmatprep.mubr.bf16.mxu1 %v854_v18  ;;  %v9177_v51 = vpack.c.bf16 %v791_v45, %v787_v34  ;;  %v8190_v18 = vld [vmem:[#allocation5 + $0xc0] ss:$16 sps:$4 sm:$0xff]   ;;  %v8231_v4 = vld [vmem:[#allocation5 + $0xec] ss:$16 sps:$4 sm:$0xff]   ;;  %v8229_v34 = vld [vmem:[#allocation5 + $0xe8] ss:$16 sps:$4 sm:$0xff]  }
 0x194   :  { %1830 = vmatmul.mubr.bf16.gmra.mrb[124].mxu0 %v853_v30  ;;  %2216 = vmatmul.mubr.bf16.gmra.mrb[124].mxu1 %v853_v30  ;;  %v9181_v53 = vpack.c.bf16 %v792_v47, %v788_v40  ;;  %v8220_v30 = vld [vmem:[#allocation5 + $0xa8] ss:$16 sps:$4 sm:$0xff]   ;;  %v8196_v38 = vld [vmem:[#allocation5 + $0x100] ss:$16 sps:$4 sm:$0xff]   ;;  %v8237_v40 = vld [vmem:[#allocation5 + $0x10c] ss:$16 sps:$4 sm:$0xff]  }
 0x195   :  { %1872 = vmatprep.mubr.bf16.mxu0 %v8978_v7  ;;  %2258 = vmatprep.mubr.bf16.mxu1 %v8978_v7  ;;  %v2687_v7 = vsel %vm2679_vm1, %v9135_v42, 0  ;;  %v8184_v42 = vld [vmem:[#allocation5 + $0x80] ss:$16 sps:$4 sm:$0xff]   ;;  %v145_v12 = vld [vmem:[%s10219_s1 + $0x48] sm:$0xff] }
 0x196   :  { %v172_v36 = vpack.c.bf16 %v145_v12, %v144_v29  ;;  %v8207_v41 = vld [vmem:[#allocation5 + $0x124] ss:$16 sps:$4 sm:$0xff]   ;;  %v8235_v45 = vld [vmem:[#allocation5 + $0x108] ss:$16 sps:$4 sm:$0xff]   ;;  %v8240_v47 = vld [vmem:[#allocation5 + $0x12c] ss:$16 sps:$4 sm:$0xff]  }
 0x197   :  { %v8259_v54 = vld [vmem:[#allocation5 + $0x1e0] ss:$16 sps:$4 sm:$0xff]   ;;  %v8265_v56 = vld [vmem:[#allocation5 + $0x1e8] ss:$16 sps:$4 sm:$0xff]  }
 0x198   :  { %v985_v29 = vld [vmem:[%s10223_s5] sm:$0xf]  ;;  %v158_v12 = vld [vmem:[%s10219_s1 + $0xb0] sm:$0xff] }
 0x19c   :  { %1873 = vmatmul.mubr.bf16.vlgmr.msra.gmra.mrb[64].mxu0 %v8975_v3  ;;  %2259 = vmatmul.mubr.bf16.vlgmr.msra.gmra.mrb[64].mxu1 %v8975_v3  ;;  %v136_v3 = vld [vmem:[%s10219_s1] sm:$0xff] }
 0x19d   :  { %2693 = vmatpush1.bf16.msra.mxu0 %v2681_v50  ;;  %1882 = vmatprep.mubr.bf16.mxu0 %v8990_v46  ;;  %v146_v50 = vld [vmem:[%s10219_s1 + $0x50] sm:$0xff] }
 0x19e   :  { %2268 = vmatprep.mubr.bf16.mxu1 %v8990_v46  ;;  %2886 = vmatpush1.bf16.msra.mxu1 %v2687_v7  ;;  %v8205_v7 = vld [vmem:[#allocation5 + $0x120] ss:$16 sps:$4 sm:$0xff]  }
 0x19f   :  { %3718 = vmatprep.subr.bf16.mxu0 %v8174_v16  ;;  %4104 = vmatprep.subr.bf16.mxu1 %v8201_v21  ;;  %v8238_v16 = vld [vmem:[#allocation5 + $0x128] ss:$16 sps:$4 sm:$0xff]  }
 0x1a4   :  { %1883 = vmatmul.mubr.bf16.gmra.mrb[68].mxu0 %v8987_v43  ;;  %2269 = vmatmul.mubr.bf16.gmra.mrb[68].mxu1 %v8987_v43  ;;  %v137_v43 = vld [vmem:[%s10219_s1 + $0x8] sm:$0xff] }
 0x1a5   :  { %1892 = vmatprep.mubr.bf16.mxu0 %v9002_v31  ;;  %2278 = vmatprep.mubr.bf16.mxu1 %v9002_v31  ;;  %v168_v46 = vpack.c.bf16 %v137_v43, %v136_v3  ;;  %v8177_v31 = vld [vmem:[#allocation5 + $0x24] ss:$16 sps:$4 sm:$0xff]   ;;  %v8214_v3 = vld [vmem:[#allocation5 + $0x140] ss:$16 sps:$4 sm:$0xff]   ;;  %v8246_v43 = vld [vmem:[#allocation5 + $0x14c] ss:$16 sps:$4 sm:$0xff]  }
 0x1ac   :  { %1893 = vmatmul.mubr.bf16.gmra.mrb[72].mxu0 %v8999_v28  ;;  %2279 = vmatmul.mubr.bf16.gmra.mrb[72].mxu1 %v8999_v28  ;;  %v8172_v28 = vld [vmem:[#allocation5] ss:$16 sps:$4 sm:$0xff]  }
 0x1ad   :  { %1902 = vmatprep.mubr.bf16.mxu0 %v9014_v17  ;;  %2288 = vmatprep.mubr.bf16.mxu1 %v9014_v17  ;;  %v8204_v17 = vld [vmem:[#allocation5 + $0x2c] ss:$16 sps:$4 sm:$0xff]  }
 0x1b4   :  { %1903 = vmatmul.mubr.bf16.gmra.mrb[76].mxu0 %v9011_v13  ;;  %2289 = vmatmul.mubr.bf16.gmra.mrb[76].mxu1 %v9011_v13  ;;  %v8199_v13 = vld [vmem:[#allocation5 + $0x8] ss:$16 sps:$4 sm:$0xff]  }
 0x1b5   :  { %1912 = vmatprep.mubr.bf16.mxu0 %v9026_v0  ;;  %2298 = vmatprep.mubr.bf16.mxu1 %v9026_v0  ;;  %v139_v0 = vld [vmem:[%s10219_s1 + $0x18] sm:$0xff] }
 0x1bc   :  { %1913 = vmatmul.mubr.bf16.gmra.mrb[80].mxu0 %v9023_v55  ;;  %2299 = vmatmul.mubr.bf16.gmra.mrb[80].mxu1 %v9023_v55  ;;  %v138_v55 = vld [vmem:[%s10219_s1 + $0x10] sm:$0xff] }
 0x1bd   :  { %1922 = vmatprep.mubr.bf16.mxu0 %v9038_v52  ;;  %2308 = vmatprep.mubr.bf16.mxu1 %v9038_v52  ;;  %v8180_v52 = vld [vmem:[#allocation5 + $0x44] ss:$16 sps:$4 sm:$0xff]  }
 0x1c4   :  { %1923 = vmatmul.mubr.bf16.gmra.mrb[84].mxu0 %v9035_v49  ;;  %2309 = vmatmul.mubr.bf16.gmra.mrb[84].mxu1 %v9035_v49  ;;  %v8175_v49 = vld [vmem:[#allocation5 + $0x20] ss:$16 sps:$4 sm:$0xff]  }
 0x1c5   :  { %1932 = vmatprep.mubr.bf16.mxu0 %v9062_v48  ;;  %2318 = vmatprep.mubr.bf16.mxu1 %v9062_v48  ;;  %v8178_v48 = vld [vmem:[#allocation5 + $0x40] ss:$16 sps:$4 sm:$0xff]  }
 0x1cc   :  { %1933 = vmatmul.mubr.bf16.gmra.mrb[88].mxu0 %v9059_v44  ;;  %2319 = vmatmul.mubr.bf16.gmra.mrb[88].mxu1 %v9059_v44  ;;  %v169_v44 = vpack.c.bf16 %v139_v0, %v138_v55  ;;  %v8223_v55 = vld [vmem:[#allocation5 + $0x160] ss:$16 sps:$4 sm:$0xff]   ;;  %v8234_v0 = vld [vmem:[#allocation5 + $0x184] ss:$16 sps:$4 sm:$0xff]  }
 0x1cd   :  { %1942 = vmatprep.mubr.bf16.mxu0 %v9077_v39  ;;  %2328 = vmatprep.mubr.bf16.mxu1 %v9077_v39  ;;  %v8183_v39 = vld [vmem:[#allocation5 + $0x64] ss:$16 sps:$4 sm:$0xff]  }
 0x1d4   :  { %1943 = vmatmul.mubr.bf16.gmra.mrb[92].mxu0 %v9074_v35  ;;  %2329 = vmatmul.mubr.bf16.gmra.mrb[92].mxu1 %v9074_v35  ;;  %v8210_v35 = vld [vmem:[#allocation5 + $0x4c] ss:$16 sps:$4 sm:$0xff]  }
 0x1d5   :  { %1952 = vmatprep.mubr.bf16.mxu0 %v9089_v27  ;;  %2338 = vmatprep.mubr.bf16.mxu1 %v9089_v27  ;;  %v8213_v27 = vld [vmem:[#allocation5 + $0x6c] ss:$16 sps:$4 sm:$0xff]  }
 0x1dc   :  { %1953 = vmatmul.mubr.bf16.gmra.mrb[96].mxu0 %v9086_v24  ;;  %2339 = vmatmul.mubr.bf16.gmra.mrb[96].mxu1 %v9086_v24  ;;  %v8208_v24 = vld [vmem:[#allocation5 + $0x48] ss:$16 sps:$4 sm:$0xff]  }
 0x1dd   :  { %1962 = vmatprep.mubr.bf16.mxu0 %v9101_v20  ;;  %2348 = vmatprep.mubr.bf16.mxu1 %v9101_v20  ;;  %v141_v20 = vld [vmem:[%s10219_s1 + $0x28] sm:$0xff] }
 0x1e4   :  { %1963 = vmatmul.mubr.bf16.gmra.mrb[100].mxu0 %v9098_v15  ;;  %2349 = vmatmul.mubr.bf16.gmra.mrb[100].mxu1 %v9098_v15  ;;  %v140_v15 = vld [vmem:[%s10219_s1 + $0x20] sm:$0xff] }
 0x1e5   :  { %1972 = vmatprep.mubr.bf16.mxu0 %v9113_v14  ;;  %2358 = vmatprep.mubr.bf16.mxu1 %v9113_v14  ;;  %v8186_v14 = vld [vmem:[#allocation5 + $0x84] ss:$16 sps:$4 sm:$0xff]  }
 0x1ec   :  { %1973 = vmatmul.mubr.bf16.gmra.mrb[104].mxu0 %v9110_v6  ;;  %2359 = vmatmul.mubr.bf16.gmra.mrb[104].mxu1 %v9110_v6  ;;  %v8181_v6 = vld [vmem:[#allocation5 + $0x60] ss:$16 sps:$4 sm:$0xff]  }
 0x1ed   :  { %1982 = vmatprep.mubr.bf16.mxu0 %v9125_v9  ;;  %2368 = vmatprep.mubr.bf16.mxu1 %v9125_v9  ;;  %v170_v9 = vpack.c.bf16 %v141_v20, %v140_v15  ;;  %v8241_v15 = vld [vmem:[#allocation5 + $0x1a0] ss:$16 sps:$4 sm:$0xff]   ;;  %v8252_v20 = vld [vmem:[#allocation5 + $0x1c4] ss:$16 sps:$4 sm:$0xff]  }
 0x1f4   :  { %1983 = vmatmul.mubr.bf16.gmra.mrb[108].mxu0 %v9122_v5  ;;  %2369 = vmatmul.mubr.bf16.gmra.mrb[108].mxu1 %v9122_v5  ;;  %v8211_v5 = vld [vmem:[#allocation5 + $0x68] ss:$16 sps:$4 sm:$0xff]  }
 0x1f5   :  { %1992 = vmatprep.mubr.bf16.mxu0 %v9145_v22  ;;  %2378 = vmatprep.mubr.bf16.mxu1 %v9145_v22  ;;  %v8189_v22 = vld [vmem:[#allocation5 + $0xa4] ss:$16 sps:$4 sm:$0xff]  }
 0x1fc   :  { %1993 = vmatmul.mubr.bf16.gmra.mrb[112].mxu0 %v9141_v19  ;;  %2379 = vmatmul.mubr.bf16.gmra.mrb[112].mxu1 %v9141_v19  ;;  %v8219_v19 = vld [vmem:[#allocation5 + $0x8c] ss:$16 sps:$4 sm:$0xff]  }
 0x1fd   :  { %2002 = vmatprep.mubr.bf16.mxu0 %v9157_v11  ;;  %2388 = vmatprep.mubr.bf16.mxu1 %v9157_v11  ;;  %v8222_v11 = vld [vmem:[#allocation5 + $0xac] ss:$16 sps:$4 sm:$0xff]  }
 0x204   :  { %2003 = vmatmul.mubr.bf16.gmra.mrb[116].mxu0 %v9154_v26  ;;  %2389 = vmatmul.mubr.bf16.gmra.mrb[116].mxu1 %v9154_v26  ;;  %v8217_v26 = vld [vmem:[#allocation5 + $0x88] ss:$16 sps:$4 sm:$0xff]  }
 0x205   :  { %2012 = vmatprep.mubr.bf16.mxu0 %v9167_v63  ;;  %2398 = vmatprep.mubr.bf16.mxu1 %v9167_v63  ;;  %v8226_v63 = vld [vmem:[#allocation5 + $0xc8] ss:$16 sps:$4 sm:$0xff]  }
 0x20c   :  { %2013 = vmatmul.mubr.bf16.gmra.mrb[120].mxu0 %v9165_v25  ;;  %2399 = vmatmul.mubr.bf16.gmra.mrb[120].mxu1 %v9165_v25  ;;  %v8195_v25 = vld [vmem:[#allocation5 + $0xe4] ss:$16 sps:$4 sm:$0xff]  }
 0x20d   :  { %2022 = vmatprep.mubr.bf16.mxu0 %v9181_v53  ;;  %2408 = vmatprep.mubr.bf16.mxu1 %v9181_v53  ;;  %v8216_v53 = vld [vmem:[#allocation5 + $0x144] ss:$16 sps:$4 sm:$0xff]  }
 0x214   :  { %2023 = vmatmul.mubr.bf16.gmra.mrb[124].mxu0 %v9177_v51  ;;  %2409 = vmatmul.mubr.bf16.gmra.mrb[124].mxu1 %v9177_v51  ;;  %v147_v51 = vld [vmem:[%s10219_s1 + $0x58] sm:$0xff] }
 0x215   :  { %2724 = vmatprep.mubr.bf16.mxu0 %v8631_v1  ;;  %2917 = vmatprep.mubr.bf16.mxu1 %v8631_v1  ;;  %v173_v21 = vpack.c.bf16 %v147_v51, %v146_v50 }
 0x21c   :  { %6902 = vmatmul.mubr.msk.bf16.vlgmr.msra.gmra.mrb[128].mxu0 %vm2630_vm2, %v168_v46  ;;  %6919 = vmatmul.mubr.msk.bf16.vlgmr.msra.gmra.mrb[128].mxu1 %vm2630_vm2, %v168_v46  ;;  %v8225_v46 = vld [vmem:[#allocation5 + $0x164] ss:$16 sps:$4 sm:$0xff]  }
 0x21d   :  { %3719 = vmatpush1.bf16.msra.mxu0 %v8172_v28  ;;  %2734 = vmatprep.mubr.bf16.mxu0 %v8631_v1  ;;  %v8244_v28 = vld [vmem:[#allocation5 + $0x148] ss:$16 sps:$4 sm:$0xff]  }
 0x21e   :  { %2927 = vmatprep.mubr.bf16.mxu1 %v8631_v1  ;;  %3720 = vmatprep.subr.bf16.mxu0 %v8177_v31  ;;  %v8249_v31 = vld [vmem:[#allocation5 + $0x16c] ss:$16 sps:$4 sm:$0xff]  }
 0x21f   :  { %4105 = vmatpush1.bf16.msra.mxu1 %v8199_v13  ;;  %v148_v13 = vld [vmem:[%s10219_s1 + $0x60] sm:$0xff] }
 0x220   :  { %4106 = vmatprep.subr.bf16.mxu1 %v8204_v17  ;;  %v149_v17 = vld [vmem:[%s10219_s1 + $0x68] sm:$0xff] }
 0x221   :  { %3721 = vmatpush1.bf16.msra.mxu0 %v8175_v49  ;;  %v8247_v49 = vld [vmem:[#allocation5 + $0x168] ss:$16 sps:$4 sm:$0xff]  }
 0x222   :  { %3722 = vmatprep.subr.bf16.mxu0 %v8180_v52  ;;  %v174_v52 = vpack.c.bf16 %v149_v17, %v148_v13 }
 0x223   :  { %4107 = vmatpush1.bf16.msra.mxu1 %v8202_v37  ;;  %v8232_v37 = vld [vmem:[#allocation5 + $0x180] ss:$16 sps:$4 sm:$0xff]  }
 0x224   :  { %6903 = vmatmul.mubr.msk.bf16.gmra.mrb[132].mxu0 %vm2630_vm2, %v169_v44  ;;  %6920 = vmatmul.mubr.msk.bf16.gmra.mrb[132].mxu1 %vm2630_vm2, %v169_v44  ;;  %v8255_v44 = vld [vmem:[#allocation5 + $0x18c] ss:$16 sps:$4 sm:$0xff]  }
 0x225   :  { %2744 = vmatprep.mubr.bf16.mxu0 %v8631_v1  ;;  %2937 = vmatprep.mubr.bf16.mxu1 %v8631_v1 }
 0x226   :  { %3723 = vmatpush1.bf16.msra.mxu0 %v8178_v48  ;;  %4108 = vmatprep.subr.bf16.mxu1 %v8210_v35  ;;  %v8243_v48 = vld [vmem:[#allocation5 + $0x1a4] ss:$16 sps:$4 sm:$0xff]   ;;  %v8253_v35 = vld [vmem:[#allocation5 + $0x188] ss:$16 sps:$4 sm:$0xff]  }
 0x227   :  { %3724 = vmatprep.subr.bf16.mxu0 %v8183_v39  ;;  %4109 = vmatpush1.bf16.msra.mxu1 %v8208_v24  ;;  %v8258_v39 = vld [vmem:[#allocation5 + $0x1ac] ss:$16 sps:$4 sm:$0xff]  }
 0x228   :  { %4110 = vmatprep.subr.bf16.mxu1 %v8213_v27  ;;  %v150_v24 = vld [vmem:[%s10219_s1 + $0x70] sm:$0xff]  ;;  %v151_v27 = vld [vmem:[%s10219_s1 + $0x78] sm:$0xff] }
 0x22a   :  { %3725 = vmatpush1.bf16.msra.mxu0 %v8181_v6  ;;  %v8256_v6 = vld [vmem:[#allocation5 + $0x1a8] ss:$16 sps:$4 sm:$0xff]  }
 0x22b   :  { %3726 = vmatprep.subr.bf16.mxu0 %v8186_v14  ;;  %4111 = vmatpush1.bf16.msra.mxu1 %v8211_v5  ;;  %v175_v14 = vpack.c.bf16 %v151_v27, %v150_v24  ;;  %v8250_v5 = vld [vmem:[#allocation5 + $0x1c0] ss:$16 sps:$4 sm:$0xff]  }
 0x22c   :  { %6904 = vmatmul.mubr.msk.bf16.gmra.mrb[136].mxu0 %vm2630_vm2, %v170_v9  ;;  %6921 = vmatmul.mubr.msk.bf16.gmra.mrb[136].mxu1 %vm2630_vm2, %v170_v9  ;;  %v8264_v9 = vld [vmem:[#allocation5 + $0x1cc] ss:$16 sps:$4 sm:$0xff]  }
 0x22d   :  { %2754 = vmatprep.mubr.bf16.mxu0 %v8631_v1  ;;  %2947 = vmatprep.mubr.bf16.mxu1 %v8631_v1 }
 0x22e   :  { %3727 = vmatpush1.bf16.msra.mxu0 %v8184_v42  ;;  %4112 = vmatprep.subr.bf16.mxu1 %v8219_v19  ;;  %v8261_v42 = vld [vmem:[#allocation5 + $0x1e4] ss:$16 sps:$4 sm:$0xff]   ;;  %v8262_v19 = vld [vmem:[#allocation5 + $0x1c8] ss:$16 sps:$4 sm:$0xff]  }
 0x22f   :  { %3728 = vmatprep.subr.bf16.mxu0 %v8189_v22  ;;  %4113 = vmatpush1.bf16.msra.mxu1 %v8217_v26  ;;  %v8267_v22 = vld [vmem:[#allocation5 + $0x1ec] ss:$16 sps:$4 sm:$0xff]  }
 0x230   :  { %4114 = vmatprep.subr.bf16.mxu1 %v8222_v11  ;;  %v152_v26 = vld [vmem:[%s10219_s1 + $0x80] sm:$0xff]  ;;  %v153_v11 = vld [vmem:[%s10219_s1 + $0x88] sm:$0xff] }
 0x232   :  { %3729 = vmatpush1.bf16.msra.mxu0 %v8187_v62  ;;  %v8270_v62 = vld [vmem:[#allocation5 + $0x204] ss:$16 sps:$4 sm:$0xff]  }
 0x233   :  { %3730 = vmatprep.subr.bf16.mxu0 %v8192_v60  ;;  %4115 = vmatpush1.bf16.msra.mxu1 %v8220_v30  ;;  %v176_v60 = vpack.c.bf16 %v153_v11, %v152_v26  ;;  %v8297_v30 = vld [vmem:[#allocation5 + $0x20c] ss:$16 sps:$4 sm:$0xff]  }
 0x234   :  { %6905 = vmatmul.mubr.msk.bf16.gmra.mrb[140].mxu0 %vm2630_vm2, %v171_v2  ;;  %6922 = vmatmul.mubr.msk.bf16.gmra.mrb[140].mxu1 %vm2630_vm2, %v171_v2  ;;  %v154_v2 = vld [vmem:[%s10219_s1 + $0x90] sm:$0xff] }
 0x235   :  { %2764 = vmatprep.mubr.bf16.mxu0 %v8631_v1  ;;  %2957 = vmatprep.mubr.bf16.mxu1 %v8631_v1 }
 0x236   :  { %3731 = vmatpush1.bf16.msra.mxu0 %v8190_v18  ;;  %4116 = vmatprep.subr.bf16.mxu1 %v8228_v23  ;;  %v155_v18 = vld [vmem:[%s10219_s1 + $0x98] sm:$0xff] }
 0x237   :  { %3732 = vmatprep.subr.bf16.mxu0 %v8195_v25  ;;  %4117 = vmatpush1.bf16.msra.mxu1 %v8226_v63  ;;  %v177_v23 = vpack.c.bf16 %v155_v18, %v154_v2  ;;  %v156_v25 = vld [vmem:[%s10219_s1 + $0xa0] sm:$0xff]  ;;  %v157_v63 = vld [vmem:[%s10219_s1 + $0xa8] sm:$0xff]  ;;  %v162_v2 = vld [vmem:[%s10219_s1 + $0xd0] sm:$0xff] }
 0x238   :  { %4118 = vmatprep.subr.bf16.mxu1 %v8231_v4  ;;  %v178_v4 = vpack.c.bf16 %v157_v63, %v156_v25  ;;  %v163_v18 = vld [vmem:[%s10219_s1 + $0xd8] sm:$0xff] }
 0x23a   :  { %3733 = vmatpush1.bf16.msra.mxu0 %v8193_v32  ;;  %v159_v32 = vld [vmem:[%s10219_s1 + $0xb8] sm:$0xff] }
 0x23b   :  { %3734 = vmatprep.subr.bf16.mxu0 %v8198_v33  ;;  %4119 = vmatpush1.bf16.msra.mxu1 %v8229_v34  ;;  %v9367_v33 = vrot.slane %v985_v29, %v8936_v59  ;;  %v9370_v34 = vrot.slane %v985_v29, %v8954_v8  ;;  %v179_v50 = vpack.c.bf16 %v159_v32, %v158_v12 }
 0x23c   :  { %6906 = vmatmul.mubr.msk.bf16.gmra.mrb[144].mxu0 %vm2630_vm2, %v172_v36  ;;  %6923 = vmatmul.mubr.msk.bf16.gmra.mrb[144].mxu1 %vm2630_vm2, %v172_v36 }
 0x23d   :  { %2774 = vmatprep.mubr.bf16.mxu0 %v8631_v1  ;;  %2967 = vmatprep.mubr.bf16.mxu1 %v8631_v1 }
 0x23e   :  { %3735 = vmatpush1.bf16.msra.mxu0 %v8196_v38  ;;  %4120 = vmatprep.subr.bf16.mxu1 %v8237_v40  ;;  %v9373_v40 = vrot.slane %v985_v29, %v8942_v61 }
 0x23f   :  { %3736 = vmatprep.subr.bf16.mxu0 %v8207_v41  ;;  %4121 = vmatpush1.bf16.msra.mxu1 %v8235_v45  ;;  %v9376_v41 = vrot.slane %v985_v29, %v8958_v10  ;;  %v181_v29 = vpack.c.bf16 %v163_v18, %v162_v2  ;;  %v166_v18 = vld [vmem:[%s10219_s1 + $0xf0] sm:$0xff] }
 0x240   :  { %4122 = vmatprep.subr.bf16.mxu1 %v8240_v47 }
 0x242   :  { %3737 = vmatpush1.bf16.msra.mxu0 %v8205_v7 }
 0x243   :  { %3738 = vmatprep.subr.bf16.mxu0 %v8216_v53  ;;  %4123 = vmatpush1.bf16.msra.mxu1 %v8238_v16 }
 0x244   :  { %6907 = vmatmul.mubr.msk.bf16.gmra.mrb[148].mxu0 %vm2630_vm2, %v173_v21  ;;  %6924 = vmatmul.mubr.msk.bf16.gmra.mrb[148].mxu1 %vm2630_vm2, %v173_v21 }
 0x245   :  { %2784 = vmatprep.mubr.bf16.mxu0 %v8631_v1  ;;  %2977 = vmatprep.mubr.bf16.mxu1 %v8631_v1 }
 0x246   :  { %3739 = vmatpush1.bf16.msra.mxu0 %v8214_v3  ;;  %4124 = vmatprep.subr.bf16.mxu1 %v8246_v43 }
 0x247   :  { %3740 = vmatprep.subr.bf16.mxu0 %v8225_v46  ;;  %4125 = vmatpush1.bf16.msra.mxu1 %v8244_v28 }
 0x248   :  { %4126 = vmatprep.subr.bf16.mxu1 %v8249_v31 }
 0x24a   :  { %3741 = vmatpush1.bf16.msra.mxu0 %v8223_v55 }
 0x24b   :  { %3742 = vmatprep.subr.bf16.mxu0 %v8234_v0  ;;  %4127 = vmatpush1.bf16.msra.mxu1 %v8247_v49 }
 0x24c   :  { %6908 = vmatmul.mubr.msk.bf16.gmra.mrb[152].mxu0 %vm2630_vm2, %v174_v52  ;;  %6925 = vmatmul.mubr.msk.bf16.gmra.mrb[152].mxu1 %vm2630_vm2, %v174_v52 }
 0x24d   :  { %2794 = vmatprep.mubr.bf16.mxu0 %v8631_v1  ;;  %2987 = vmatprep.mubr.bf16.mxu1 %v8631_v1 }
 0x24e   :  { %3743 = vmatpush1.bf16.msra.mxu0 %v8232_v37  ;;  %4128 = vmatprep.subr.bf16.mxu1 %v8255_v44  ;;  %v160_v37 = vld [vmem:[%s10219_s1 + $0xc0] sm:$0xff]  ;;  %v161_v44 = vld [vmem:[%s10219_s1 + $0xc8] sm:$0xff] }
 0x24f   :  { %3744 = vmatprep.subr.bf16.mxu0 %v8243_v48  ;;  %4129 = vmatpush1.bf16.msra.mxu1 %v8253_v35  ;;  %v180_v27 = vpack.c.bf16 %v161_v44, %v160_v37 }
 0x250   :  { %4130 = vmatprep.subr.bf16.mxu1 %v8258_v39 }
 0x252   :  { %3745 = vmatpush1.bf16.msra.mxu0 %v8241_v15 }
 0x253   :  { %3746 = vmatprep.subr.bf16.mxu0 %v8252_v20  ;;  %4131 = vmatpush1.bf16.msra.mxu1 %v8256_v6 }
 0x254   :  { %6909 = vmatmul.mubr.msk.bf16.gmra.mrb[156].mxu0 %vm2630_vm2, %v175_v14  ;;  %6926 = vmatmul.mubr.msk.bf16.gmra.mrb[156].mxu1 %vm2630_vm2, %v175_v14 }
 0x255   :  { %2804 = vmatprep.mubr.bf16.mxu0 %v8631_v1  ;;  %2997 = vmatprep.mubr.bf16.mxu1 %v8631_v1 }
 0x256   :  { %3747 = vmatpush1.bf16.msra.mxu0 %v8250_v5  ;;  %4132 = vmatprep.subr.bf16.mxu1 %v8264_v9 }
 0x257   :  { %3748 = vmatprep.subr.bf16.mxu0 %v8261_v42  ;;  %4133 = vmatpush1.bf16.msra.mxu1 %v8262_v19 }
 0x258   :  { %4134 = vmatprep.subr.bf16.mxu1 %v8267_v22 }
 0x25a   :  { %3749 = vmatpush1.bf16.msra.mxu0 %v8259_v54 }
 0x25b   :  { %4135 = vmatpush1.bf16.msra.mxu1 %v8265_v56  ;;  %3911 = vmatprep.subr.bf16.mxu0 %v8270_v62 }
 0x25c   :  { %6910 = vmatmul.mubr.msk.bf16.gmra.mrb[160].mxu0 %vm2630_vm2, %v176_v60  ;;  %6927 = vmatmul.mubr.msk.bf16.gmra.mrb[160].mxu1 %vm2630_vm2, %v176_v60 }
 0x25d   :  { %2814 = vmatprep.mubr.bf16.mxu0 %v8631_v1  ;;  %3007 = vmatprep.mubr.bf16.mxu1 %v8631_v1 }
 0x25e   :  { %4297 = vmatprep.subr.bf16.mxu1 %v8297_v30 }
 0x264   :  { %6911 = vmatmul.mubr.msk.bf16.gmra.mrb[164].mxu0 %vm2630_vm2, %v177_v23  ;;  %6928 = vmatmul.mubr.msk.bf16.gmra.mrb[164].mxu1 %vm2630_vm2, %v177_v23 }
 0x265   :  { %2824 = vmatprep.mubr.bf16.mxu0 %v8631_v1  ;;  %3017 = vmatprep.mubr.bf16.mxu1 %v8631_v1 }
 0x26c   :  { %6912 = vmatmul.mubr.msk.bf16.gmra.mrb[168].mxu0 %vm2630_vm2, %v178_v4  ;;  %6929 = vmatmul.mubr.msk.bf16.gmra.mrb[168].mxu1 %vm2630_vm2, %v178_v4 }
 0x26d   :  { %2834 = vmatprep.mubr.bf16.mxu0 %v8631_v1  ;;  %3027 = vmatprep.mubr.bf16.mxu1 %v8631_v1 }
 0x26f   :  { %v1874_v36 = vpop.f32.mrb[64].mxu0  ;;  %v2260_v38 = vpop.f32.mrb[64].mxu1 }
 0x270   :  { %v1876_v45 = vpop.f32.mrb[65].mxu0  ;;  %v2262_v47 = vpop.f32.mrb[65].mxu1  ;;  %v7192_v53 = vadd.f32 %v1874_v36, %v9367_v33  ;;  %v7256_v16 = vadd.f32 %v2260_v38, %v9370_v34 }
 0x271   :  { %v1878_v51 = vpop.f32.mrb[66].mxu0  ;;  %v2264_v7 = vpop.f32.mrb[66].mxu1  ;;  %v7193_v28 = vadd.f32 %v1876_v45, %v9373_v40  ;;  %v7257_v31 = vadd.f32 %v2262_v47, %v9376_v41 }
 0x272   :  { %v7194_v21 = vadd.f32 %v1878_v51, %v9367_v33  ;;  %v7258_v3 = vadd.f32 %v2264_v7, %v9370_v34  ;;  %v1880_v43 = vpop.f32.mrb[67].mxu0  ;;  %v2266_v46 = vpop.f32.mrb[67].mxu1 }
 0x273   :  { %v7195_v13 = vadd.f32 %v1880_v43, %v9373_v40  ;;  %v7259_v17 = vadd.f32 %v2266_v46, %v9376_v41 }
 0x274   :  { %v9386_v55 = vpack.c.bf16 %v7194_v21, %v7192_v53  ;;  %v9388_v0 = vpack.c.bf16 %v7258_v3, %v7256_v16  ;;  %6913 = vmatmul.mubr.msk.bf16.gmra.mrb[172].mxu0 %vm2630_vm2, %v179_v50  ;;  %6930 = vmatmul.mubr.msk.bf16.gmra.mrb[172].mxu1 %vm2630_vm2, %v179_v50 }
 0x275   :  { %v9392_v49 = vpack.c.bf16 %v7195_v13, %v7193_v28  ;;  %v9394_v52 = vpack.c.bf16 %v7259_v17, %v7257_v31  ;;  %2844 = vmatprep.mubr.bf16.mxu0 %v8631_v1  ;;  %3037 = vmatprep.mubr.bf16.mxu1 %v8631_v1  ;;  %v164_v31 = vld [vmem:[%s10219_s1 + $0xe0] sm:$0xff]  ;;  %v165_v13 = vld [vmem:[%s10219_s1 + $0xe8] sm:$0xff] }
 0x277   :  { %v1884_v48 = vpop.f32.mrb[68].mxu0  ;;  %v2270_v35 = vpop.f32.mrb[68].mxu1 }
 0x278   :  { %v1886_v39 = vpop.f32.mrb[69].mxu0  ;;  %v2272_v24 = vpop.f32.mrb[69].mxu1  ;;  %v7196_v6 = vadd.f32 %v1884_v48, %v9367_v33  ;;  %v7260_v14 = vadd.f32 %v2270_v35, %v9370_v34  ;;  %v182_v35 = vpack.c.bf16 %v165_v13, %v164_v31 }
 0x279   :  { %v1888_v15 = vpop.f32.mrb[70].mxu0  ;;  %v2274_v20 = vpop.f32.mrb[70].mxu1  ;;  %v7197_v22 = vadd.f32 %v1886_v39, %v9373_v40  ;;  %v7261_v26 = vadd.f32 %v2272_v24, %v9376_v41 }
 0x27a   :  { %v7198_v5 = vadd.f32 %v1888_v15, %v9367_v33  ;;  %v7262_v9 = vadd.f32 %v2274_v20, %v9370_v34  ;;  %v1890_v42 = vpop.f32.mrb[71].mxu0  ;;  %v2276_v19 = vpop.f32.mrb[71].mxu1 }
 0x27b   :  { %v7199_v11 = vadd.f32 %v1890_v42, %v9373_v40  ;;  %v7263_v54 = vadd.f32 %v2276_v19, %v9376_v41 }
 0x27c   :  { %v9412_v56 = vpack.c.bf16 %v7198_v5, %v7196_v6  ;;  %v9414_v62 = vpack.c.bf16 %v7262_v9, %v7260_v14  ;;  %6914 = vmatmul.mubr.msk.bf16.gmra.mrb[176].mxu0 %vm2630_vm2, %v180_v27  ;;  %6931 = vmatmul.mubr.msk.bf16.gmra.mrb[176].mxu1 %vm2630_vm2, %v180_v27 }
 0x27d   :  { %v9418_v60 = vpack.c.bf16 %v7199_v11, %v7197_v22  ;;  %v9420_v30 = vpack.c.bf16 %v7263_v54, %v7261_v26  ;;  %2854 = vmatprep.mubr.bf16.mxu0 %v8631_v1  ;;  %3047 = vmatprep.mubr.bf16.mxu1 %v8631_v1 }
 0x27f   :  { %v1894_v23 = vpop.f32.mrb[72].mxu0  ;;  %v2280_v25 = vpop.f32.mrb[72].mxu1 }
 0x280   :  { %v1896_v63 = vpop.f32.mrb[73].mxu0  ;;  %v2282_v4 = vpop.f32.mrb[73].mxu1  ;;  %v7200_v36 = vadd.f32 %v1894_v23, %v9367_v33  ;;  %v7264_v38 = vadd.f32 %v2280_v25, %v9370_v34  ;;  %v167_v23 = vld [vmem:[%s10219_s1 + $0xf8] sm:$0xff] }
 0x281   :  { %v1898_v12 = vpop.f32.mrb[74].mxu0  ;;  %v2284_v32 = vpop.f32.mrb[74].mxu1  ;;  %v7201_v7 = vadd.f32 %v1896_v63, %v9373_v40  ;;  %v7265_v53 = vadd.f32 %v2282_v4, %v9376_v41 }
 0x282   :  { %v7202_v45 = vadd.f32 %v1898_v12, %v9367_v33  ;;  %v7266_v47 = vadd.f32 %v2284_v32, %v9370_v34  ;;  %v1900_v50 = vpop.f32.mrb[75].mxu0  ;;  %v2286_v51 = vpop.f32.mrb[75].mxu1  ;;  %v183_v12 = vpack.c.bf16 %v167_v23, %v166_v18 }
 0x283   :  { %v7203_v16 = vadd.f32 %v1900_v50, %v9373_v40  ;;  %v7267_v21 = vadd.f32 %v2286_v51, %v9376_v41 }
 0x284   :  { %v9438_v3 = vpack.c.bf16 %v7202_v45, %v7200_v36  ;;  %v9440_v43 = vpack.c.bf16 %v7266_v47, %v7264_v38  ;;  %6915 = vmatmul.mubr.msk.bf16.gmra.mrb[180].mxu0 %vm2630_vm2, %v181_v29  ;;  %6932 = vmatmul.mubr.msk.bf16.gmra.mrb[180].mxu1 %vm2630_vm2, %v181_v29 }
 0x285   :  { %v9444_v46 = vpack.c.bf16 %v7203_v16, %v7201_v7  ;;  %v9446_v28 = vpack.c.bf16 %v7267_v21, %v7265_v53  ;;  %2864 = vmatprep.mubr.bf16.mxu0 %v8631_v1  ;;  %3057 = vmatprep.mubr.bf16.mxu1 %v8631_v1 }
 0x287   :  { %v1904_v17 = vpop.f32.mrb[76].mxu0  ;;  %v2290_v37 = vpop.f32.mrb[76].mxu1 }
 0x288   :  { %v1906_v44 = vpop.f32.mrb[77].mxu0  ;;  %v2292_v48 = vpop.f32.mrb[77].mxu1  ;;  %v7204_v27 = vadd.f32 %v1904_v17, %v9367_v33  ;;  %v7268_v15 = vadd.f32 %v2290_v37, %v9370_v34 }
 0x289   :  { %v1908_v39 = vpop.f32.mrb[78].mxu0  ;;  %v2294_v24 = vpop.f32.mrb[78].mxu1  ;;  %v7205_v9 = vadd.f32 %v1906_v44, %v9373_v40  ;;  %v7269_v42 = vadd.f32 %v2292_v48, %v9376_v41 }
 0x28a   :  { %v7206_v20 = vadd.f32 %v1908_v39, %v9367_v33  ;;  %v7270_v6 = vadd.f32 %v2294_v24, %v9370_v34  ;;  %v1910_v14 = vpop.f32.mrb[79].mxu0  ;;  %v2296_v5 = vpop.f32.mrb[79].mxu1 }
 0x28b   :  { %v7207_v19 = vadd.f32 %v1910_v14, %v9373_v40  ;;  %v7271_v22 = vadd.f32 %v2296_v5, %v9376_v41 }
 0x28c   :  { %v9464_v26 = vpack.c.bf16 %v7206_v20, %v7204_v27  ;;  %v9466_v11 = vpack.c.bf16 %v7270_v6, %v7268_v15  ;;  %6916 = vmatmul.mubr.msk.bf16.gmra.mrb[184].mxu0 %vm2630_vm2, %v182_v35  ;;  %6933 = vmatmul.mubr.msk.bf16.gmra.mrb[184].mxu1 %vm2630_vm2, %v182_v35  ;;  %v8268_v15 = vld [vmem:[#allocation5 + $0x200] ss:$16 sps:$4 sm:$0xff]  }
 0x28d   :  { %v9470_v54 = vpack.c.bf16 %v7207_v19, %v7205_v9  ;;  %v9472_v2 = vpack.c.bf16 %v7271_v22, %v7269_v42  ;;  %2874 = vmatprep.mubr.bf16.mxu0 %v8631_v1  ;;  %3067 = vmatprep.mubr.bf16.mxu1 %v8631_v1  ;;  %v8273_v19 = vld [vmem:[#allocation5 + $0x224] ss:$16 sps:$4 sm:$0xff]  }
 0x28f   :  { %v1914_v25 = vpop.f32.mrb[80].mxu0  ;;  %v2300_v63 = vpop.f32.mrb[80].mxu1 }
 0x290   :  { %v1916_v4 = vpop.f32.mrb[81].mxu0  ;;  %v2302_v29 = vpop.f32.mrb[81].mxu1  ;;  %v7208_v38 = vadd.f32 %v1914_v25, %v9367_v33  ;;  %v7272_v45 = vadd.f32 %v2300_v63, %v9370_v34  ;;  %v8295_v25 = vld [vmem:[#allocation5 + $0x208] ss:$16 sps:$4 sm:$0xff]  }
 0x291   :  { %v1918_v32 = vpop.f32.mrb[82].mxu0  ;;  %v2304_v36 = vpop.f32.mrb[82].mxu1  ;;  %v7209_v7 = vadd.f32 %v1916_v4, %v9373_v40  ;;  %v7273_v53 = vadd.f32 %v2302_v29, %v9376_v41  ;;  %v8300_v29 = vld [vmem:[#allocation5 + $0x22c] ss:$16 sps:$4 sm:$0xff]  }
 0x292   :  { %v7210_v1 = vadd.f32 %v1918_v32, %v9367_v33  ;;  %v7274_v47 = vadd.f32 %v2304_v36, %v9370_v34  ;;  %v1920_v50 = vpop.f32.mrb[83].mxu0  ;;  %v2306_v51 = vpop.f32.mrb[83].mxu1  ;;  %v8271_v36 = vld [vmem:[#allocation5 + $0x220] ss:$16 sps:$4 sm:$0xff]  }
 0x293   :  { %v7211_v16 = vadd.f32 %v1920_v50, %v9373_v40  ;;  %v7275_v21 = vadd.f32 %v2306_v51, %v9376_v41 }
 0x294   :  { %v9490_v31 = vpack.c.bf16 %v7210_v1, %v7208_v38  ;;  %v9492_v13 = vpack.c.bf16 %v7274_v47, %v7272_v45  ;;  %6917 = vmatmul.mubr.msk.bf16.gmra.mrb[188].mxu0 %vm2630_vm2, %v183_v12  ;;  %6934 = vmatmul.mubr.msk.bf16.gmra.mrb[188].mxu1 %vm2630_vm2, %v183_v12  ;;  %v8276_v38 = vld [vmem:[#allocation5 + $0x244] ss:$16 sps:$4 sm:$0xff]   ;;  %v8298_v47 = vld [vmem:[#allocation5 + $0x228] ss:$16 sps:$4 sm:$0xff]  }
 0x295   :  { %v9496_v17 = vpack.c.bf16 %v7211_v16, %v7209_v7  ;;  %v9498_v37 = vpack.c.bf16 %v7275_v21, %v7273_v53  ;;  %3750 = vmatprep.mubr.bf16.mxu0 %v9392_v49  ;;  %4136 = vmatprep.mubr.bf16.mxu1 %v9392_v49 }
 0x297   :  { %v1924_v44 = vpop.f32.mrb[84].mxu0  ;;  %v2310_v48 = vpop.f32.mrb[84].mxu1 }
 0x298   :  { %v1926_v35 = vpop.f32.mrb[85].mxu0  ;;  %v2312_v39 = vpop.f32.mrb[85].mxu1  ;;  %v7212_v20 = vadd.f32 %v1924_v44, %v9367_v33  ;;  %v7276_v6 = vadd.f32 %v2310_v48, %v9370_v34 }
 0x299   :  { %v1928_v24 = vpop.f32.mrb[86].mxu0  ;;  %v2314_v27 = vpop.f32.mrb[86].mxu1  ;;  %v7213_v49 = vadd.f32 %v1926_v35, %v9373_v40  ;;  %v7277_v22 = vadd.f32 %v2312_v39, %v9376_v41  ;;  %v8274_v35 = vld [vmem:[#allocation5 + $0x240] ss:$16 sps:$4 sm:$0xff]   ;;  %v8306_v39 = vld [vmem:[#allocation5 + $0x24c] ss:$16 sps:$4 sm:$0xff]  }
 0x29a   :  { %v7214_v14 = vadd.f32 %v1928_v24, %v9367_v33  ;;  %v7278_v5 = vadd.f32 %v2314_v27, %v9370_v34  ;;  %v1930_v9 = vpop.f32.mrb[87].mxu0  ;;  %v2316_v42 = vpop.f32.mrb[87].mxu1 }
 0x29b   :  { %v7215_v18 = vadd.f32 %v1930_v9, %v9373_v40  ;;  %v7279_v23 = vadd.f32 %v2316_v42, %v9376_v41  ;;  %v8309_v42 = vld [vmem:[#allocation5 + $0x26c] ss:$16 sps:$4 sm:$0xff]  }
 0x29c   :  { %v9510_v63 = vpack.c.bf16 %v7214_v14, %v7212_v20  ;;  %v9512_v4 = vpack.c.bf16 %v7278_v5, %v7276_v6  ;;  %3751 = vmatmul.mubr.bf16.vlgmr.msra.gmra.mrb[128].mxu0 %v9386_v55  ;;  %4137 = vmatmul.mubr.bf16.vlgmr.msra.gmra.mrb[128].mxu1 %v9386_v55  ;;  %v8279_v6 = vld [vmem:[#allocation5 + $0x264] ss:$16 sps:$4 sm:$0xff]   ;;  %v8304_v14 = vld [vmem:[#allocation5 + $0x248] ss:$16 sps:$4 sm:$0xff]  }
 0x29d   :  { %v9516_v12 = vpack.c.bf16 %v7215_v18, %v7213_v49  ;;  %v9518_v32 = vpack.c.bf16 %v7279_v23, %v7277_v22  ;;  %3760 = vmatprep.mubr.bf16.mxu0 %v9418_v60  ;;  %3912 = vmatpush1.bf16.msra.mxu0 %v8268_v15  ;;  %v8277_v22 = vld [vmem:[#allocation5 + $0x260] ss:$16 sps:$4 sm:$0xff]  }
 0x29e   :  { %4146 = vmatprep.mubr.bf16.mxu1 %v9418_v60  ;;  %3913 = vmatprep.subr.bf16.mxu0 %v8273_v19 }
 0x29f   :  { %v1934_v45 = vpop.f32.mrb[88].mxu0  ;;  %v2320_v1 = vpop.f32.mrb[88].mxu1  ;;  %4298 = vmatpush1.bf16.msra.mxu1 %v8295_v25  ;;  %v8282_v25 = vld [vmem:[#allocation5 + $0x284] ss:$16 sps:$4 sm:$0xff]  }
 0x2a0   :  { %v1936_v50 = vpop.f32.mrb[89].mxu0  ;;  %v2322_v51 = vpop.f32.mrb[89].mxu1  ;;  %4299 = vmatprep.subr.bf16.mxu1 %v8300_v29  ;;  %v7216_v53 = vadd.f32 %v1934_v45, %v9367_v33  ;;  %v7280_v16 = vadd.f32 %v2320_v1, %v9370_v34  ;;  %v8307_v29 = vld [vmem:[#allocation5 + $0x268] ss:$16 sps:$4 sm:$0xff]  }
 0x2a1   :  { %v1938_v55 = vpop.f32.mrb[90].mxu0  ;;  %v2324_v7 = vpop.f32.mrb[90].mxu1  ;;  %3914 = vmatpush1.bf16.msra.mxu0 %v8271_v36  ;;  %v7217_v24 = vadd.f32 %v1936_v50, %v9373_v40  ;;  %v7281_v27 = vadd.f32 %v2322_v51, %v9376_v41 }
 0x2a2   :  { %v7218_v21 = vadd.f32 %v1938_v55, %v9367_v33  ;;  %v7282_v60 = vadd.f32 %v2324_v7, %v9370_v34  ;;  %v1940_v44 = vpop.f32.mrb[91].mxu0  ;;  %v2326_v48 = vpop.f32.mrb[91].mxu1  ;;  %3915 = vmatprep.subr.bf16.mxu0 %v8276_v38 }
 0x2a3   :  { %v7219_v15 = vadd.f32 %v1940_v44, %v9373_v40  ;;  %v7283_v20 = vadd.f32 %v2326_v48, %v9376_v41  ;;  %4300 = vmatpush1.bf16.msra.mxu1 %v8298_v47  ;;  %v8285_v48 = vld [vmem:[#allocation5 + $0x2a4] ss:$16 sps:$4 sm:$0xff]  }
 0x2a4   :  { %v9530_v5 = vpack.c.bf16 %v7218_v21, %v7216_v53  ;;  %v9532_v9 = vpack.c.bf16 %v7282_v60, %v7280_v16  ;;  %3761 = vmatmul.mubr.bf16.gmra.mrb[132].mxu0 %v9412_v56  ;;  %4147 = vmatmul.mubr.bf16.gmra.mrb[132].mxu1 %v9412_v56  ;;  %v8280_v53 = vld [vmem:[#allocation5 + $0x280] ss:$16 sps:$4 sm:$0xff]   ;;  %v8315_v16 = vld [vmem:[#allocation5 + $0x28c] ss:$16 sps:$4 sm:$0xff]  }
 0x2a5   :  { %v9536_v19 = vpack.c.bf16 %v7219_v15, %v7217_v24  ;;  %v9538_v49 = vpack.c.bf16 %v7283_v20, %v7281_v27  ;;  %3770 = vmatprep.mubr.bf16.mxu0 %v9444_v46  ;;  %4156 = vmatprep.mubr.bf16.mxu1 %v9444_v46  ;;  %v8318_v27 = vld [vmem:[#allocation5 + $0x2ac] ss:$16 sps:$4 sm:$0xff]  }
 0x2a6   :  { %3916 = vmatpush1.bf16.msra.mxu0 %v8274_v35  ;;  %4301 = vmatprep.subr.bf16.mxu1 %v8306_v39  ;;  %v8313_v35 = vld [vmem:[#allocation5 + $0x288] ss:$16 sps:$4 sm:$0xff]  }
 0x2a7   :  { %v1944_v18 = vpop.f32.mrb[92].mxu0  ;;  %v2330_v23 = vpop.f32.mrb[92].mxu1  ;;  %3917 = vmatprep.subr.bf16.mxu0 %v8279_v6  ;;  %4302 = vmatpush1.bf16.msra.mxu1 %v8304_v14  ;;  %v8283_v6 = vld [vmem:[#allocation5 + $0x2a0] ss:$16 sps:$4 sm:$0xff]  }
 0x2a8   :  { %v1946_v36 = vpop.f32.mrb[93].mxu0  ;;  %v2332_v56 = vpop.f32.mrb[93].mxu1  ;;  %4303 = vmatprep.subr.bf16.mxu1 %v8309_v42  ;;  %v7220_v38 = vadd.f32 %v1944_v18, %v9367_v33  ;;  %v7284_v47 = vadd.f32 %v2330_v23, %v9370_v34  ;;  %v8316_v18 = vld [vmem:[#allocation5 + $0x2a8] ss:$16 sps:$4 sm:$0xff]  }
 0x2a9   :  { %v1948_v45 = vpop.f32.mrb[94].mxu0  ;;  %v2334_v1 = vpop.f32.mrb[94].mxu1  ;;  %v7221_v46 = vadd.f32 %v1946_v36, %v9373_v40  ;;  %v7285_v21 = vadd.f32 %v2332_v56, %v9376_v41 }
 0x2aa   :  { %v7222_v50 = vadd.f32 %v1948_v45, %v9367_v33  ;;  %v7286_v51 = vadd.f32 %v2334_v1, %v9370_v34  ;;  %v1950_v55 = vpop.f32.mrb[95].mxu0  ;;  %v2336_v7 = vpop.f32.mrb[95].mxu1  ;;  %3918 = vmatpush1.bf16.msra.mxu0 %v8277_v22  ;;  %v8288_v22 = vld [vmem:[#allocation5 + $0x2c4] ss:$16 sps:$4 sm:$0xff]  }
 0x2ab   :  { %v7223_v60 = vadd.f32 %v1950_v55, %v9373_v40  ;;  %v7287_v44 = vadd.f32 %v2336_v7, %v9376_v41  ;;  %3919 = vmatprep.subr.bf16.mxu0 %v8282_v25  ;;  %4304 = vmatpush1.bf16.msra.mxu1 %v8307_v29 }
 0x2ac   :  { %v9550_v39 = vpack.c.bf16 %v7222_v50, %v7220_v38  ;;  %v9552_v24 = vpack.c.bf16 %v7286_v51, %v7284_v47  ;;  %3771 = vmatmul.mubr.bf16.gmra.mrb[136].mxu0 %v9438_v3  ;;  %4157 = vmatmul.mubr.bf16.gmra.mrb[136].mxu1 %v9438_v3  ;;  %v8324_v50 = vld [vmem:[#allocation5 + $0x2cc] ss:$16 sps:$4 sm:$0xff]  }
 0x2ad   :  { %v9556_v15 = vpack.c.bf16 %v7223_v60, %v7221_v46  ;;  %v9558_v20 = vpack.c.bf16 %v7287_v44, %v7285_v21  ;;  %3780 = vmatprep.mubr.bf16.mxu0 %v9470_v54  ;;  %4166 = vmatprep.mubr.bf16.mxu1 %v9470_v54  ;;  %v8286_v46 = vld [vmem:[#allocation5 + $0x2c0] ss:$16 sps:$4 sm:$0xff]   ;;  %v8327_v44 = vld [vmem:[#allocation5 + $0x2ec] ss:$16 sps:$4 sm:$0xff]  }
 0x2ae   :  { %3920 = vmatpush1.bf16.msra.mxu0 %v8280_v53  ;;  %4305 = vmatprep.subr.bf16.mxu1 %v8315_v16  ;;  %v8291_v53 = vld [vmem:[#allocation5 + $0x2e4] ss:$16 sps:$4 sm:$0xff]   ;;  %v8322_v16 = vld [vmem:[#allocation5 + $0x2c8] ss:$16 sps:$4 sm:$0xff]  }
 0x2af   :  { %v1954_v14 = vpop.f32.mrb[96].mxu0  ;;  %v2340_v42 = vpop.f32.mrb[96].mxu1  ;;  %3921 = vmatprep.subr.bf16.mxu0 %v8285_v48  ;;  %4306 = vmatpush1.bf16.msra.mxu1 %v8313_v35 }
 0x2b0   :  { %v1956_v23 = vpop.f32.mrb[97].mxu0  ;;  %v2342_v3 = vpop.f32.mrb[97].mxu1  ;;  %4307 = vmatprep.subr.bf16.mxu1 %v8318_v27  ;;  %v7224_v25 = vadd.f32 %v1954_v14, %v9367_v33  ;;  %v7288_v56 = vadd.f32 %v2340_v42, %v9370_v34  ;;  %v8289_v27 = vld [vmem:[#allocation5 + $0x2e0] ss:$16 sps:$4 sm:$0xff]   ;;  %v8294_v42 = vld [vmem:[#allocation5 + $0x304] ss:$16 sps:$4 sm:$0xff]  }
 0x2b1   :  { %v1958_v29 = vpop.f32.mrb[98].mxu0  ;;  %v2344_v36 = vpop.f32.mrb[98].mxu1  ;;  %v7225_v54 = vadd.f32 %v1956_v23, %v9373_v40  ;;  %v7289_v51 = vadd.f32 %v2342_v3, %v9376_v41 }
 0x2b2   :  { %v7226_v38 = vadd.f32 %v1958_v29, %v9367_v33  ;;  %v7290_v45 = vadd.f32 %v2344_v36, %v9370_v34  ;;  %v1960_v1 = vpop.f32.mrb[99].mxu0  ;;  %v2346_v47 = vpop.f32.mrb[99].mxu1  ;;  %3922 = vmatpush1.bf16.msra.mxu0 %v8283_v6 }
 0x2b3   :  { %v7227_v55 = vadd.f32 %v1960_v1, %v9373_v40  ;;  %v7291_v7 = vadd.f32 %v2346_v47, %v9376_v41  ;;  %3923 = vmatprep.subr.bf16.mxu0 %v8288_v22  ;;  %4308 = vmatpush1.bf16.msra.mxu1 %v8316_v18  ;;  %v8325_v22 = vld [vmem:[#allocation5 + $0x2e8] ss:$16 sps:$4 sm:$0xff]   ;;  %v8333_v1 = vld [vmem:[#allocation5 + $0x30c] ss:$16 sps:$4 sm:$0xff]  }
 0x2b4   :  { %v9570_v21 = vpack.c.bf16 %v7226_v38, %v7224_v25  ;;  %v9572_v60 = vpack.c.bf16 %v7290_v45, %v7288_v56  ;;  %3781 = vmatmul.mubr.bf16.gmra.mrb[140].mxu0 %v9464_v26  ;;  %4167 = vmatmul.mubr.bf16.gmra.mrb[140].mxu1 %v9464_v26  ;;  %v8292_v45 = vld [vmem:[#allocation5 + $0x300] ss:$16 sps:$4 sm:$0xff]  }
 0x2b5   :  { %v9576_v48 = vpack.c.bf16 %v7227_v55, %v7225_v54  ;;  %v9578_v35 = vpack.c.bf16 %v7291_v7, %v7289_v51  ;;  %3790 = vmatprep.mubr.bf16.mxu0 %v9496_v17  ;;  %4176 = vmatprep.mubr.bf16.mxu1 %v9496_v17  ;;  %v8303_v51 = vld [vmem:[#allocation5 + $0x324] ss:$16 sps:$4 sm:$0xff]   ;;  %v8331_v55 = vld [vmem:[#allocation5 + $0x308] ss:$16 sps:$4 sm:$0xff]  }
 0x2b6   :  { %3924 = vmatpush1.bf16.msra.mxu0 %v8286_v46  ;;  %4309 = vmatprep.subr.bf16.mxu1 %v8324_v50 }
 0x2b7   :  { %v1964_v6 = vpop.f32.mrb[100].mxu0  ;;  %v2350_v14 = vpop.f32.mrb[100].mxu1  ;;  %3925 = vmatprep.subr.bf16.mxu0 %v8291_v53  ;;  %4310 = vmatpush1.bf16.msra.mxu1 %v8322_v16  ;;  %v8336_v16 = vld [vmem:[#allocation5 + $0x32c] ss:$16 sps:$4 sm:$0xff]  }
 0x2b8   :  { %v1966_v18 = vpop.f32.mrb[101].mxu0  ;;  %v2352_v26 = vpop.f32.mrb[101].mxu1  ;;  %4311 = vmatprep.subr.bf16.mxu1 %v8327_v44  ;;  %v7228_v23 = vadd.f32 %v1964_v6, %v9367_v33  ;;  %v7292_v29 = vadd.f32 %v2350_v14, %v9370_v34  ;;  %v8301_v6 = vld [vmem:[#allocation5 + $0x320] ss:$16 sps:$4 sm:$0xff]  }
 0x2b9   :  { %v1968_v3 = vpop.f32.mrb[102].mxu0  ;;  %v2354_v25 = vpop.f32.mrb[102].mxu1  ;;  %v7229_v17 = vadd.f32 %v1966_v18, %v9373_v40  ;;  %v7293_v47 = vadd.f32 %v2352_v26, %v9376_v41  ;;  %v8334_v18 = vld [vmem:[#allocation5 + $0x328] ss:$16 sps:$4 sm:$0xff]  }
 0x2ba   :  { %v7230_v36 = vadd.f32 %v1968_v3, %v9367_v33  ;;  %v7294_v56 = vadd.f32 %v2354_v25, %v9370_v34  ;;  %v1970_v54 = vpop.f32.mrb[103].mxu0  ;;  %v2356_v38 = vpop.f32.mrb[103].mxu1  ;;  %3926 = vmatpush1.bf16.msra.mxu0 %v8289_v27 }
 0x2bb   :  { %v7231_v46 = vadd.f32 %v1970_v54, %v9373_v40  ;;  %v7295_v50 = vadd.f32 %v2356_v38, %v9376_v41  ;;  %3927 = vmatprep.subr.bf16.mxu0 %v8294_v42  ;;  %4312 = vmatpush1.bf16.msra.mxu1 %v8325_v22  ;;  %v8312_v22 = vld [vmem:[#allocation5 + $0x344] ss:$16 sps:$4 sm:$0xff]   ;;  %v8310_v38 = vld [vmem:[#allocation5 + $0x340] ss:$16 sps:$4 sm:$0xff]  }
 0x2bc   :  { %v9590_v7 = vpack.c.bf16 %v7230_v36, %v7228_v23  ;;  %v9592_v53 = vpack.c.bf16 %v7294_v56, %v7292_v29  ;;  %3791 = vmatmul.mubr.bf16.gmra.mrb[144].mxu0 %v9490_v31  ;;  %4177 = vmatmul.mubr.bf16.gmra.mrb[144].mxu1 %v9490_v31 }
 0x2bd   :  { %v9596_v44 = vpack.c.bf16 %v7231_v46, %v7229_v17  ;;  %v9598_v27 = vpack.c.bf16 %v7295_v50, %v7293_v47  ;;  %3800 = vmatprep.mubr.bf16.mxu0 %v9516_v12  ;;  %4186 = vmatprep.mubr.bf16.mxu1 %v9516_v12  ;;  %v8321_v50 = vld [vmem:[#allocation5 + $0x364] ss:$16 sps:$4 sm:$0xff]  }
 0x2be   :  { %3928 = vmatpush1.bf16.msra.mxu0 %v8292_v45  ;;  %4313 = vmatprep.subr.bf16.mxu1 %v8333_v1  ;;  %v8342_v45 = vld [vmem:[#allocation5 + $0x34c] ss:$16 sps:$4 sm:$0xff]  }
 0x2bf   :  { %v1974_v14 = vpop.f32.mrb[104].mxu0  ;;  %v2360_v42 = vpop.f32.mrb[104].mxu1  ;;  %3929 = vmatprep.subr.bf16.mxu0 %v8303_v51  ;;  %4314 = vmatpush1.bf16.msra.mxu1 %v8331_v55  ;;  %v8340_v51 = vld [vmem:[#allocation5 + $0x348] ss:$16 sps:$4 sm:$0xff]  }
 0x2c0   :  { %v1976_v26 = vpop.f32.mrb[105].mxu0  ;;  %v2362_v31 = vpop.f32.mrb[105].mxu1  ;;  %4315 = vmatprep.subr.bf16.mxu1 %v8336_v16  ;;  %v7232_v23 = vadd.f32 %v1974_v14, %v9367_v33  ;;  %v7296_v29 = vadd.f32 %v2360_v42, %v9370_v34 }
 0x2c1   :  { %v1978_v3 = vpop.f32.mrb[106].mxu0  ;;  %v2364_v25 = vpop.f32.mrb[106].mxu1  ;;  %v7233_v12 = vadd.f32 %v1976_v26, %v9373_v40  ;;  %v7297_v1 = vadd.f32 %v2362_v31, %v9376_v41  ;;  %v8330_v31 = vld [vmem:[#allocation5 + $0x384] ss:$16 sps:$4 sm:$0xff]  }
 0x2c2   :  { %v7234_v17 = vadd.f32 %v1978_v3, %v9367_v33  ;;  %v7298_v36 = vadd.f32 %v2364_v25, %v9370_v34  ;;  %v1980_v56 = vpop.f32.mrb[107].mxu0  ;;  %v2366_v54 = vpop.f32.mrb[107].mxu1  ;;  %3930 = vmatpush1.bf16.msra.mxu0 %v8301_v6  ;;  %v8345_v6 = vld [vmem:[#allocation5 + $0x36c] ss:$16 sps:$4 sm:$0xff]  }
 0x2c3   :  { %v7235_v47 = vadd.f32 %v1980_v56, %v9373_v40  ;;  %v7299_v46 = vadd.f32 %v2366_v54, %v9376_v41  ;;  %3931 = vmatprep.subr.bf16.mxu0 %v8312_v22  ;;  %4316 = vmatpush1.bf16.msra.mxu1 %v8334_v18  ;;  %v8319_v22 = vld [vmem:[#allocation5 + $0x360] ss:$16 sps:$4 sm:$0xff]  }
 0x2c4   :  { %v9610_v55 = vpack.c.bf16 %v7234_v17, %v7232_v23  ;;  %v9612_v16 = vpack.c.bf16 %v7298_v36, %v7296_v29  ;;  %3801 = vmatmul.mubr.bf16.gmra.mrb[148].mxu0 %v9510_v63  ;;  %4187 = vmatmul.mubr.bf16.gmra.mrb[148].mxu1 %v9510_v63  ;;  %v8343_v23 = vld [vmem:[#allocation5 + $0x368] ss:$16 sps:$4 sm:$0xff]  }
 0x2c5   :  { %v9616_v14 = vpack.c.bf16 %v7235_v47, %v7233_v12  ;;  %v9618_v42 = vpack.c.bf16 %v7299_v46, %v7297_v1  ;;  %3810 = vmatprep.mubr.bf16.mxu0 %v9536_v19  ;;  %4196 = vmatprep.mubr.bf16.mxu1 %v9536_v19  ;;  %v8351_v1 = vld [vmem:[#allocation5 + $0x38c] ss:$16 sps:$4 sm:$0xff]  }
 0x2c6   :  { %3932 = vmatpush1.bf16.msra.mxu0 %v8310_v38  ;;  %4317 = vmatprep.subr.bf16.mxu1 %v8342_v45  ;;  %v8328_v45 = vld [vmem:[#allocation5 + $0x380] ss:$16 sps:$4 sm:$0xff]  }
 0x2c7   :  { %v1984_v18 = vpop.f32.mrb[108].mxu0  ;;  %v2370_v26 = vpop.f32.mrb[108].mxu1  ;;  %3933 = vmatprep.subr.bf16.mxu0 %v8321_v50  ;;  %4318 = vmatpush1.bf16.msra.mxu1 %v8340_v51  ;;  %v8339_v51 = vld [vmem:[#allocation5 + $0x3a4] ss:$16 sps:$4 sm:$0xff]  }
 0x2c8   :  { %v1986_v3 = vpop.f32.mrb[109].mxu0  ;;  %v2372_v63 = vpop.f32.mrb[109].mxu1  ;;  %4319 = vmatprep.subr.bf16.mxu1 %v8345_v6  ;;  %v7236_v25 = vadd.f32 %v1984_v18, %v9367_v33  ;;  %v7300_v17 = vadd.f32 %v2370_v26, %v9370_v34  ;;  %v8349_v6 = vld [vmem:[#allocation5 + $0x388] ss:$16 sps:$4 sm:$0xff]  }
 0x2c9   :  { %v1988_v29 = vpop.f32.mrb[110].mxu0  ;;  %v2374_v12 = vpop.f32.mrb[110].mxu1  ;;  %v7237_v19 = vadd.f32 %v1986_v3, %v9373_v40  ;;  %v7301_v47 = vadd.f32 %v2372_v63, %v9376_v41 }
 0x2ca   :  { %v7238_v36 = vadd.f32 %v1988_v29, %v9367_v33  ;;  %v7302_v56 = vadd.f32 %v2374_v12, %v9370_v34  ;;  %v1990_v54 = vpop.f32.mrb[111].mxu0  ;;  %v2376_v38 = vpop.f32.mrb[111].mxu1  ;;  %3934 = vmatpush1.bf16.msra.mxu0 %v8319_v22  ;;  %v8354_v22 = vld [vmem:[#allocation5 + $0x3ac] ss:$16 sps:$4 sm:$0xff]   ;;  %v8348_v29 = vld [vmem:[#allocation5 + $0x3c4] ss:$16 sps:$4 sm:$0xff]  }
 0x2cb   :  { %v7239_v46 = vadd.f32 %v1990_v54, %v9373_v40  ;;  %v7303_v50 = vadd.f32 %v2376_v38, %v9376_v41  ;;  %3935 = vmatprep.subr.bf16.mxu0 %v8330_v31  ;;  %4320 = vmatpush1.bf16.msra.mxu1 %v8343_v23  ;;  %v8337_v31 = vld [vmem:[#allocation5 + $0x3a0] ss:$16 sps:$4 sm:$0xff]   ;;  %v8352_v12 = vld [vmem:[#allocation5 + $0x3a8] ss:$16 sps:$4 sm:$0xff]  }
 0x2cc   :  { %v9630_v18 = vpack.c.bf16 %v7238_v36, %v7236_v25  ;;  %v9632_v26 = vpack.c.bf16 %v7302_v56, %v7300_v17  ;;  %3811 = vmatmul.mubr.bf16.gmra.mrb[152].mxu0 %v9530_v5  ;;  %4197 = vmatmul.mubr.bf16.gmra.mrb[152].mxu1 %v9530_v5 }
 0x2cd   :  { %v9636_v3 = vpack.c.bf16 %v7239_v46, %v7237_v19  ;;  %v9638_v63 = vpack.c.bf16 %v7303_v50, %v7301_v47  ;;  %3820 = vmatprep.mubr.bf16.mxu0 %v9556_v15  ;;  %4206 = vmatprep.mubr.bf16.mxu1 %v9556_v15  ;;  %v8346_v46 = vld [vmem:[#allocation5 + $0x3c0] ss:$16 sps:$4 sm:$0xff]   ;;  %v8360_v50 = vld [vmem:[#allocation5 + $0x3cc] ss:$16 sps:$4 sm:$0xff]  }
 0x2ce   :  { %3936 = vmatpush1.bf16.msra.mxu0 %v8328_v45  ;;  %4321 = vmatprep.subr.bf16.mxu1 %v8351_v1 }
 0x2cf   :  { %v1994_v23 = vpop.f32.mrb[112].mxu0  ;;  %v2380_v25 = vpop.f32.mrb[112].mxu1  ;;  %3937 = vmatprep.subr.bf16.mxu0 %v8339_v51  ;;  %4322 = vmatpush1.bf16.msra.mxu1 %v8349_v6 }
 0x2d0   :  { %v1996_v17 = vpop.f32.mrb[113].mxu0  ;;  %v2382_v5 = vpop.f32.mrb[113].mxu1  ;;  %4323 = vmatprep.subr.bf16.mxu1 %v8354_v22  ;;  %v7240_v19 = vadd.f32 %v1994_v23, %v9367_v33  ;;  %v7304_v54 = vadd.f32 %v2380_v25, %v9370_v34  ;;  %v8357_v23 = vld [vmem:[#allocation5 + $0x3e4] ss:$16 sps:$4 sm:$0xff]   ;;  %v8358_v25 = vld [vmem:[#allocation5 + $0x3c8] ss:$16 sps:$4 sm:$0xff]  }
 0x2d1   :  { %v1998_v36 = vpop.f32.mrb[114].mxu0  ;;  %v2384_v56 = vpop.f32.mrb[114].mxu1  ;;  %v7241_v15 = vadd.f32 %v1996_v17, %v9373_v40  ;;  %v7305_v51 = vadd.f32 %v2382_v5, %v9376_v41 }
 0x2d2   :  { %v7242_v38 = vadd.f32 %v1998_v36, %v9367_v33  ;;  %v7306_v45 = vadd.f32 %v2384_v56, %v9370_v34  ;;  %v2000_v1 = vpop.f32.mrb[115].mxu0  ;;  %v2386_v47 = vpop.f32.mrb[115].mxu1  ;;  %3938 = vmatpush1.bf16.msra.mxu0 %v8337_v31  ;;  %v8363_v31 = vld [vmem:[#allocation5 + $0x3ec] ss:$16 sps:$4 sm:$0xff]  }
 0x2d3   :  { %v7243_v6 = vadd.f32 %v2000_v1, %v9373_v40  ;;  %v7307_v22 = vadd.f32 %v2386_v47, %v9376_v41  ;;  %3939 = vmatprep.subr.bf16.mxu0 %v8348_v29  ;;  %4324 = vmatpush1.bf16.msra.mxu1 %v8352_v12  ;;  %v8355_v29 = vld [vmem:[#allocation5 + $0x3e0] ss:$16 sps:$4 sm:$0xff]  }
 0x2d4   :  { %v9650_v17 = vpack.c.bf16 %v7242_v38, %v7240_v19  ;;  %v9652_v36 = vpack.c.bf16 %v7306_v45, %v7304_v54  ;;  %3821 = vmatmul.mubr.bf16.gmra.mrb[156].mxu0 %v9550_v39  ;;  %4207 = vmatmul.mubr.bf16.gmra.mrb[156].mxu1 %v9550_v39  ;;  %v8361_v54 = vld [vmem:[#allocation5 + $0x3e8] ss:$16 sps:$4 sm:$0xff]  }
 0x2d5   :  { %v9656_v56 = vpack.c.bf16 %v7243_v6, %v7241_v15  ;;  %v9658_v5 = vpack.c.bf16 %v7307_v22, %v7305_v51  ;;  %3830 = vmatprep.mubr.bf16.mxu0 %v9576_v48  ;;  %4216 = vmatprep.mubr.bf16.mxu1 %v9576_v48 }
 0x2d6   :  { %3940 = vmatpush1.bf16.msra.mxu0 %v8346_v46  ;;  %4325 = vmatprep.subr.bf16.mxu1 %v8360_v50 }
 0x2d7   :  { %v2004_v12 = vpop.f32.mrb[116].mxu0  ;;  %v2390_v19 = vpop.f32.mrb[116].mxu1  ;;  %3941 = vmatprep.subr.bf16.mxu0 %v8357_v23  ;;  %4326 = vmatpush1.bf16.msra.mxu1 %v8358_v25 }
 0x2d8   :  { %v2006_v38 = vpop.f32.mrb[117].mxu0  ;;  %v2392_v45 = vpop.f32.mrb[117].mxu1  ;;  %4327 = vmatprep.subr.bf16.mxu1 %v8363_v31  ;;  %v7244_v1 = vadd.f32 %v2004_v12, %v9367_v33  ;;  %v7308_v47 = vadd.f32 %v2390_v19, %v9370_v34 }
 0x2d9   :  { %v2008_v39 = vpop.f32.mrb[118].mxu0  ;;  %v2394_v15 = vpop.f32.mrb[118].mxu1  ;;  %v7245_v6 = vadd.f32 %v2006_v38, %v9373_v40  ;;  %v7309_v22 = vadd.f32 %v2392_v45, %v9376_v41 }
 0x2da   :  { %v7246_v51 = vadd.f32 %v2008_v39, %v9367_v33  ;;  %v7310_v48 = vadd.f32 %v2394_v15, %v9370_v34  ;;  %v2010_v46 = vpop.f32.mrb[119].mxu0  ;;  %v2396_v50 = vpop.f32.mrb[119].mxu1  ;;  %3942 = vmatpush1.bf16.msra.mxu0 %v8355_v29 }
 0x2db   :  { %v7247_v23 = vadd.f32 %v2010_v46, %v9373_v40  ;;  %v7311_v25 = vadd.f32 %v2396_v50, %v9376_v41  ;;  %4328 = vmatpush1.bf16.msra.mxu1 %v8361_v54 }
 0x2dc   :  { %v9670_v31 = vpack.c.bf16 %v7246_v51, %v7244_v1  ;;  %v9672_v12 = vpack.c.bf16 %v7310_v48, %v7308_v47  ;;  %3831 = vmatmul.mubr.bf16.gmra.mrb[160].mxu0 %v9570_v21  ;;  %4217 = vmatmul.mubr.bf16.gmra.mrb[160].mxu1 %v9570_v21 }
 0x2dd   :  { %v2472_v19 = vpack.c.bf16 %v7247_v23, %v7245_v6  ;;  %v9676_v39 = vpack.c.bf16 %v7311_v25, %v7309_v22  ;;  %3840 = vmatprep.mubr.bf16.mxu0 %v9596_v44  ;;  %4226 = vmatprep.mubr.bf16.mxu1 %v9596_v44 }
 0x2df   :  { %v2014_v29 = vpop.f32.mrb[120].mxu0  ;;  %v2400_v38 = vpop.f32.mrb[120].mxu1 }
 0x2e0   :  { %v2016_v45 = vpop.f32.mrb[121].mxu0  ;;  %v2402_v15 = vpop.f32.mrb[121].mxu1  ;;  %v7248_v47 = vadd.f32 %v2014_v29, %v9367_v33  ;;  %v7312_v51 = vadd.f32 %v2400_v38, %v9370_v34 }
 0x2e1   :  { %v2018_v54 = vpop.f32.mrb[122].mxu0  ;;  %v2404_v1 = vpop.f32.mrb[122].mxu1  ;;  %v7249_v6 = vadd.f32 %v2016_v45, %v9373_v40  ;;  %v7313_v44 = vadd.f32 %v2402_v15, %v9376_v41 }
 0x2e2   :  { %v7250_v48 = vadd.f32 %v2018_v54, %v9367_v33  ;;  %v7314_v21 = vadd.f32 %v2404_v1, %v9370_v34  ;;  %v2020_v46 = vpop.f32.mrb[123].mxu0  ;;  %v2406_v50 = vpop.f32.mrb[123].mxu1 }
 0x2e3   :  { %v7251_v22 = vadd.f32 %v2020_v46, %v9373_v40  ;;  %v7315_v23 = vadd.f32 %v2406_v50, %v9376_v41 }
 0x2e4   :  { %v2475_v25 = vpack.c.bf16 %v7250_v48, %v7248_v47  ;;  %v9688_v57 = vpack.c.bf16 %v7314_v21, %v7312_v51  ;;  %3841 = vmatmul.mubr.bf16.gmra.mrb[164].mxu0 %v9590_v7  ;;  %4227 = vmatmul.mubr.bf16.gmra.mrb[164].mxu1 %v9590_v7 }
 0x2e5   :  { %v2476_v29 = vpack.c.bf16 %v7251_v22, %v7249_v6  ;;  %v9692_v38 = vpack.c.bf16 %v7315_v23, %v7313_v44  ;;  %3850 = vmatprep.mubr.bf16.mxu0 %v9616_v14  ;;  %4236 = vmatprep.mubr.bf16.mxu1 %v9616_v14 }
 0x2e7   :  { %v2024_v45 = vpop.f32.mrb[124].mxu0  ;;  %v2410_v15 = vpop.f32.mrb[124].mxu1 }
 0x2e8   :  { %v2026_v54 = vpop.f32.mrb[125].mxu0  ;;  %v2412_v1 = vpop.f32.mrb[125].mxu1  ;;  %v7252_v47 = vadd.f32 %v2024_v45, %v9367_v33  ;;  %v7316_v51 = vadd.f32 %v2410_v15, %v9370_v34  ;;  %v8390_v15 = vld [vmem:[#allocation7 + $0x84] ss:$16 sps:$4 sm:$0xff]  }
 0x2e9   :  { %v2028_v46 = vpop.f32.mrb[126].mxu0  ;;  %v2414_v50 = vpop.f32.mrb[126].mxu1  ;;  %v7253_v44 = vadd.f32 %v2026_v54, %v9373_v40  ;;  %v7317_v14 = vadd.f32 %v2412_v1, %v9376_v41  ;;  %v8393_v54 = vld [vmem:[#allocation7 + $0x8c] ss:$16 sps:$4 sm:$0xff]   ;;  %v8388_v1 = vld [vmem:[#allocation7 + $0x80] ss:$16 sps:$4 sm:$0xff]  }
 0x2ea   :  { %v7254_v48 = vadd.f32 %v2028_v46, %v9367_v33  ;;  %v7318_v7 = vadd.f32 %v2414_v50, %v9370_v34  ;;  %v2030_v21 = vpop.f32.mrb[127].mxu0  ;;  %v2416_v6 = vpop.f32.mrb[127].mxu1  ;;  %v8366_v34 = vld [vmem:[#allocation7 + $0x4] ss:$16 sps:$4 sm:$0xff]   ;;  %v8391_v46 = vld [vmem:[#allocation7 + $0x88] ss:$16 sps:$4 sm:$0xff]  }
 0x2eb   :  { %v7255_v22 = vadd.f32 %v2030_v21, %v9373_v40  ;;  %v7319_v23 = vadd.f32 %v2416_v6, %v9376_v41  ;;  %5622 = vmatprep.subr.bf16.mxu0 %v8366_v34  ;;  %v8369_v40 = vld [vmem:[#allocation7 + $0xc] ss:$16 sps:$4 sm:$0xff]   ;;  %v8364_v41 = vld [vmem:[#allocation7] ss:$16 sps:$4 sm:$0xff]   ;;  %v8396_v50 = vld [vmem:[#allocation7 + $0xa4] ss:$16 sps:$4 sm:$0xff]  }
 0x2ec   :  { %v2479_v58 = vpack.c.bf16 %v7254_v48, %v7252_v47  ;;  %v9704_v10 = vpack.c.bf16 %v7318_v7, %v7316_v51  ;;  %3851 = vmatmul.mubr.bf16.gmra.mrb[168].mxu0 %v9610_v55  ;;  %4237 = vmatmul.mubr.bf16.gmra.mrb[168].mxu1 %v9610_v55  ;;  %v8367_v55 = vld [vmem:[#allocation7 + $0x8] ss:$16 sps:$4 sm:$0xff]   ;;  %v8402_v51 = vld [vmem:[#allocation7 + $0xc4] ss:$16 sps:$4 sm:$0xff]   ;;  %v8405_v48 = vld [vmem:[#allocation7 + $0xcc] ss:$16 sps:$4 sm:$0xff]  }
 0x2ed   :  { %v2480_v33 = vpack.c.bf16 %v7255_v22, %v7253_v44  ;;  %v9708_v45 = vpack.c.bf16 %v7319_v23, %v7317_v14  ;;  %3860 = vmatprep.mubr.bf16.mxu0 %v9636_v3  ;;  %4246 = vmatprep.mubr.bf16.mxu1 %v9636_v3  ;;  %v8375_v3 = vld [vmem:[#allocation7 + $0x2c] ss:$16 sps:$4 sm:$0xff]   ;;  %v8397_v47 = vld [vmem:[#allocation7 + $0xa8] ss:$16 sps:$4 sm:$0xff]   ;;  %v8400_v7 = vld [vmem:[#allocation7 + $0xc0] ss:$16 sps:$4 sm:$0xff]  }
 0x2ee   :  { %6008 = vmatprep.subr.bf16.mxu1 %v8369_v40  ;;  %v8403_v21 = vld [vmem:[#allocation7 + $0xc8] ss:$16 sps:$4 sm:$0xff]   ;;  %v8408_v6 = vld [vmem:[#allocation7 + $0xe4] ss:$16 sps:$4 sm:$0xff]   ;;  %v8417_v22 = vld [vmem:[#allocation7 + $0x10c] ss:$16 sps:$4 sm:$0xff]  }
 0x2ef   :  { %v8409_v44 = vld [vmem:[#allocation7 + $0xe8] ss:$16 sps:$4 sm:$0xff]   ;;  %v8414_v14 = vld [vmem:[#allocation7 + $0x104] ss:$16 sps:$4 sm:$0xff]   ;;  %v8412_v23 = vld [vmem:[#allocation7 + $0x100] ss:$16 sps:$4 sm:$0xff]  }
 0x2f0   :  { %v8420_v34 = vld [vmem:[#allocation7 + $0x124] ss:$16 sps:$4 sm:$0xff]   ;;  %v8421_v40 = vld [vmem:[#allocation7 + $0x128] ss:$16 sps:$4 sm:$0xff]  }
 0x2f4   :  { %3861 = vmatmul.mubr.bf16.gmra.mrb[172].mxu0 %v9630_v18  ;;  %4247 = vmatmul.mubr.bf16.gmra.mrb[172].mxu1 %v9630_v18  ;;  %v8372_v18 = vld [vmem:[#allocation7 + $0x24] ss:$16 sps:$4 sm:$0xff]  }
 0x2f5   :  { %3870 = vmatprep.mubr.bf16.mxu0 %v9656_v56  ;;  %4256 = vmatprep.mubr.bf16.mxu1 %v9656_v56  ;;  %v8378_v56 = vld [vmem:[#allocation7 + $0x44] ss:$16 sps:$4 sm:$0xff]  }
 0x2fc   :  { %3871 = vmatmul.mubr.bf16.gmra.mrb[176].mxu0 %v9650_v17  ;;  %4257 = vmatmul.mubr.bf16.gmra.mrb[176].mxu1 %v9650_v17  ;;  %v8370_v17 = vld [vmem:[#allocation7 + $0x20] ss:$16 sps:$4 sm:$0xff]  }
 0x2fd   :  { %3880 = vmatprep.mubr.bf16.mxu0 %v2472_v19  ;;  %4266 = vmatprep.mubr.bf16.mxu1 %v2472_v19  ;;  %v8379_v19 = vld [vmem:[#allocation7 + $0x48] ss:$16 sps:$4 sm:$0xff]  }
 0x304   :  { %3881 = vmatmul.mubr.bf16.gmra.mrb[180].mxu0 %v9670_v31  ;;  %4267 = vmatmul.mubr.bf16.gmra.mrb[180].mxu1 %v9670_v31  ;;  %v8376_v31 = vld [vmem:[#allocation7 + $0x40] ss:$16 sps:$4 sm:$0xff]  }
 0x305   :  { %3890 = vmatprep.mubr.bf16.mxu0 %v2476_v29  ;;  %4276 = vmatprep.mubr.bf16.mxu1 %v2476_v29  ;;  %v8385_v29 = vld [vmem:[#allocation7 + $0x68] ss:$16 sps:$4 sm:$0xff]  }
 0x30c   :  { %3891 = vmatmul.mubr.bf16.gmra.mrb[184].mxu0 %v2475_v25  ;;  %4277 = vmatmul.mubr.bf16.gmra.mrb[184].mxu1 %v2475_v25  ;;  %v8384_v25 = vld [vmem:[#allocation7 + $0x64] ss:$16 sps:$4 sm:$0xff]  }
 0x30d   :  { %3900 = vmatprep.mubr.bf16.mxu0 %v2480_v33  ;;  %4286 = vmatprep.mubr.bf16.mxu1 %v2480_v33  ;;  %v8415_v33 = vld [vmem:[#allocation7 + $0x108] ss:$16 sps:$4 sm:$0xff]  }
 0x314   :  { %3901 = vmatmul.mubr.bf16.gmra.mrb[188].mxu0 %v2479_v58  ;;  %4287 = vmatmul.mubr.bf16.gmra.mrb[188].mxu1 %v2479_v58  ;;  %v8373_v58 = vld [vmem:[#allocation7 + $0x28] ss:$16 sps:$4 sm:$0xff]  }
 0x315   :  { %3943 = vmatprep.mubr.bf16.mxu0 %v9394_v52  ;;  %4329 = vmatprep.mubr.bf16.mxu1 %v9394_v52  ;;  %v8381_v52 = vld [vmem:[#allocation7 + $0x4c] ss:$16 sps:$4 sm:$0xff]  }
 0x31c   :  { %3944 = vmatmul.mubr.bf16.vlgmr.msra.gmra.mrb[128].mxu0 %v9388_v0  ;;  %4330 = vmatmul.mubr.bf16.vlgmr.msra.gmra.mrb[128].mxu1 %v9388_v0  ;;  %v8387_v0 = vld [vmem:[#allocation7 + $0x6c] ss:$16 sps:$4 sm:$0xff]  }
 0x31d   :  { %3953 = vmatprep.mubr.bf16.mxu0 %v9420_v30  ;;  %4339 = vmatprep.mubr.bf16.mxu1 %v9420_v30  ;;  %v8382_v30 = vld [vmem:[#allocation7 + $0x60] ss:$16 sps:$4 sm:$0xff]  }
 0x31e   :  { %5623 = vmatpush1.bf16.msra.mxu0 %v8364_v41  ;;  %6009 = vmatpush1.bf16.msra.mxu1 %v8367_v55  ;;  %v8426_v41 = vld [vmem:[#allocation7 + $0x144] ss:$16 sps:$4 sm:$0xff]   ;;  %v8429_v55 = vld [vmem:[#allocation7 + $0x14c] ss:$16 sps:$4 sm:$0xff]  }
 0x31f   :  { %5624 = vmatprep.subr.bf16.mxu0 %v8372_v18  ;;  %6010 = vmatprep.subr.bf16.mxu1 %v8375_v3  ;;  %v8424_v18 = vld [vmem:[#allocation7 + $0x140] ss:$16 sps:$4 sm:$0xff]   ;;  %v8427_v3 = vld [vmem:[#allocation7 + $0x148] ss:$16 sps:$4 sm:$0xff]  }
 0x322   :  { %5625 = vmatpush1.bf16.msra.mxu0 %v8370_v17  ;;  %6011 = vmatpush1.bf16.msra.mxu1 %v8373_v58  ;;  %v8432_v17 = vld [vmem:[#allocation7 + $0x164] ss:$16 sps:$4 sm:$0xff]   ;;  %v8433_v58 = vld [vmem:[#allocation7 + $0x168] ss:$16 sps:$4 sm:$0xff]  }
 0x323   :  { %5626 = vmatprep.subr.bf16.mxu0 %v8378_v56  ;;  %6012 = vmatprep.subr.bf16.mxu1 %v8381_v52  ;;  %v8438_v56 = vld [vmem:[#allocation7 + $0x184] ss:$16 sps:$4 sm:$0xff]   ;;  %v8441_v52 = vld [vmem:[#allocation7 + $0x18c] ss:$16 sps:$4 sm:$0xff]  }
 0x324   :  { %3954 = vmatmul.mubr.bf16.gmra.mrb[132].mxu0 %v9414_v62  ;;  %4340 = vmatmul.mubr.bf16.gmra.mrb[132].mxu1 %v9414_v62  ;;  %v8399_v62 = vld [vmem:[#allocation7 + $0xac] ss:$16 sps:$4 sm:$0xff]  }
 0x325   :  { %3963 = vmatprep.mubr.bf16.mxu0 %v9446_v28  ;;  %4349 = vmatprep.mubr.bf16.mxu1 %v9446_v28  ;;  %v8394_v28 = vld [vmem:[#allocation7 + $0xa0] ss:$16 sps:$4 sm:$0xff]  }
 0x326   :  { %5627 = vmatpush1.bf16.msra.mxu0 %v8376_v31  ;;  %6013 = vmatpush1.bf16.msra.mxu1 %v8379_v19  ;;  %v8436_v31 = vld [vmem:[#allocation7 + $0x180] ss:$16 sps:$4 sm:$0xff]   ;;  %v8439_v19 = vld [vmem:[#allocation7 + $0x188] ss:$16 sps:$4 sm:$0xff]  }
 0x327   :  { %5628 = vmatprep.subr.bf16.mxu0 %v8384_v25  ;;  %6014 = vmatprep.subr.bf16.mxu1 %v8387_v0  ;;  %v8444_v25 = vld [vmem:[#allocation7 + $0x1a4] ss:$16 sps:$4 sm:$0xff]   ;;  %v8445_v0 = vld [vmem:[#allocation7 + $0x1a8] ss:$16 sps:$4 sm:$0xff]  }
 0x32a   :  { %5629 = vmatpush1.bf16.msra.mxu0 %v8382_v30  ;;  %6015 = vmatpush1.bf16.msra.mxu1 %v8385_v29  ;;  %v8450_v30 = vld [vmem:[#allocation7 + $0x1c4] ss:$16 sps:$4 sm:$0xff]   ;;  %v8453_v29 = vld [vmem:[#allocation7 + $0x1cc] ss:$16 sps:$4 sm:$0xff]  }
 0x32b   :  { %5630 = vmatprep.subr.bf16.mxu0 %v8390_v15  ;;  %6016 = vmatprep.subr.bf16.mxu1 %v8393_v54  ;;  %v8448_v15 = vld [vmem:[#allocation7 + $0x1c0] ss:$16 sps:$4 sm:$0xff]   ;;  %v8451_v54 = vld [vmem:[#allocation7 + $0x1c8] ss:$16 sps:$4 sm:$0xff]  }
 0x32c   :  { %3964 = vmatmul.mubr.bf16.gmra.mrb[136].mxu0 %v9440_v43  ;;  %4350 = vmatmul.mubr.bf16.gmra.mrb[136].mxu1 %v9440_v43  ;;  %v8411_v43 = vld [vmem:[#allocation7 + $0xec] ss:$16 sps:$4 sm:$0xff]  }
 0x32d   :  { %3973 = vmatprep.mubr.bf16.mxu0 %v9472_v2  ;;  %4359 = vmatprep.mubr.bf16.mxu1 %v9472_v2  ;;  %v8406_v2 = vld [vmem:[#allocation7 + $0xe0] ss:$16 sps:$4 sm:$0xff]  }
 0x32e   :  { %5631 = vmatpush1.bf16.msra.mxu0 %v8388_v1  ;;  %6017 = vmatpush1.bf16.msra.mxu1 %v8391_v46 }
 0x32f   :  { %5632 = vmatprep.subr.bf16.mxu0 %v8396_v50  ;;  %6018 = vmatprep.subr.bf16.mxu1 %v8399_v62 }
 0x332   :  { %5633 = vmatpush1.bf16.msra.mxu0 %v8394_v28  ;;  %6019 = vmatpush1.bf16.msra.mxu1 %v8397_v47 }
 0x333   :  { %5634 = vmatprep.subr.bf16.mxu0 %v8402_v51  ;;  %6020 = vmatprep.subr.bf16.mxu1 %v8405_v48 }
 0x334   :  { %3974 = vmatmul.mubr.bf16.gmra.mrb[140].mxu0 %v9466_v11  ;;  %4360 = vmatmul.mubr.bf16.gmra.mrb[140].mxu1 %v9466_v11  ;;  %v8423_v11 = vld [vmem:[#allocation7 + $0x12c] ss:$16 sps:$4 sm:$0xff]  }
 0x335   :  { %3983 = vmatprep.mubr.bf16.mxu0 %v9498_v37  ;;  %4369 = vmatprep.mubr.bf16.mxu1 %v9498_v37  ;;  %v8418_v37 = vld [vmem:[#allocation7 + $0x120] ss:$16 sps:$4 sm:$0xff]  }
 0x336   :  { %5635 = vmatpush1.bf16.msra.mxu0 %v8400_v7  ;;  %6021 = vmatpush1.bf16.msra.mxu1 %v8403_v21 }
 0x337   :  { %5636 = vmatprep.subr.bf16.mxu0 %v8408_v6  ;;  %6022 = vmatprep.subr.bf16.mxu1 %v8411_v43 }
 0x33a   :  { %5637 = vmatpush1.bf16.msra.mxu0 %v8406_v2  ;;  %6023 = vmatpush1.bf16.msra.mxu1 %v8409_v44 }
 0x33b   :  { %5638 = vmatprep.subr.bf16.mxu0 %v8414_v14  ;;  %6024 = vmatprep.subr.bf16.mxu1 %v8417_v22 }
 0x33c   :  { %3984 = vmatmul.mubr.bf16.gmra.mrb[144].mxu0 %v9492_v13  ;;  %4370 = vmatmul.mubr.bf16.gmra.mrb[144].mxu1 %v9492_v13  ;;  %v8435_v13 = vld [vmem:[#allocation7 + $0x16c] ss:$16 sps:$4 sm:$0xff]  }
 0x33d   :  { %3993 = vmatprep.mubr.bf16.mxu0 %v9518_v32  ;;  %4379 = vmatprep.mubr.bf16.mxu1 %v9518_v32  ;;  %v8430_v32 = vld [vmem:[#allocation7 + $0x160] ss:$16 sps:$4 sm:$0xff]  }
 0x33e   :  { %5639 = vmatpush1.bf16.msra.mxu0 %v8412_v23  ;;  %6025 = vmatpush1.bf16.msra.mxu1 %v8415_v33 }
 0x33f   :  { %5640 = vmatprep.subr.bf16.mxu0 %v8420_v34  ;;  %6026 = vmatprep.subr.bf16.mxu1 %v8423_v11 }
 0x342   :  { %5641 = vmatpush1.bf16.msra.mxu0 %v8418_v37  ;;  %6027 = vmatpush1.bf16.msra.mxu1 %v8421_v40 }
 0x343   :  { %5642 = vmatprep.subr.bf16.mxu0 %v8426_v41  ;;  %6028 = vmatprep.subr.bf16.mxu1 %v8429_v55  ;;  %v8460_v55 = vld [vmem:[#allocation7 + $0x200] ss:$16 sps:$4 sm:$0xff]  }
 0x344   :  { %3994 = vmatmul.mubr.bf16.gmra.mrb[148].mxu0 %v9512_v4  ;;  %4380 = vmatmul.mubr.bf16.gmra.mrb[148].mxu1 %v9512_v4  ;;  %v8447_v4 = vld [vmem:[#allocation7 + $0x1ac] ss:$16 sps:$4 sm:$0xff]  }
 0x345   :  { %4003 = vmatprep.mubr.bf16.mxu0 %v9538_v49  ;;  %4389 = vmatprep.mubr.bf16.mxu1 %v9538_v49  ;;  %v8442_v49 = vld [vmem:[#allocation7 + $0x1a0] ss:$16 sps:$4 sm:$0xff]  }
 0x346   :  { %5643 = vmatpush1.bf16.msra.mxu0 %v8424_v18  ;;  %6029 = vmatpush1.bf16.msra.mxu1 %v8427_v3  ;;  %v8463_v18 = vld [vmem:[#allocation7 + $0x208] ss:$16 sps:$4 sm:$0xff]  }
 0x347   :  { %5644 = vmatprep.subr.bf16.mxu0 %v8432_v17  ;;  %6030 = vmatprep.subr.bf16.mxu1 %v8435_v13 }
 0x34a   :  { %5645 = vmatpush1.bf16.msra.mxu0 %v8430_v32  ;;  %6031 = vmatpush1.bf16.msra.mxu1 %v8433_v58  ;;  %v8468_v58 = vld [vmem:[#allocation7 + $0x224] ss:$16 sps:$4 sm:$0xff]  }
 0x34b   :  { %5646 = vmatprep.subr.bf16.mxu0 %v8438_v56  ;;  %6032 = vmatprep.subr.bf16.mxu1 %v8441_v52  ;;  %v8471_v56 = vld [vmem:[#allocation7 + $0x22c] ss:$16 sps:$4 sm:$0xff]  }
 0x34c   :  { %4004 = vmatmul.mubr.bf16.gmra.mrb[152].mxu0 %v9532_v9  ;;  %4390 = vmatmul.mubr.bf16.gmra.mrb[152].mxu1 %v9532_v9  ;;  %v8456_v9 = vld [vmem:[#allocation7 + $0x1e4] ss:$16 sps:$4 sm:$0xff]  }
 0x34d   :  { %4013 = vmatprep.mubr.bf16.mxu0 %v9558_v20  ;;  %4399 = vmatprep.mubr.bf16.mxu1 %v9558_v20  ;;  %v8454_v20 = vld [vmem:[#allocation7 + $0x1e0] ss:$16 sps:$4 sm:$0xff]  }
 0x34e   :  { %5647 = vmatpush1.bf16.msra.mxu0 %v8436_v31  ;;  %6033 = vmatpush1.bf16.msra.mxu1 %v8439_v19 }
 0x34f   :  { %5648 = vmatprep.subr.bf16.mxu0 %v8444_v25  ;;  %6034 = vmatprep.subr.bf16.mxu1 %v8447_v4 }
 0x352   :  { %5649 = vmatpush1.bf16.msra.mxu0 %v8442_v49  ;;  %6035 = vmatpush1.bf16.msra.mxu1 %v8445_v0 }
 0x353   :  { %5650 = vmatprep.subr.bf16.mxu0 %v8450_v30  ;;  %6036 = vmatprep.subr.bf16.mxu1 %v8453_v29 }
 0x354   :  { %4014 = vmatmul.mubr.bf16.gmra.mrb[156].mxu0 %v9552_v24  ;;  %4400 = vmatmul.mubr.bf16.gmra.mrb[156].mxu1 %v9552_v24  ;;  %v8459_v24 = vld [vmem:[#allocation7 + $0x1ec] ss:$16 sps:$4 sm:$0xff]  }
 0x355   :  { %4023 = vmatprep.mubr.bf16.mxu0 %v9578_v35  ;;  %4409 = vmatprep.mubr.bf16.mxu1 %v9578_v35  ;;  %v8462_v35 = vld [vmem:[#allocation7 + $0x204] ss:$16 sps:$4 sm:$0xff]  }
 0x356   :  { %5651 = vmatpush1.bf16.msra.mxu0 %v8448_v15  ;;  %6037 = vmatpush1.bf16.msra.mxu1 %v8451_v54  ;;  %v8466_v54 = vld [vmem:[#allocation7 + $0x220] ss:$16 sps:$4 sm:$0xff]  }
 0x357   :  { %5652 = vmatprep.subr.bf16.mxu0 %v8456_v9  ;;  %6038 = vmatprep.subr.bf16.mxu1 %v8459_v24  ;;  %v8469_v9 = vld [vmem:[#allocation7 + $0x228] ss:$16 sps:$4 sm:$0xff]   ;;  %v8474_v24 = vld [vmem:[#allocation7 + $0x244] ss:$16 sps:$4 sm:$0xff]  }
 0x35a   :  { %5653 = vmatpush1.bf16.msra.mxu0 %v8454_v20 }
 0x35b   :  { %5815 = vmatprep.subr.bf16.mxu0 %v8462_v35 }
 0x35c   :  { %4024 = vmatmul.mubr.bf16.gmra.mrb[160].mxu0 %v9572_v60  ;;  %4410 = vmatmul.mubr.bf16.gmra.mrb[160].mxu1 %v9572_v60  ;;  %v8457_v60 = vld [vmem:[#allocation7 + $0x1e8] ss:$16 sps:$4 sm:$0xff]  }
 0x35d   :  { %4033 = vmatprep.mubr.bf16.mxu0 %v9598_v27  ;;  %4419 = vmatprep.mubr.bf16.mxu1 %v9598_v27  ;;  %v4490_v27 = vld [vmem:[%s10226_s8] sm:$0xf] }
 0x35e   :  { %6039 = vmatpush1.bf16.msra.mxu1 %v8457_v60 }
 0x364   :  { %4034 = vmatmul.mubr.bf16.gmra.mrb[164].mxu0 %v9592_v53  ;;  %4420 = vmatmul.mubr.bf16.gmra.mrb[164].mxu1 %v9592_v53  ;;  %v8465_v53 = vld [vmem:[#allocation7 + $0x20c] ss:$16 sps:$4 sm:$0xff]  }
 0x365   :  { %4043 = vmatprep.mubr.bf16.mxu0 %v9618_v42  ;;  %4429 = vmatprep.mubr.bf16.mxu1 %v9618_v42  ;;  %v9791_v42 = vrot.slane %v4490_v27, %v8954_v8 }
 0x366   :  { %6201 = vmatprep.subr.bf16.mxu1 %v8465_v53 }
 0x36c   :  { %4044 = vmatmul.mubr.bf16.gmra.mrb[168].mxu0 %v9612_v16  ;;  %4430 = vmatmul.mubr.bf16.gmra.mrb[168].mxu1 %v9612_v16  ;;  %v9788_v16 = vrot.slane %v4490_v27, %v8936_v59 }
 0x36d   :  { %4053 = vmatprep.mubr.bf16.mxu0 %v9638_v63  ;;  %4439 = vmatprep.mubr.bf16.mxu1 %v9638_v63 }
 0x374   :  { %4054 = vmatmul.mubr.bf16.gmra.mrb[172].mxu0 %v9632_v26  ;;  %4440 = vmatmul.mubr.bf16.gmra.mrb[172].mxu1 %v9632_v26  ;;  %v10238_v26 = vld [vmem:[#allocation11_spill] sm:$0xff] }
 0x375   :  { %4063 = vmatprep.mubr.bf16.mxu0 %v9658_v5  ;;  %4449 = vmatprep.mubr.bf16.mxu1 %v9658_v5  ;;  %v9797_v63 = vrot.slane %v4490_v27, %v10238_v26 }
 0x37c   :  { %4064 = vmatmul.mubr.bf16.gmra.mrb[176].mxu0 %v9652_v36  ;;  %4450 = vmatmul.mubr.bf16.gmra.mrb[176].mxu1 %v9652_v36 }
 0x37d   :  { %4073 = vmatprep.mubr.bf16.mxu0 %v9676_v39  ;;  %4459 = vmatprep.mubr.bf16.mxu1 %v9676_v39 }
 0x384   :  { %4074 = vmatmul.mubr.bf16.gmra.mrb[180].mxu0 %v9672_v12  ;;  %4460 = vmatmul.mubr.bf16.gmra.mrb[180].mxu1 %v9672_v12 }
 0x385   :  { %4083 = vmatprep.mubr.bf16.mxu0 %v9692_v38  ;;  %4469 = vmatprep.mubr.bf16.mxu1 %v9692_v38 }
 0x38c   :  { %4084 = vmatmul.mubr.bf16.gmra.mrb[184].mxu0 %v9688_v57  ;;  %4470 = vmatmul.mubr.bf16.gmra.mrb[184].mxu1 %v9688_v57  ;;  %v9794_v57 = vrot.slane %v4490_v27, %v8942_v61  ;;  %v8477_v27 = vld [vmem:[#allocation7 + $0x24c] ss:$16 sps:$4 sm:$0xff]  }
 0x38d   :  { %4093 = vmatprep.mubr.bf16.mxu0 %v9708_v45  ;;  %4479 = vmatprep.mubr.bf16.mxu1 %v9708_v45 }
 0x394   :  { %4094 = vmatmul.mubr.bf16.gmra.mrb[188].mxu0 %v9704_v10  ;;  %4480 = vmatmul.mubr.bf16.gmra.mrb[188].mxu1 %v9704_v10 }
 0x3ef   :  { %v3945_v36 = vpop.f32.mrb[128].mxu0  ;;  %v4331_v5 = vpop.f32.mrb[128].mxu1 }
 0x3f0   :  { %v4512_v10 = vadd.f32 %v9788_v16, %v3945_v36  ;;  %v4514_v12 = vadd.f32 %v9791_v42, %v4331_v5  ;;  %v3947_v39 = vpop.f32.mrb[129].mxu0  ;;  %v4333_v38 = vpop.f32.mrb[129].mxu1 }
 0x3f1   :  { %v4513_v45 = vadd.f32 %v9794_v57, %v3947_v39  ;;  %v4515_v1 = vadd.f32 %v9797_v63, %v4333_v38  ;;  %v3949_v46 = vpop.f32.mrb[130].mxu0  ;;  %v4335_v50 = vpop.f32.mrb[130].mxu1 }
 0x3f2   :  { %v4516_v62 = vadd.f32 %v9788_v16, %v3949_v46  ;;  %v4518_v28 = vadd.f32 %v9791_v42, %v4335_v50  ;;  %v3951_v47 = vpop.f32.mrb[131].mxu0  ;;  %v4337_v51 = vpop.f32.mrb[131].mxu1  ;;  %v4640_v21 = vmax.f32 %v4512_v10, 0.0  ;;  %v4642_v6 = vmax.f32 %v4514_v12, 0.0 }
 0x3f3   :  { %v4517_v48 = vadd.f32 %v9794_v57, %v3951_v47  ;;  %v4519_v7 = vadd.f32 %v9797_v63, %v4337_v51  ;;  %v4641_v44 = vmax.f32 %v4513_v45, 0.0  ;;  %v4643_v14 = vmax.f32 %v4515_v1, 0.0 }
 0x3f4   :  { %v4644_v43 = vmax.f32 %v4516_v62, 0.0  ;;  %v4646_v2 = vmax.f32 %v4518_v28, 0.0  ;;  %v8472_v62 = vld [vmem:[#allocation7 + $0x240] ss:$16 sps:$4 sm:$0xff]   ;;  %v8475_v28 = vld [vmem:[#allocation7 + $0x248] ss:$16 sps:$4 sm:$0xff]  }
 0x3f5   :  { %v4645_v22 = vmax.f32 %v4517_v48, 0.0  ;;  %v4647_v23 = vmax.f32 %v4519_v7, 0.0 }
 0x3f6   :  { %v4768_v33 = vpack.c.bf16 %v4644_v43, %v4640_v21  ;;  %v9807_v34 = vpack.c.bf16 %v4646_v2, %v4642_v6  ;;  %v8480_v21 = vld [vmem:[#allocation7 + $0x264] ss:$16 sps:$4 sm:$0xff]   ;;  %v8483_v6 = vld [vmem:[#allocation7 + $0x26c] ss:$16 sps:$4 sm:$0xff]  }
 0x3f7   :  { %v4769_v11 = vpack.c.bf16 %v4645_v22, %v4641_v44  ;;  %v9809_v37 = vpack.c.bf16 %v4647_v23, %v4643_v14  ;;  %v3955_v40 = vpop.f32.mrb[132].mxu0  ;;  %v4341_v41 = vpop.f32.mrb[132].mxu1 }
 0x3f8   :  { %v4520_v3 = vadd.f32 %v9788_v16, %v3955_v40  ;;  %v4522_v17 = vadd.f32 %v9791_v42, %v4341_v41  ;;  %v3957_v13 = vpop.f32.mrb[133].mxu0  ;;  %v4343_v32 = vpop.f32.mrb[133].mxu1 }
 0x3f9   :  { %v4521_v52 = vadd.f32 %v9794_v57, %v3957_v13  ;;  %v4523_v31 = vadd.f32 %v9797_v63, %v4343_v32  ;;  %v3959_v19 = vpop.f32.mrb[134].mxu0  ;;  %v4345_v25 = vpop.f32.mrb[134].mxu1  ;;  %5654 = vmatprep.mubr.bf16.mxu0 %v4769_v11  ;;  %6040 = vmatprep.mubr.bf16.mxu1 %v4769_v11 }
 0x3fa   :  { %v4524_v4 = vadd.f32 %v9788_v16, %v3959_v19  ;;  %v4526_v49 = vadd.f32 %v9791_v42, %v4345_v25  ;;  %v3961_v0 = vpop.f32.mrb[135].mxu0  ;;  %v4347_v30 = vpop.f32.mrb[135].mxu1  ;;  %5655 = vmatmul.mubr.bf16.vlgmr.msra.gmra.mrb[192].mxu0 %v4768_v33  ;;  %6041 = vmatmul.mubr.bf16.vlgmr.msra.gmra.mrb[192].mxu1 %v4768_v33  ;;  %v4648_v20 = vmax.f32 %v4520_v3, 0.0  ;;  %v4650_v60 = vmax.f32 %v4522_v17, 0.0  ;;  %v8486_v3 = vld [vmem:[#allocation7 + $0x284] ss:$16 sps:$4 sm:$0xff]  }
 0x3fb   :  { %v4525_v29 = vadd.f32 %v9794_v57, %v3961_v0  ;;  %v4527_v15 = vadd.f32 %v9797_v63, %v4347_v30  ;;  %5816 = vmatpush1.bf16.msra.mxu0 %v8460_v55  ;;  %6202 = vmatpush1.bf16.msra.mxu1 %v8463_v18  ;;  %v4649_v36 = vmax.f32 %v4521_v52, 0.0  ;;  %v4651_v5 = vmax.f32 %v4523_v31, 0.0  ;;  %v8478_v55 = vld [vmem:[#allocation7 + $0x260] ss:$16 sps:$4 sm:$0xff]   ;;  %v8481_v18 = vld [vmem:[#allocation7 + $0x268] ss:$16 sps:$4 sm:$0xff]  }
 0x3fc   :  { %v4652_v35 = vmax.f32 %v4524_v4, 0.0  ;;  %v4654_v53 = vmax.f32 %v4526_v49, 0.0  ;;  %5817 = vmatprep.subr.bf16.mxu0 %v8468_v58  ;;  %6203 = vmatprep.subr.bf16.mxu1 %v8471_v56  ;;  %v8489_v56 = vld [vmem:[#allocation7 + $0x28c] ss:$16 sps:$4 sm:$0xff]  }
 0x3fd   :  { %v4653_v10 = vmax.f32 %v4525_v29, 0.0  ;;  %v4655_v12 = vmax.f32 %v4527_v15, 0.0 }
 0x3fe   :  { %v4772_v39 = vpack.c.bf16 %v4652_v35, %v4648_v20  ;;  %v9819_v38 = vpack.c.bf16 %v4654_v53, %v4650_v60  ;;  %v8492_v53 = vld [vmem:[#allocation7 + $0x2a4] ss:$16 sps:$4 sm:$0xff]  }
 0x3ff   :  { %v4773_v45 = vpack.c.bf16 %v4653_v10, %v4649_v36  ;;  %v9821_v1 = vpack.c.bf16 %v4655_v12, %v4651_v5  ;;  %v3965_v46 = vpop.f32.mrb[136].mxu0  ;;  %v4351_v50 = vpop.f32.mrb[136].mxu1  ;;  %5818 = vmatpush1.bf16.msra.mxu0 %v8466_v54  ;;  %6204 = vmatpush1.bf16.msra.mxu1 %v8469_v9  ;;  %v8484_v54 = vld [vmem:[#allocation7 + $0x280] ss:$16 sps:$4 sm:$0xff]   ;;  %v8487_v9 = vld [vmem:[#allocation7 + $0x288] ss:$16 sps:$4 sm:$0xff]  }
 0x400   :  { %v4528_v47 = vadd.f32 %v9788_v16, %v3965_v46  ;;  %v4530_v51 = vadd.f32 %v9791_v42, %v4351_v50  ;;  %v3967_v48 = vpop.f32.mrb[137].mxu0  ;;  %v4353_v7 = vpop.f32.mrb[137].mxu1  ;;  %5819 = vmatprep.subr.bf16.mxu0 %v8474_v24  ;;  %6205 = vmatprep.subr.bf16.mxu1 %v8477_v27  ;;  %v8495_v27 = vld [vmem:[#allocation7 + $0x2ac] ss:$16 sps:$4 sm:$0xff]  }
 0x401   :  { %v4529_v43 = vadd.f32 %v9794_v57, %v3967_v48  ;;  %v4531_v2 = vadd.f32 %v9797_v63, %v4353_v7  ;;  %v3969_v44 = vpop.f32.mrb[138].mxu0  ;;  %v4355_v14 = vpop.f32.mrb[138].mxu1  ;;  %5664 = vmatprep.mubr.bf16.mxu0 %v4773_v45  ;;  %6050 = vmatprep.mubr.bf16.mxu1 %v4773_v45  ;;  %v8498_v48 = vld [vmem:[#allocation7 + $0x2c4] ss:$16 sps:$4 sm:$0xff]  }
 0x402   :  { %v4532_v22 = vadd.f32 %v9788_v16, %v3969_v44  ;;  %v4534_v23 = vadd.f32 %v9791_v42, %v4355_v14  ;;  %v3971_v33 = vpop.f32.mrb[139].mxu0  ;;  %v4357_v11 = vpop.f32.mrb[139].mxu1  ;;  %5665 = vmatmul.mubr.bf16.gmra.mrb[196].mxu0 %v4772_v39  ;;  %6051 = vmatmul.mubr.bf16.gmra.mrb[196].mxu1 %v4772_v39  ;;  %v4656_v17 = vmax.f32 %v4528_v47, 0.0  ;;  %v4658_v13 = vmax.f32 %v4530_v51, 0.0  ;;  %v8490_v47 = vld [vmem:[#allocation7 + $0x2a0] ss:$16 sps:$4 sm:$0xff]  }
 0x403   :  { %v4533_v40 = vadd.f32 %v9794_v57, %v3971_v33  ;;  %v4535_v41 = vadd.f32 %v9797_v63, %v4357_v11  ;;  %5820 = vmatpush1.bf16.msra.mxu0 %v8472_v62  ;;  %6206 = vmatpush1.bf16.msra.mxu1 %v8475_v28  ;;  %v4657_v52 = vmax.f32 %v4529_v43, 0.0  ;;  %v4659_v31 = vmax.f32 %v4531_v2, 0.0  ;;  %v8493_v51 = vld [vmem:[#allocation7 + $0x2a8] ss:$16 sps:$4 sm:$0xff]   ;;  %v8501_v2 = vld [vmem:[#allocation7 + $0x2cc] ss:$16 sps:$4 sm:$0xff]  }
 0x404   :  { %v4660_v32 = vmax.f32 %v4532_v22, 0.0  ;;  %v4662_v58 = vmax.f32 %v4534_v23, 0.0  ;;  %5821 = vmatprep.subr.bf16.mxu0 %v8480_v21  ;;  %6207 = vmatprep.subr.bf16.mxu1 %v8483_v6 }
 0x405   :  { %v4661_v19 = vmax.f32 %v4533_v40, 0.0  ;;  %v4663_v25 = vmax.f32 %v4535_v41, 0.0 }
 0x406   :  { %v4776_v4 = vpack.c.bf16 %v4660_v32, %v4656_v17  ;;  %v9831_v49 = vpack.c.bf16 %v4662_v58, %v4658_v13  ;;  %v8499_v17 = vld [vmem:[#allocation7 + $0x2c8] ss:$16 sps:$4 sm:$0xff]  }
 0x407   :  { %v4777_v0 = vpack.c.bf16 %v4661_v19, %v4657_v52  ;;  %v9833_v30 = vpack.c.bf16 %v4663_v25, %v4659_v31  ;;  %v3975_v29 = vpop.f32.mrb[140].mxu0  ;;  %v4361_v15 = vpop.f32.mrb[140].mxu1  ;;  %5822 = vmatpush1.bf16.msra.mxu0 %v8478_v55  ;;  %6208 = vmatpush1.bf16.msra.mxu1 %v8481_v18  ;;  %v8504_v52 = vld [vmem:[#allocation7 + $0x2e4] ss:$16 sps:$4 sm:$0xff]   ;;  %v8507_v31 = vld [vmem:[#allocation7 + $0x2ec] ss:$16 sps:$4 sm:$0xff]  }
 0x408   :  { %v4536_v24 = vadd.f32 %v9788_v16, %v3975_v29  ;;  %v4538_v20 = vadd.f32 %v9791_v42, %v4361_v15  ;;  %v3977_v60 = vpop.f32.mrb[141].mxu0  ;;  %v4363_v35 = vpop.f32.mrb[141].mxu1  ;;  %5823 = vmatprep.subr.bf16.mxu0 %v8486_v3  ;;  %6209 = vmatprep.subr.bf16.mxu1 %v8489_v56  ;;  %v8496_v3 = vld [vmem:[#allocation7 + $0x2c0] ss:$16 sps:$4 sm:$0xff]  }
 0x409   :  { %v4537_v36 = vadd.f32 %v9794_v57, %v3977_v60  ;;  %v4539_v5 = vadd.f32 %v9797_v63, %v4363_v35  ;;  %v3979_v10 = vpop.f32.mrb[142].mxu0  ;;  %v4365_v12 = vpop.f32.mrb[142].mxu1  ;;  %5674 = vmatprep.mubr.bf16.mxu0 %v4777_v0  ;;  %6060 = vmatprep.mubr.bf16.mxu1 %v4777_v0  ;;  %v8502_v60 = vld [vmem:[#allocation7 + $0x2e0] ss:$16 sps:$4 sm:$0xff]   ;;  %v8505_v35 = vld [vmem:[#allocation7 + $0x2e8] ss:$16 sps:$4 sm:$0xff]  }
 0x40a   :  { %v4540_v39 = vadd.f32 %v9788_v16, %v3979_v10  ;;  %v4542_v45 = vadd.f32 %v9791_v42, %v4365_v12  ;;  %v3981_v46 = vpop.f32.mrb[143].mxu0  ;;  %v4367_v50 = vpop.f32.mrb[143].mxu1  ;;  %5675 = vmatmul.mubr.bf16.gmra.mrb[200].mxu0 %v4776_v4  ;;  %6061 = vmatmul.mubr.bf16.gmra.mrb[200].mxu1 %v4776_v4  ;;  %v4664_v7 = vmax.f32 %v4536_v24, 0.0  ;;  %v4666_v21 = vmax.f32 %v4538_v20, 0.0  ;;  %v8513_v12 = vld [vmem:[#allocation7 + $0x30c] ss:$16 sps:$4 sm:$0xff]  }
 0x40b   :  { %v4541_v62 = vadd.f32 %v9794_v57, %v3981_v46  ;;  %v4543_v28 = vadd.f32 %v9797_v63, %v4367_v50  ;;  %5824 = vmatpush1.bf16.msra.mxu0 %v8484_v54  ;;  %6210 = vmatpush1.bf16.msra.mxu1 %v8487_v9  ;;  %v4665_v44 = vmax.f32 %v4537_v36, 0.0  ;;  %v4667_v14 = vmax.f32 %v4539_v5, 0.0 }
 0x40c   :  { %v4668_v6 = vmax.f32 %v4540_v39, 0.0  ;;  %v4670_v43 = vmax.f32 %v4542_v45, 0.0  ;;  %5825 = vmatprep.subr.bf16.mxu0 %v8492_v53  ;;  %6211 = vmatprep.subr.bf16.mxu1 %v8495_v27  ;;  %v8510_v53 = vld [vmem:[#allocation7 + $0x304] ss:$16 sps:$4 sm:$0xff]  }
 0x40d   :  { %v4669_v22 = vmax.f32 %v4541_v62, 0.0  ;;  %v4671_v23 = vmax.f32 %v4543_v28, 0.0 }
 0x40e   :  { %v4780_v33 = vpack.c.bf16 %v4668_v6, %v4664_v7  ;;  %v9843_v11 = vpack.c.bf16 %v4670_v43, %v4666_v21  ;;  %v8508_v21 = vld [vmem:[#allocation7 + $0x300] ss:$16 sps:$4 sm:$0xff]   ;;  %v8511_v6 = vld [vmem:[#allocation7 + $0x308] ss:$16 sps:$4 sm:$0xff]  }
 0x40f   :  { %v4781_v40 = vpack.c.bf16 %v4669_v22, %v4665_v44  ;;  %v9845_v41 = vpack.c.bf16 %v4671_v23, %v4667_v14  ;;  %v3985_v55 = vpop.f32.mrb[144].mxu0  ;;  %v4371_v18 = vpop.f32.mrb[144].mxu1  ;;  %5826 = vmatpush1.bf16.msra.mxu0 %v8490_v47  ;;  %6212 = vmatpush1.bf16.msra.mxu1 %v8493_v51  ;;  %v8516_v22 = vld [vmem:[#allocation7 + $0x324] ss:$16 sps:$4 sm:$0xff]   ;;  %v8519_v23 = vld [vmem:[#allocation7 + $0x32c] ss:$16 sps:$4 sm:$0xff]  }
 0x410   :  { %v4544_v13 = vadd.f32 %v9788_v16, %v3985_v55  ;;  %v4546_v32 = vadd.f32 %v9791_v42, %v4371_v18  ;;  %v3987_v58 = vpop.f32.mrb[145].mxu0  ;;  %v4373_v56 = vpop.f32.mrb[145].mxu1  ;;  %5827 = vmatprep.subr.bf16.mxu0 %v8498_v48  ;;  %6213 = vmatprep.subr.bf16.mxu1 %v8501_v2 }
 0x411   :  { %v4545_v19 = vadd.f32 %v9794_v57, %v3987_v58  ;;  %v4547_v25 = vadd.f32 %v9797_v63, %v4373_v56  ;;  %v3989_v4 = vpop.f32.mrb[146].mxu0  ;;  %v4375_v0 = vpop.f32.mrb[146].mxu1  ;;  %5684 = vmatprep.mubr.bf16.mxu0 %v4781_v40  ;;  %6070 = vmatprep.mubr.bf16.mxu1 %v4781_v40 }
 0x412   :  { %v4548_v29 = vadd.f32 %v9788_v16, %v3989_v4  ;;  %v4550_v15 = vadd.f32 %v9791_v42, %v4375_v0  ;;  %v3991_v54 = vpop.f32.mrb[147].mxu0  ;;  %v4377_v9 = vpop.f32.mrb[147].mxu1  ;;  %5685 = vmatmul.mubr.bf16.gmra.mrb[204].mxu0 %v4780_v33  ;;  %6071 = vmatmul.mubr.bf16.gmra.mrb[204].mxu1 %v4780_v33  ;;  %v4672_v27 = vmax.f32 %v4544_v13, 0.0  ;;  %v4674_v36 = vmax.f32 %v4546_v32, 0.0 }
 0x413   :  { %v4549_v24 = vadd.f32 %v9794_v57, %v3991_v54  ;;  %v4551_v20 = vadd.f32 %v9797_v63, %v4377_v9  ;;  %5828 = vmatpush1.bf16.msra.mxu0 %v8496_v3  ;;  %6214 = vmatpush1.bf16.msra.mxu1 %v8499_v17  ;;  %v4673_v39 = vmax.f32 %v4545_v19, 0.0  ;;  %v4675_v45 = vmax.f32 %v4547_v25, 0.0  ;;  %v8522_v19 = vld [vmem:[#allocation7 + $0x344] ss:$16 sps:$4 sm:$0xff]  }
 0x414   :  { %v4676_v5 = vmax.f32 %v4548_v29, 0.0  ;;  %v4678_v10 = vmax.f32 %v4550_v15, 0.0  ;;  %5829 = vmatprep.subr.bf16.mxu0 %v8504_v52  ;;  %6215 = vmatprep.subr.bf16.mxu1 %v8507_v31  ;;  %v8514_v52 = vld [vmem:[#allocation7 + $0x320] ss:$16 sps:$4 sm:$0xff]   ;;  %v8517_v31 = vld [vmem:[#allocation7 + $0x328] ss:$16 sps:$4 sm:$0xff]  }
 0x415   :  { %v4677_v46 = vmax.f32 %v4549_v24, 0.0  ;;  %v4679_v50 = vmax.f32 %v4551_v20, 0.0  ;;  %v8525_v15 = vld [vmem:[#allocation7 + $0x34c] ss:$16 sps:$4 sm:$0xff]  }
 0x416   :  { %v4784_v62 = vpack.c.bf16 %v4676_v5, %v4672_v27  ;;  %v9855_v28 = vpack.c.bf16 %v4678_v10, %v4674_v36  ;;  %v8520_v10 = vld [vmem:[#allocation7 + $0x340] ss:$16 sps:$4 sm:$0xff]  }
 0x417   :  { %v4785_v47 = vpack.c.bf16 %v4677_v46, %v4673_v39  ;;  %v9857_v51 = vpack.c.bf16 %v4679_v50, %v4675_v45  ;;  %v3995_v48 = vpop.f32.mrb[148].mxu0  ;;  %v4381_v7 = vpop.f32.mrb[148].mxu1  ;;  %5830 = vmatpush1.bf16.msra.mxu0 %v8502_v60  ;;  %6216 = vmatpush1.bf16.msra.mxu1 %v8505_v35 }
 0x418   :  { %v4552_v43 = vadd.f32 %v9788_v16, %v3995_v48  ;;  %v4554_v2 = vadd.f32 %v9791_v42, %v4381_v7  ;;  %v3997_v44 = vpop.f32.mrb[149].mxu0  ;;  %v4383_v14 = vpop.f32.mrb[149].mxu1  ;;  %5831 = vmatprep.subr.bf16.mxu0 %v8510_v53  ;;  %6217 = vmatprep.subr.bf16.mxu1 %v8513_v12  ;;  %v8523_v12 = vld [vmem:[#allocation7 + $0x348] ss:$16 sps:$4 sm:$0xff]  }
 0x419   :  { %v4553_v33 = vadd.f32 %v9794_v57, %v3997_v44  ;;  %v4555_v40 = vadd.f32 %v9797_v63, %v4383_v14  ;;  %v3999_v55 = vpop.f32.mrb[150].mxu0  ;;  %v4385_v18 = vpop.f32.mrb[150].mxu1  ;;  %5694 = vmatprep.mubr.bf16.mxu0 %v4785_v47  ;;  %6080 = vmatprep.mubr.bf16.mxu1 %v4785_v47  ;;  %v8531_v47 = vld [vmem:[#allocation7 + $0x36c] ss:$16 sps:$4 sm:$0xff]  }
 0x41a   :  { %v4556_v3 = vadd.f32 %v9788_v16, %v3999_v55  ;;  %v4558_v17 = vadd.f32 %v9791_v42, %v4385_v18  ;;  %v4001_v13 = vpop.f32.mrb[151].mxu0  ;;  %v4387_v32 = vpop.f32.mrb[151].mxu1  ;;  %5695 = vmatmul.mubr.bf16.gmra.mrb[208].mxu0 %v4784_v62  ;;  %6081 = vmatmul.mubr.bf16.gmra.mrb[208].mxu1 %v4784_v62  ;;  %v4680_v25 = vmax.f32 %v4552_v43, 0.0  ;;  %v4682_v4 = vmax.f32 %v4554_v2, 0.0  ;;  %v8528_v62 = vld [vmem:[#allocation7 + $0x364] ss:$16 sps:$4 sm:$0xff]  }
 0x41b   :  { %v4557_v58 = vadd.f32 %v9794_v57, %v4001_v13  ;;  %v4559_v56 = vadd.f32 %v9797_v63, %v4387_v32  ;;  %5832 = vmatpush1.bf16.msra.mxu0 %v8508_v21  ;;  %6218 = vmatpush1.bf16.msra.mxu1 %v8511_v6  ;;  %v4681_v54 = vmax.f32 %v4553_v33, 0.0  ;;  %v4683_v9 = vmax.f32 %v4555_v40, 0.0  ;;  %v8526_v33 = vld [vmem:[#allocation7 + $0x360] ss:$16 sps:$4 sm:$0xff]   ;;  %v8529_v40 = vld [vmem:[#allocation7 + $0x368] ss:$16 sps:$4 sm:$0xff]  }
 0x41c   :  { %v4684_v0 = vmax.f32 %v4556_v3, 0.0  ;;  %v4686_v29 = vmax.f32 %v4558_v17, 0.0  ;;  %5833 = vmatprep.subr.bf16.mxu0 %v8516_v22  ;;  %6219 = vmatprep.subr.bf16.mxu1 %v8519_v23  ;;  %v8534_v55 = vld [vmem:[#allocation7 + $0x384] ss:$16 sps:$4 sm:$0xff]   ;;  %v8537_v32 = vld [vmem:[#allocation7 + $0x38c] ss:$16 sps:$4 sm:$0xff]  }
 0x41d   :  { %v4685_v24 = vmax.f32 %v4557_v58, 0.0  ;;  %v4687_v20 = vmax.f32 %v4559_v56, 0.0 }
 0x41e   :  { %v4788_v60 = vpack.c.bf16 %v4684_v0, %v4680_v25  ;;  %v9867_v35 = vpack.c.bf16 %v4686_v29, %v4682_v4 }
 0x41f   :  { %v4789_v53 = vpack.c.bf16 %v4685_v24, %v4681_v54  ;;  %v9869_v27 = vpack.c.bf16 %v4687_v20, %v4683_v9  ;;  %v4005_v36 = vpop.f32.mrb[152].mxu0  ;;  %v4391_v5 = vpop.f32.mrb[152].mxu1  ;;  %5834 = vmatpush1.bf16.msra.mxu0 %v8514_v52  ;;  %6220 = vmatpush1.bf16.msra.mxu1 %v8517_v31  ;;  %v8532_v54 = vld [vmem:[#allocation7 + $0x380] ss:$16 sps:$4 sm:$0xff]   ;;  %v8535_v9 = vld [vmem:[#allocation7 + $0x388] ss:$16 sps:$4 sm:$0xff]  }
 0x420   :  { %v4560_v39 = vadd.f32 %v9788_v16, %v4005_v36  ;;  %v4562_v45 = vadd.f32 %v9791_v42, %v4391_v5  ;;  %v4007_v46 = vpop.f32.mrb[153].mxu0  ;;  %v4393_v50 = vpop.f32.mrb[153].mxu1  ;;  %5835 = vmatprep.subr.bf16.mxu0 %v8522_v19  ;;  %6221 = vmatprep.subr.bf16.mxu1 %v8525_v15  ;;  %v8540_v36 = vld [vmem:[#allocation7 + $0x3a4] ss:$16 sps:$4 sm:$0xff]   ;;  %v8543_v5 = vld [vmem:[#allocation7 + $0x3ac] ss:$16 sps:$4 sm:$0xff]  }
 0x421   :  { %v4561_v48 = vadd.f32 %v9794_v57, %v4007_v46  ;;  %v4563_v7 = vadd.f32 %v9797_v63, %v4393_v50  ;;  %v4009_v21 = vpop.f32.mrb[154].mxu0  ;;  %v4395_v6 = vpop.f32.mrb[154].mxu1  ;;  %5704 = vmatprep.mubr.bf16.mxu0 %v4789_v53  ;;  %6090 = vmatprep.mubr.bf16.mxu1 %v4789_v53 }
 0x422   :  { %v4564_v43 = vadd.f32 %v9788_v16, %v4009_v21  ;;  %v4566_v2 = vadd.f32 %v9791_v42, %v4395_v6  ;;  %v4011_v44 = vpop.f32.mrb[155].mxu0  ;;  %v4397_v14 = vpop.f32.mrb[155].mxu1  ;;  %5705 = vmatmul.mubr.bf16.gmra.mrb[212].mxu0 %v4788_v60  ;;  %6091 = vmatmul.mubr.bf16.gmra.mrb[212].mxu1 %v4788_v60  ;;  %v4688_v18 = vmax.f32 %v4560_v39, 0.0  ;;  %v4690_v3 = vmax.f32 %v4562_v45, 0.0  ;;  %v8538_v21 = vld [vmem:[#allocation7 + $0x3a0] ss:$16 sps:$4 sm:$0xff]  }
 0x423   :  { %v4565_v22 = vadd.f32 %v9794_v57, %v4011_v44  ;;  %v4567_v23 = vadd.f32 %v9797_v63, %v4397_v14  ;;  %5836 = vmatpush1.bf16.msra.mxu0 %v8520_v10  ;;  %6222 = vmatpush1.bf16.msra.mxu1 %v8523_v12  ;;  %v4689_v58 = vmax.f32 %v4561_v48, 0.0  ;;  %v4691_v56 = vmax.f32 %v4563_v7, 0.0  ;;  %v8541_v6 = vld [vmem:[#allocation7 + $0x3a8] ss:$16 sps:$4 sm:$0xff]  }
 0x424   :  { %v4692_v17 = vmax.f32 %v4564_v43, 0.0  ;;  %v4694_v13 = vmax.f32 %v4566_v2, 0.0  ;;  %5837 = vmatprep.subr.bf16.mxu0 %v8528_v62  ;;  %6223 = vmatprep.subr.bf16.mxu1 %v8531_v47  ;;  %v8546_v43 = vld [vmem:[#allocation7 + $0x3c4] ss:$16 sps:$4 sm:$0xff]  }
 0x425   :  { %v4693_v52 = vmax.f32 %v4565_v22, 0.0  ;;  %v4695_v31 = vmax.f32 %v4567_v23, 0.0  ;;  %v8549_v23 = vld [vmem:[#allocation7 + $0x3cc] ss:$16 sps:$4 sm:$0xff]  }
 0x426   :  { %v4792_v19 = vpack.c.bf16 %v4692_v17, %v4688_v18  ;;  %v9879_v25 = vpack.c.bf16 %v4694_v13, %v4690_v3 }
 0x427   :  { %v4793_v4 = vpack.c.bf16 %v4693_v52, %v4689_v58  ;;  %v9881_v0 = vpack.c.bf16 %v4695_v31, %v4691_v56  ;;  %v4015_v29 = vpop.f32.mrb[156].mxu0  ;;  %v4401_v15 = vpop.f32.mrb[156].mxu1  ;;  %5838 = vmatpush1.bf16.msra.mxu0 %v8526_v33  ;;  %6224 = vmatpush1.bf16.msra.mxu1 %v8529_v40  ;;  %v8544_v52 = vld [vmem:[#allocation7 + $0x3c0] ss:$16 sps:$4 sm:$0xff]   ;;  %v8547_v31 = vld [vmem:[#allocation7 + $0x3c8] ss:$16 sps:$4 sm:$0xff]  }
 0x428   :  { %v4568_v24 = vadd.f32 %v9788_v16, %v4015_v29  ;;  %v4570_v20 = vadd.f32 %v9791_v42, %v4401_v15  ;;  %v4017_v60 = vpop.f32.mrb[157].mxu0  ;;  %v4403_v53 = vpop.f32.mrb[157].mxu1  ;;  %5839 = vmatprep.subr.bf16.mxu0 %v8534_v55  ;;  %6225 = vmatprep.subr.bf16.mxu1 %v8537_v32 }
 0x429   :  { %v4569_v10 = vadd.f32 %v9794_v57, %v4017_v60  ;;  %v4571_v12 = vadd.f32 %v9797_v63, %v4403_v53  ;;  %v4019_v39 = vpop.f32.mrb[158].mxu0  ;;  %v4405_v45 = vpop.f32.mrb[158].mxu1  ;;  %5714 = vmatprep.mubr.bf16.mxu0 %v4793_v4  ;;  %6100 = vmatprep.mubr.bf16.mxu1 %v4793_v4 }
 0x42a   :  { %v4572_v46 = vadd.f32 %v9788_v16, %v4019_v39  ;;  %v4574_v50 = vadd.f32 %v9791_v42, %v4405_v45  ;;  %v4021_v62 = vpop.f32.mrb[159].mxu0  ;;  %v4407_v47 = vpop.f32.mrb[159].mxu1  ;;  %5715 = vmatmul.mubr.bf16.gmra.mrb[216].mxu0 %v4792_v19  ;;  %6101 = vmatmul.mubr.bf16.gmra.mrb[216].mxu1 %v4792_v19  ;;  %v4696_v2 = vmax.f32 %v4568_v24, 0.0  ;;  %v4698_v44 = vmax.f32 %v4570_v20, 0.0 }
 0x42b   :  { %v4573_v48 = vadd.f32 %v9794_v57, %v4021_v62  ;;  %v4575_v7 = vadd.f32 %v9797_v63, %v4407_v47  ;;  %5840 = vmatpush1.bf16.msra.mxu0 %v8532_v54  ;;  %6226 = vmatpush1.bf16.msra.mxu1 %v8535_v9  ;;  %v4697_v33 = vmax.f32 %v4569_v10, 0.0  ;;  %v4699_v40 = vmax.f32 %v4571_v12, 0.0  ;;  %v8552_v54 = vld [vmem:[#allocation7 + $0x3e4] ss:$16 sps:$4 sm:$0xff]   ;;  %v8555_v9 = vld [vmem:[#allocation7 + $0x3ec] ss:$16 sps:$4 sm:$0xff]  }
 0x42c   :  { %v4700_v14 = vmax.f32 %v4572_v46, 0.0  ;;  %v4702_v22 = vmax.f32 %v4574_v50, 0.0  ;;  %5841 = vmatprep.subr.bf16.mxu0 %v8540_v36  ;;  %6227 = vmatprep.subr.bf16.mxu1 %v8543_v5  ;;  %v8550_v46 = vld [vmem:[#allocation7 + $0x3e0] ss:$16 sps:$4 sm:$0xff]   ;;  %v8553_v50 = vld [vmem:[#allocation7 + $0x3e8] ss:$16 sps:$4 sm:$0xff]  }
 0x42d   :  { %v4701_v55 = vmax.f32 %v4573_v48, 0.0  ;;  %v4703_v18 = vmax.f32 %v4575_v7, 0.0 }
 0x42e   :  { %v4796_v3 = vpack.c.bf16 %v4700_v14, %v4696_v2  ;;  %v9891_v17 = vpack.c.bf16 %v4702_v22, %v4698_v44 }
 0x42f   :  { %v4797_v13 = vpack.c.bf16 %v4701_v55, %v4697_v33  ;;  %v9893_v32 = vpack.c.bf16 %v4703_v18, %v4699_v40  ;;  %v4025_v58 = vpop.f32.mrb[160].mxu0  ;;  %v4411_v56 = vpop.f32.mrb[160].mxu1  ;;  %5842 = vmatpush1.bf16.msra.mxu0 %v8538_v21  ;;  %6228 = vmatpush1.bf16.msra.mxu1 %v8541_v6 }
 0x430   :  { %v4576_v19 = vadd.f32 %v9788_v16, %v4025_v58  ;;  %v4578_v4 = vadd.f32 %v9791_v42, %v4411_v56  ;;  %v4027_v29 = vpop.f32.mrb[161].mxu0  ;;  %v4413_v15 = vpop.f32.mrb[161].mxu1  ;;  %5843 = vmatprep.subr.bf16.mxu0 %v8546_v43  ;;  %6229 = vmatprep.subr.bf16.mxu1 %v8549_v23 }
 0x431   :  { %v4577_v24 = vadd.f32 %v9794_v57, %v4027_v29  ;;  %v4579_v20 = vadd.f32 %v9797_v63, %v4413_v15  ;;  %v4029_v60 = vpop.f32.mrb[162].mxu0  ;;  %v4415_v53 = vpop.f32.mrb[162].mxu1  ;;  %5724 = vmatprep.mubr.bf16.mxu0 %v4797_v13  ;;  %6110 = vmatprep.mubr.bf16.mxu1 %v4797_v13 }
 0x432   :  { %v4580_v36 = vadd.f32 %v9788_v16, %v4029_v60  ;;  %v4582_v5 = vadd.f32 %v9791_v42, %v4415_v53  ;;  %v4031_v10 = vpop.f32.mrb[163].mxu0  ;;  %v4417_v12 = vpop.f32.mrb[163].mxu1  ;;  %5725 = vmatmul.mubr.bf16.gmra.mrb[220].mxu0 %v4796_v3  ;;  %6111 = vmatmul.mubr.bf16.gmra.mrb[220].mxu1 %v4796_v3  ;;  %v4704_v62 = vmax.f32 %v4576_v19, 0.0  ;;  %v4706_v47 = vmax.f32 %v4578_v4, 0.0 }
 0x433   :  { %v4581_v39 = vadd.f32 %v9794_v57, %v4031_v10  ;;  %v4583_v45 = vadd.f32 %v9797_v63, %v4417_v12  ;;  %5844 = vmatpush1.bf16.msra.mxu0 %v8544_v52  ;;  %6230 = vmatpush1.bf16.msra.mxu1 %v8547_v31  ;;  %v4705_v21 = vmax.f32 %v4577_v24, 0.0  ;;  %v4707_v6 = vmax.f32 %v4579_v20, 0.0 }
 0x434   :  { %v4708_v48 = vmax.f32 %v4580_v36, 0.0  ;;  %v4710_v7 = vmax.f32 %v4582_v5, 0.0  ;;  %5845 = vmatprep.subr.bf16.mxu0 %v8552_v54  ;;  %6231 = vmatprep.subr.bf16.mxu1 %v8555_v9 }
 0x435   :  { %v4709_v43 = vmax.f32 %v4581_v39, 0.0  ;;  %v4711_v2 = vmax.f32 %v4583_v45, 0.0 }
 0x436   :  { %v4800_v44 = vpack.c.bf16 %v4708_v48, %v4704_v62  ;;  %v9903_v14 = vpack.c.bf16 %v4710_v7, %v4706_v47 }
 0x437   :  { %v4801_v22 = vpack.c.bf16 %v4709_v43, %v4705_v21  ;;  %v9905_v23 = vpack.c.bf16 %v4711_v2, %v4707_v6  ;;  %v4035_v33 = vpop.f32.mrb[164].mxu0  ;;  %v4421_v40 = vpop.f32.mrb[164].mxu1  ;;  %5846 = vmatpush1.bf16.msra.mxu0 %v8550_v46  ;;  %6232 = vmatpush1.bf16.msra.mxu1 %v8553_v50 }
 0x438   :  { %v4584_v55 = vadd.f32 %v9788_v16, %v4035_v33  ;;  %v4586_v18 = vadd.f32 %v9791_v42, %v4421_v40  ;;  %v4037_v3 = vpop.f32.mrb[165].mxu0  ;;  %v4423_v13 = vpop.f32.mrb[165].mxu1 }
 0x439   :  { %v4585_v58 = vadd.f32 %v9794_v57, %v4037_v3  ;;  %v4587_v56 = vadd.f32 %v9797_v63, %v4423_v13  ;;  %v4039_v52 = vpop.f32.mrb[166].mxu0  ;;  %v4425_v31 = vpop.f32.mrb[166].mxu1  ;;  %5734 = vmatprep.mubr.bf16.mxu0 %v4801_v22  ;;  %6120 = vmatprep.mubr.bf16.mxu1 %v4801_v22 }
 0x43a   :  { %v4588_v19 = vadd.f32 %v9788_v16, %v4039_v52  ;;  %v4590_v4 = vadd.f32 %v9791_v42, %v4425_v31  ;;  %v4041_v29 = vpop.f32.mrb[167].mxu0  ;;  %v4427_v15 = vpop.f32.mrb[167].mxu1  ;;  %5735 = vmatmul.mubr.bf16.gmra.mrb[224].mxu0 %v4800_v44  ;;  %6121 = vmatmul.mubr.bf16.gmra.mrb[224].mxu1 %v4800_v44  ;;  %v4712_v24 = vmax.f32 %v4584_v55, 0.0  ;;  %v4714_v20 = vmax.f32 %v4586_v18, 0.0 }
 0x43b   :  { %v4589_v54 = vadd.f32 %v9794_v57, %v4041_v29  ;;  %v4591_v9 = vadd.f32 %v9797_v63, %v4427_v15  ;;  %v4713_v36 = vmax.f32 %v4585_v58, 0.0  ;;  %v4715_v5 = vmax.f32 %v4587_v56, 0.0 }
 0x43c   :  { %v4716_v60 = vmax.f32 %v4588_v19, 0.0  ;;  %v4718_v53 = vmax.f32 %v4590_v4, 0.0 }
 0x43d   :  { %v4717_v10 = vmax.f32 %v4589_v54, 0.0  ;;  %v4719_v12 = vmax.f32 %v4591_v9, 0.0 }
 0x43e   :  { %v4804_v39 = vpack.c.bf16 %v4716_v60, %v4712_v24  ;;  %v9915_v45 = vpack.c.bf16 %v4718_v53, %v4714_v20 }
 0x43f   :  { %v4805_v46 = vpack.c.bf16 %v4717_v10, %v4713_v36  ;;  %v9917_v50 = vpack.c.bf16 %v4719_v12, %v4715_v5  ;;  %v4045_v62 = vpop.f32.mrb[168].mxu0  ;;  %v4431_v47 = vpop.f32.mrb[168].mxu1 }
 0x440   :  { %v4592_v48 = vadd.f32 %v9788_v16, %v4045_v62  ;;  %v4594_v7 = vadd.f32 %v9791_v42, %v4431_v47  ;;  %v4047_v21 = vpop.f32.mrb[169].mxu0  ;;  %v4433_v6 = vpop.f32.mrb[169].mxu1 }
 0x441   :  { %v4593_v43 = vadd.f32 %v9794_v57, %v4047_v21  ;;  %v4595_v2 = vadd.f32 %v9797_v63, %v4433_v6  ;;  %v4049_v44 = vpop.f32.mrb[170].mxu0  ;;  %v4435_v22 = vpop.f32.mrb[170].mxu1  ;;  %5744 = vmatprep.mubr.bf16.mxu0 %v4805_v46  ;;  %6130 = vmatprep.mubr.bf16.mxu1 %v4805_v46 }
 0x442   :  { %v4596_v33 = vadd.f32 %v9788_v16, %v4049_v44  ;;  %v4598_v40 = vadd.f32 %v9791_v42, %v4435_v22  ;;  %v4051_v55 = vpop.f32.mrb[171].mxu0  ;;  %v4437_v18 = vpop.f32.mrb[171].mxu1  ;;  %5745 = vmatmul.mubr.bf16.gmra.mrb[228].mxu0 %v4804_v39  ;;  %6131 = vmatmul.mubr.bf16.gmra.mrb[228].mxu1 %v4804_v39  ;;  %v4720_v58 = vmax.f32 %v4592_v48, 0.0  ;;  %v4722_v56 = vmax.f32 %v4594_v7, 0.0 }
 0x443   :  { %v4597_v3 = vadd.f32 %v9794_v57, %v4051_v55  ;;  %v4599_v13 = vadd.f32 %v9797_v63, %v4437_v18  ;;  %v4721_v19 = vmax.f32 %v4593_v43, 0.0  ;;  %v4723_v4 = vmax.f32 %v4595_v2, 0.0 }
 0x444   :  { %v4724_v52 = vmax.f32 %v4596_v33, 0.0  ;;  %v4726_v31 = vmax.f32 %v4598_v40, 0.0 }
 0x445   :  { %v4725_v29 = vmax.f32 %v4597_v3, 0.0  ;;  %v4727_v15 = vmax.f32 %v4599_v13, 0.0 }
 0x446   :  { %v4808_v54 = vpack.c.bf16 %v4724_v52, %v4720_v58  ;;  %v9927_v9 = vpack.c.bf16 %v4726_v31, %v4722_v56 }
 0x447   :  { %v4809_v24 = vpack.c.bf16 %v4725_v29, %v4721_v19  ;;  %v9929_v20 = vpack.c.bf16 %v4727_v15, %v4723_v4  ;;  %v4055_v60 = vpop.f32.mrb[172].mxu0  ;;  %v4441_v53 = vpop.f32.mrb[172].mxu1 }
 0x448   :  { %v4600_v36 = vadd.f32 %v9788_v16, %v4055_v60  ;;  %v4602_v5 = vadd.f32 %v9791_v42, %v4441_v53  ;;  %v4057_v10 = vpop.f32.mrb[173].mxu0  ;;  %v4443_v12 = vpop.f32.mrb[173].mxu1 }
 0x449   :  { %v4601_v39 = vadd.f32 %v9794_v57, %v4057_v10  ;;  %v4603_v46 = vadd.f32 %v9797_v63, %v4443_v12  ;;  %v4059_v62 = vpop.f32.mrb[174].mxu0  ;;  %v4445_v47 = vpop.f32.mrb[174].mxu1  ;;  %5754 = vmatprep.mubr.bf16.mxu0 %v4809_v24  ;;  %6140 = vmatprep.mubr.bf16.mxu1 %v4809_v24 }
 0x44a   :  { %v4604_v48 = vadd.f32 %v9788_v16, %v4059_v62  ;;  %v4606_v7 = vadd.f32 %v9791_v42, %v4445_v47  ;;  %v4061_v21 = vpop.f32.mrb[175].mxu0  ;;  %v4447_v6 = vpop.f32.mrb[175].mxu1  ;;  %5755 = vmatmul.mubr.bf16.gmra.mrb[232].mxu0 %v4808_v54  ;;  %6141 = vmatmul.mubr.bf16.gmra.mrb[232].mxu1 %v4808_v54  ;;  %v4728_v44 = vmax.f32 %v4600_v36, 0.0  ;;  %v4730_v22 = vmax.f32 %v4602_v5, 0.0 }
 0x44b   :  { %v4605_v43 = vadd.f32 %v9794_v57, %v4061_v21  ;;  %v4607_v2 = vadd.f32 %v9797_v63, %v4447_v6  ;;  %v4729_v55 = vmax.f32 %v4601_v39, 0.0  ;;  %v4731_v18 = vmax.f32 %v4603_v46, 0.0 }
 0x44c   :  { %v4732_v33 = vmax.f32 %v4604_v48, 0.0  ;;  %v4734_v40 = vmax.f32 %v4606_v7, 0.0 }
 0x44d   :  { %v4733_v3 = vmax.f32 %v4605_v43, 0.0  ;;  %v4735_v13 = vmax.f32 %v4607_v2, 0.0 }
 0x44e   :  { %v4812_v58 = vpack.c.bf16 %v4732_v33, %v4728_v44  ;;  %v9939_v56 = vpack.c.bf16 %v4734_v40, %v4730_v22 }
 0x44f   :  { %v4813_v52 = vpack.c.bf16 %v4733_v3, %v4729_v55  ;;  %v9941_v31 = vpack.c.bf16 %v4735_v13, %v4731_v18  ;;  %v4065_v19 = vpop.f32.mrb[176].mxu0  ;;  %v4451_v4 = vpop.f32.mrb[176].mxu1 }
 0x450   :  { %v4608_v29 = vadd.f32 %v9788_v16, %v4065_v19  ;;  %v4610_v15 = vadd.f32 %v9791_v42, %v4451_v4  ;;  %v4067_v54 = vpop.f32.mrb[177].mxu0  ;;  %v4453_v24 = vpop.f32.mrb[177].mxu1 }
 0x451   :  { %v4609_v60 = vadd.f32 %v9794_v57, %v4067_v54  ;;  %v4611_v53 = vadd.f32 %v9797_v63, %v4453_v24  ;;  %v4069_v36 = vpop.f32.mrb[178].mxu0  ;;  %v4455_v5 = vpop.f32.mrb[178].mxu1  ;;  %5764 = vmatprep.mubr.bf16.mxu0 %v4813_v52  ;;  %6150 = vmatprep.mubr.bf16.mxu1 %v4813_v52 }
 0x452   :  { %v4612_v10 = vadd.f32 %v9788_v16, %v4069_v36  ;;  %v4614_v12 = vadd.f32 %v9791_v42, %v4455_v5  ;;  %v4071_v39 = vpop.f32.mrb[179].mxu0  ;;  %v4457_v46 = vpop.f32.mrb[179].mxu1  ;;  %5765 = vmatmul.mubr.bf16.gmra.mrb[236].mxu0 %v4812_v58  ;;  %6151 = vmatmul.mubr.bf16.gmra.mrb[236].mxu1 %v4812_v58  ;;  %v4736_v48 = vmax.f32 %v4608_v29, 0.0  ;;  %v4738_v7 = vmax.f32 %v4610_v15, 0.0 }
 0x453   :  { %v4613_v62 = vadd.f32 %v9794_v57, %v4071_v39  ;;  %v4615_v47 = vadd.f32 %v9797_v63, %v4457_v46  ;;  %v4737_v43 = vmax.f32 %v4609_v60, 0.0  ;;  %v4739_v2 = vmax.f32 %v4611_v53, 0.0 }
 0x454   :  { %v4740_v21 = vmax.f32 %v4612_v10, 0.0  ;;  %v4742_v6 = vmax.f32 %v4614_v12, 0.0 }
 0x455   :  { %v4741_v44 = vmax.f32 %v4613_v62, 0.0  ;;  %v4743_v22 = vmax.f32 %v4615_v47, 0.0 }
 0x456   :  { %v4816_v33 = vpack.c.bf16 %v4740_v21, %v4736_v48  ;;  %v9951_v40 = vpack.c.bf16 %v4742_v6, %v4738_v7 }
 0x457   :  { %v4817_v55 = vpack.c.bf16 %v4741_v44, %v4737_v43  ;;  %v9953_v18 = vpack.c.bf16 %v4743_v22, %v4739_v2  ;;  %v4075_v3 = vpop.f32.mrb[180].mxu0  ;;  %v4461_v13 = vpop.f32.mrb[180].mxu1 }
 0x458   :  { %v4616_v58 = vadd.f32 %v9788_v16, %v4075_v3  ;;  %v4618_v52 = vadd.f32 %v9791_v42, %v4461_v13  ;;  %v4077_v19 = vpop.f32.mrb[181].mxu0  ;;  %v4463_v4 = vpop.f32.mrb[181].mxu1 }
 0x459   :  { %v4617_v29 = vadd.f32 %v9794_v57, %v4077_v19  ;;  %v4619_v15 = vadd.f32 %v9797_v63, %v4463_v4  ;;  %v4079_v54 = vpop.f32.mrb[182].mxu0  ;;  %v4465_v24 = vpop.f32.mrb[182].mxu1  ;;  %5774 = vmatprep.mubr.bf16.mxu0 %v4817_v55  ;;  %6160 = vmatprep.mubr.bf16.mxu1 %v4817_v55 }
 0x45a   :  { %v4620_v60 = vadd.f32 %v9788_v16, %v4079_v54  ;;  %v4622_v53 = vadd.f32 %v9791_v42, %v4465_v24  ;;  %v4081_v36 = vpop.f32.mrb[183].mxu0  ;;  %v4467_v5 = vpop.f32.mrb[183].mxu1  ;;  %5775 = vmatmul.mubr.bf16.gmra.mrb[240].mxu0 %v4816_v33  ;;  %6161 = vmatmul.mubr.bf16.gmra.mrb[240].mxu1 %v4816_v33  ;;  %v4744_v39 = vmax.f32 %v4616_v58, 0.0  ;;  %v4746_v46 = vmax.f32 %v4618_v52, 0.0 }
 0x45b   :  { %v4621_v10 = vadd.f32 %v9794_v57, %v4081_v36  ;;  %v4623_v12 = vadd.f32 %v9797_v63, %v4467_v5  ;;  %v4745_v48 = vmax.f32 %v4617_v29, 0.0  ;;  %v4747_v7 = vmax.f32 %v4619_v15, 0.0 }
 0x45c   :  { %v4748_v62 = vmax.f32 %v4620_v60, 0.0  ;;  %v4750_v47 = vmax.f32 %v4622_v53, 0.0 }
 0x45d   :  { %v4749_v21 = vmax.f32 %v4621_v10, 0.0  ;;  %v4751_v6 = vmax.f32 %v4623_v12, 0.0 }
 0x45e   :  { %v4820_v43 = vpack.c.bf16 %v4748_v62, %v4744_v39  ;;  %v9963_v2 = vpack.c.bf16 %v4750_v47, %v4746_v46 }
 0x45f   :  { %v4821_v44 = vpack.c.bf16 %v4749_v21, %v4745_v48  ;;  %v9965_v22 = vpack.c.bf16 %v4751_v6, %v4747_v7  ;;  %v4085_v55 = vpop.f32.mrb[184].mxu0  ;;  %v4471_v33 = vpop.f32.mrb[184].mxu1 }
 0x460   :  { %v4624_v3 = vadd.f32 %v9788_v16, %v4085_v55  ;;  %v4626_v13 = vadd.f32 %v9791_v42, %v4471_v33  ;;  %v4087_v58 = vpop.f32.mrb[185].mxu0  ;;  %v4473_v52 = vpop.f32.mrb[185].mxu1 }
 0x461   :  { %v4625_v19 = vadd.f32 %v9794_v57, %v4087_v58  ;;  %v4627_v4 = vadd.f32 %v9797_v63, %v4473_v52  ;;  %v4089_v29 = vpop.f32.mrb[186].mxu0  ;;  %v4475_v15 = vpop.f32.mrb[186].mxu1  ;;  %5784 = vmatprep.mubr.bf16.mxu0 %v4821_v44  ;;  %6170 = vmatprep.mubr.bf16.mxu1 %v4821_v44 }
 0x462   :  { %v4628_v54 = vadd.f32 %v9788_v16, %v4089_v29  ;;  %v4630_v24 = vadd.f32 %v9791_v42, %v4475_v15  ;;  %v4091_v60 = vpop.f32.mrb[187].mxu0  ;;  %v4477_v53 = vpop.f32.mrb[187].mxu1  ;;  %5785 = vmatmul.mubr.bf16.gmra.mrb[244].mxu0 %v4820_v43  ;;  %6171 = vmatmul.mubr.bf16.gmra.mrb[244].mxu1 %v4820_v43  ;;  %v4752_v10 = vmax.f32 %v4624_v3, 0.0  ;;  %v4754_v12 = vmax.f32 %v4626_v13, 0.0 }
 0x463   :  { %v4629_v36 = vadd.f32 %v9794_v57, %v4091_v60  ;;  %v4631_v5 = vadd.f32 %v9797_v63, %v4477_v53  ;;  %v4753_v62 = vmax.f32 %v4625_v19, 0.0  ;;  %v4755_v47 = vmax.f32 %v4627_v4, 0.0 }
 0x464   :  { %v4756_v39 = vmax.f32 %v4628_v54, 0.0  ;;  %v4758_v46 = vmax.f32 %v4630_v24, 0.0 }
 0x465   :  { %v4757_v48 = vmax.f32 %v4629_v36, 0.0  ;;  %v4759_v7 = vmax.f32 %v4631_v5, 0.0 }
 0x466   :  { %v4824_v21 = vpack.c.bf16 %v4756_v39, %v4752_v10  ;;  %v9975_v6 = vpack.c.bf16 %v4758_v46, %v4754_v12 }
 0x467   :  { %v4825_v44 = vpack.c.bf16 %v4757_v48, %v4753_v62  ;;  %v9977_v55 = vpack.c.bf16 %v4759_v7, %v4755_v47  ;;  %v4095_v33 = vpop.f32.mrb[188].mxu0  ;;  %v4481_v43 = vpop.f32.mrb[188].mxu1 }
 0x468   :  { %v4632_v58 = vadd.f32 %v9788_v16, %v4095_v33  ;;  %v4634_v52 = vadd.f32 %v9791_v42, %v4481_v43  ;;  %v4097_v3 = vpop.f32.mrb[189].mxu0  ;;  %v4483_v13 = vpop.f32.mrb[189].mxu1 }
 0x469   :  { %v4633_v29 = vadd.f32 %v9794_v57, %v4097_v3  ;;  %v4635_v19 = vadd.f32 %v9797_v63, %v4483_v13  ;;  %v4099_v4 = vpop.f32.mrb[190].mxu0  ;;  %v4485_v15 = vpop.f32.mrb[190].mxu1  ;;  %5794 = vmatprep.mubr.bf16.mxu0 %v4825_v44  ;;  %6180 = vmatprep.mubr.bf16.mxu1 %v4825_v44 }
 0x46a   :  { %v4636_v54 = vadd.f32 %v9788_v16, %v4099_v4  ;;  %v4638_v24 = vadd.f32 %v9791_v42, %v4485_v15  ;;  %v4101_v60 = vpop.f32.mrb[191].mxu0  ;;  %v4487_v53 = vpop.f32.mrb[191].mxu1  ;;  %5795 = vmatmul.mubr.bf16.gmra.mrb[248].mxu0 %v4824_v21  ;;  %6181 = vmatmul.mubr.bf16.gmra.mrb[248].mxu1 %v4824_v21  ;;  %v4760_v10 = vmax.f32 %v4632_v58, 0.0  ;;  %v4762_v12 = vmax.f32 %v4634_v52, 0.0 }
 0x46b   :  { %v4637_v36 = vadd.f32 %v9794_v57, %v4101_v60  ;;  %v4639_v5 = vadd.f32 %v9797_v63, %v4487_v53  ;;  %v4761_v62 = vmax.f32 %v4633_v29, 0.0  ;;  %v4763_v47 = vmax.f32 %v4635_v19, 0.0  ;;  %v4960_v57 = vld [vmem:[%s10228_s10] sm:$0xf] }
 0x46c   :  { %v4764_v39 = vmax.f32 %v4636_v54, 0.0  ;;  %v4766_v46 = vmax.f32 %v4638_v24, 0.0  ;;  %v10059_v63 = vrot.slane %v4960_v57, %v8936_v59 }
 0x46d   :  { %v4765_v48 = vmax.f32 %v4637_v36, 0.0  ;;  %v4767_v7 = vmax.f32 %v4639_v5, 0.0 }
 0x46e   :  { %v4828_v44 = vpack.c.bf16 %v4764_v39, %v4760_v10  ;;  %v9987_v16 = vpack.c.bf16 %v4766_v46, %v4762_v12  ;;  %v6587_v12 = vld [vmem:[#allocation2] sm:$0x1] }
 0x46f   :  { %v4829_v42 = vpack.c.bf16 %v4765_v48, %v4761_v62  ;;  %v9989_v33 = vpack.c.bf16 %v4767_v7, %v4763_v47  ;;  %6590 = vperm.xlu0 %7972, %v6587_v12  }
 0x471   :  { %5804 = vmatprep.mubr.bf16.mxu0 %v4829_v42  ;;  %6190 = vmatprep.mubr.bf16.mxu1 %v4829_v42 }
 0x472   :  { %5805 = vmatmul.mubr.bf16.gmra.mrb[252].mxu0 %v4828_v44  ;;  %6191 = vmatmul.mubr.bf16.gmra.mrb[252].mxu1 %v4828_v44 }
 0x473   :  { %5847 = vmatprep.mubr.bf16.mxu0 %v9809_v37  ;;  %6233 = vmatprep.mubr.bf16.mxu1 %v9809_v37  ;;  %v10065_v37 = vrot.slane %v4960_v57, %v8942_v61 }
 0x47a   :  { %5848 = vmatmul.mubr.bf16.vlgmr.msra.gmra.mrb[192].mxu0 %v9807_v34  ;;  %6234 = vmatmul.mubr.bf16.vlgmr.msra.gmra.mrb[192].mxu1 %v9807_v34  ;;  %v10062_v34 = vrot.slane %v4960_v57, %v8954_v8 }
 0x47b   :  { %5857 = vmatprep.mubr.bf16.mxu0 %v9821_v1  ;;  %6243 = vmatprep.mubr.bf16.mxu1 %v9821_v1 }
 0x482   :  { %5858 = vmatmul.mubr.bf16.gmra.mrb[196].mxu0 %v9819_v38  ;;  %6244 = vmatmul.mubr.bf16.gmra.mrb[196].mxu1 %v9819_v38  ;;  %v10068_v38 = vrot.slane %v4960_v57, %v10238_v26 }
 0x483   :  { %5867 = vmatprep.mubr.bf16.mxu0 %v9833_v30  ;;  %6253 = vmatprep.mubr.bf16.mxu1 %v9833_v30  ;;  %v8633_v30 = vmov 1966171168  }
 0x48a   :  { %5868 = vmatmul.mubr.bf16.gmra.mrb[200].mxu0 %v9831_v49  ;;  %6254 = vmatmul.mubr.bf16.gmra.mrb[200].mxu1 %v9831_v49 }
 0x48b   :  { %5877 = vmatprep.mubr.bf16.mxu0 %v9845_v41  ;;  %6263 = vmatprep.mubr.bf16.mxu1 %v9845_v41 }
 0x492   :  { %5878 = vmatmul.mubr.bf16.gmra.mrb[204].mxu0 %v9843_v11  ;;  %6264 = vmatmul.mubr.bf16.gmra.mrb[204].mxu1 %v9843_v11  ;;  %v6607_v11 = vunpack.c.l.s4 %v8633_v30 }
 0x493   :  { %5887 = vmatprep.mubr.bf16.mxu0 %v9857_v51  ;;  %6273 = vmatprep.mubr.bf16.mxu1 %v9857_v51 }
 0x49a   :  { %5888 = vmatmul.mubr.bf16.gmra.mrb[208].mxu0 %v9855_v28  ;;  %6274 = vmatmul.mubr.bf16.gmra.mrb[208].mxu1 %v9855_v28 }
 0x49b   :  { %5897 = vmatprep.mubr.bf16.mxu0 %v9869_v27  ;;  %6283 = vmatprep.mubr.bf16.mxu1 %v9869_v27 }
 0x4a2   :  { %5898 = vmatmul.mubr.bf16.gmra.mrb[212].mxu0 %v9867_v35  ;;  %6284 = vmatmul.mubr.bf16.gmra.mrb[212].mxu1 %v9867_v35 }
 0x4a3   :  { %5907 = vmatprep.mubr.bf16.mxu0 %v9881_v0  ;;  %6293 = vmatprep.mubr.bf16.mxu1 %v9881_v0  ;;  %v6608_v0 = vunpack.c.0.s8 %v6607_v11 }
 0x4aa   :  { %5908 = vmatmul.mubr.bf16.gmra.mrb[216].mxu0 %v9879_v25  ;;  %6294 = vmatmul.mubr.bf16.gmra.mrb[216].mxu1 %v9879_v25 }
 0x4ab   :  { %5917 = vmatprep.mubr.bf16.mxu0 %v9893_v32  ;;  %6303 = vmatprep.mubr.bf16.mxu1 %v9893_v32 }
 0x4b2   :  { %5918 = vmatmul.mubr.bf16.gmra.mrb[220].mxu0 %v9891_v17  ;;  %6304 = vmatmul.mubr.bf16.gmra.mrb[220].mxu1 %v9891_v17 }
 0x4b3   :  { %5927 = vmatprep.mubr.bf16.mxu0 %v9905_v23  ;;  %6313 = vmatprep.mubr.bf16.mxu1 %v9905_v23 }
 0x4ba   :  { %5928 = vmatmul.mubr.bf16.gmra.mrb[224].mxu0 %v9903_v14  ;;  %6314 = vmatmul.mubr.bf16.gmra.mrb[224].mxu1 %v9903_v14 }
 0x4bb   :  { %5937 = vmatprep.mubr.bf16.mxu0 %v9917_v50  ;;  %6323 = vmatprep.mubr.bf16.mxu1 %v9917_v50 }
 0x4c2   :  { %5938 = vmatmul.mubr.bf16.gmra.mrb[228].mxu0 %v9915_v45  ;;  %6324 = vmatmul.mubr.bf16.gmra.mrb[228].mxu1 %v9915_v45 }
 0x4c3   :  { %5947 = vmatprep.mubr.bf16.mxu0 %v9929_v20  ;;  %6333 = vmatprep.mubr.bf16.mxu1 %v9929_v20  ;;  %v10081_v20 = vld.sshfl [vmem:[%s10229_s11] sm:$0x33 pattern:$0x75316420] }
 0x4ca   :  { %5948 = vmatmul.mubr.bf16.gmra.mrb[232].mxu0 %v9927_v9  ;;  %6334 = vmatmul.mubr.bf16.gmra.mrb[232].mxu1 %v9927_v9 }
 0x4cb   :  { %5957 = vmatprep.mubr.bf16.mxu0 %v9941_v31  ;;  %6343 = vmatprep.mubr.bf16.mxu1 %v9941_v31 }
 0x4d2   :  { %5958 = vmatmul.mubr.bf16.gmra.mrb[236].mxu0 %v9939_v56  ;;  %6344 = vmatmul.mubr.bf16.gmra.mrb[236].mxu1 %v9939_v56 }
 0x4d3   :  { %5967 = vmatprep.mubr.bf16.mxu0 %v9953_v18  ;;  %6353 = vmatprep.mubr.bf16.mxu1 %v9953_v18  ;;  %v10239_v18 = vld [vmem:[#allocation10_spill] sm:$0xff] }
 0x4da   :  { %5968 = vmatmul.mubr.bf16.gmra.mrb[240].mxu0 %v9951_v40  ;;  %6354 = vmatmul.mubr.bf16.gmra.mrb[240].mxu1 %v9951_v40  ;;  %v6605_v40 = vcombine.high %v10081_v20, %v10081_v20 }
 0x4db   :  { %5977 = vmatprep.mubr.bf16.mxu0 %v9965_v22  ;;  %6363 = vmatprep.mubr.bf16.mxu1 %v9965_v22 }
 0x4e2   :  { %5978 = vmatmul.mubr.bf16.gmra.mrb[244].mxu0 %v9963_v2  ;;  %6364 = vmatmul.mubr.bf16.gmra.mrb[244].mxu1 %v9963_v2  ;;  %v10086_v2 = vsub.s32 %v6608_v0, %v10239_v18 }
 0x4e3   :  { %5987 = vmatprep.mubr.bf16.mxu0 %v9977_v55  ;;  %6373 = vmatprep.mubr.bf16.mxu1 %v9977_v55 }
 0x4e4   :  { %v6619_v52 = vrot.slane %v6605_v40, %v10086_v2 }
 0x4e6   :  { %v6621_v60 = vcombine.high %v6619_v52, %v6619_v52 }
 0x4ea   :  { %5988 = vmatmul.mubr.bf16.gmra.mrb[248].mxu0 %v9975_v6  ;;  %6374 = vmatmul.mubr.bf16.gmra.mrb[248].mxu1 %v9975_v6 }
 0x4eb   :  { %5997 = vmatprep.mubr.bf16.mxu0 %v9989_v33  ;;  %6383 = vmatprep.mubr.bf16.mxu1 %v9989_v33 }
 0x4f2   :  { %5998 = vmatmul.mubr.bf16.gmra.mrb[252].mxu0 %v9987_v16  ;;  %6384 = vmatmul.mubr.bf16.gmra.mrb[252].mxu1 %v9987_v16 }
 0x4f3   :  { %6658 = vmatprep.mubr.bf16.mxu1 %v6619_v52  ;;  %6699 = vmatprep.mubr.bf16.mxu0 %v6621_v60 }
 0x54d   :  { %v5849_v1 = vpop.f32.mrb[192].mxu0  ;;  %v6235_v49 = vpop.f32.mrb[192].mxu1 }
 0x54e   :  { %v7320_v41 = vadd.f32 %v5849_v1, %v10059_v63  ;;  %v7384_v28 = vadd.f32 %v6235_v49, %v10062_v34  ;;  %v5851_v51 = vpop.f32.mrb[193].mxu0  ;;  %v6237_v35 = vpop.f32.mrb[193].mxu1 }
 0x54f   :  { %v7321_v27 = vadd.f32 %v5851_v51, %v10065_v37  ;;  %v7385_v8 = vadd.f32 %v6237_v35, %v10068_v38  ;;  %v5853_v25 = vpop.f32.mrb[194].mxu0  ;;  %v6239_v61 = vpop.f32.mrb[194].mxu1 }
 0x550   :  { %v7322_v26 = vadd.f32 %v5853_v25, %v10059_v63  ;;  %v7386_v17 = vadd.f32 %v6239_v61, %v10062_v34  ;;  %v5855_v32 = vpop.f32.mrb[195].mxu0  ;;  %v6241_v14 = vpop.f32.mrb[195].mxu1  ;;  %v6394_v23 = vmax.f32 %v7320_v41, 0.0  ;;  %v6396_v45 = vmax.f32 %v7384_v28, 0.0 }
 0x551   :  { %v7323_v50 = vadd.f32 %v5855_v32, %v10065_v37  ;;  %v7387_v9 = vadd.f32 %v6241_v14, %v10068_v38  ;;  %v6395_v22 = vmax.f32 %v7321_v27, 0.0  ;;  %v6397_v21 = vmax.f32 %v7385_v8, 0.0 }
 0x552   :  { %v6398_v56 = vmax.f32 %v7322_v26, 0.0  ;;  %v6400_v31 = vmax.f32 %v7386_v17, 0.0 }
 0x553   :  { %v6399_v6 = vmax.f32 %v7323_v50, 0.0  ;;  %v6401_v55 = vmax.f32 %v7387_v9, 0.0 }
 0x554   :  { %v6522_v43 = vpack.c.bf16 %v6398_v56, %v6394_v23  ;;  %v6524_v58 = vpack.c.bf16 %v6400_v31, %v6396_v45 }
 0x555   :  { %v6523_v3 = vpack.c.bf16 %v6399_v6, %v6395_v22  ;;  %v6525_v13 = vpack.c.bf16 %v6401_v55, %v6397_v21  ;;  %v5859_v29 = vpop.f32.mrb[196].mxu0  ;;  %v6245_v19 = vpop.f32.mrb[196].mxu1 }
 0x556   :  { %v7324_v4 = vadd.f32 %v5859_v29, %v10059_v63  ;;  %v7388_v15 = vadd.f32 %v6245_v19, %v10062_v34  ;;  %v5861_v54 = vpop.f32.mrb[197].mxu0  ;;  %v6247_v24 = vpop.f32.mrb[197].mxu1 }
 0x557   :  { %v7325_v53 = vadd.f32 %v5861_v54, %v10065_v37  ;;  %v7389_v36 = vadd.f32 %v6247_v24, %v10068_v38  ;;  %v5863_v5 = vpop.f32.mrb[198].mxu0  ;;  %v6249_v10 = vpop.f32.mrb[198].mxu1  ;;  %6626 = vmatprep.subr.bf16.mxu1 %v6523_v3  ;;  %6667 = vmatprep.subr.bf16.mxu0 %v6525_v13 }
 0x558   :  { %v7326_v39 = vadd.f32 %v5863_v5, %v10059_v63  ;;  %v7390_v46 = vadd.f32 %v6249_v10, %v10062_v34  ;;  %v5865_v62 = vpop.f32.mrb[199].mxu0  ;;  %v6251_v47 = vpop.f32.mrb[199].mxu1  ;;  %6627 = vmatpush1.bf16.xpose.msra.mxu1 %v6522_v43  ;;  %6668 = vmatpush1.bf16.xpose.msra.mxu0 %v6524_v58  ;;  %v6402_v44 = vmax.f32 %v7324_v4, 0.0  ;;  %v6404_v16 = vmax.f32 %v7388_v15, 0.0 }
 0x559   :  { %v7327_v48 = vadd.f32 %v5865_v62, %v10065_v37  ;;  %v7391_v7 = vadd.f32 %v6251_v47, %v10068_v38  ;;  %v6403_v57 = vmax.f32 %v7325_v53, 0.0  ;;  %v6405_v1 = vmax.f32 %v7389_v36, 0.0 }
 0x55a   :  { %v6406_v42 = vmax.f32 %v7326_v39, 0.0  ;;  %v6408_v33 = vmax.f32 %v7390_v46, 0.0 }
 0x55b   :  { %v6407_v49 = vmax.f32 %v7327_v48, 0.0  ;;  %v6409_v30 = vmax.f32 %v7391_v7, 0.0 }
 0x55c   :  { %v6526_v11 = vpack.c.bf16 %v6406_v42, %v6402_v44  ;;  %v6528_v41 = vpack.c.bf16 %v6408_v33, %v6404_v16 }
 0x55d   :  { %v6527_v28 = vpack.c.bf16 %v6407_v49, %v6403_v57  ;;  %v6529_v51 = vpack.c.bf16 %v6409_v30, %v6405_v1  ;;  %v5869_v35 = vpop.f32.mrb[200].mxu0  ;;  %v6255_v27 = vpop.f32.mrb[200].mxu1 }
 0x55e   :  { %v7328_v8 = vadd.f32 %v5869_v35, %v10059_v63  ;;  %v7392_v25 = vadd.f32 %v6255_v27, %v10062_v34  ;;  %v5871_v61 = vpop.f32.mrb[201].mxu0  ;;  %v6257_v0 = vpop.f32.mrb[201].mxu1 }
 0x55f   :  { %v7329_v26 = vadd.f32 %v5871_v61, %v10065_v37  ;;  %v7393_v17 = vadd.f32 %v6257_v0, %v10068_v38  ;;  %v5873_v32 = vpop.f32.mrb[202].mxu0  ;;  %v6259_v14 = vpop.f32.mrb[202].mxu1  ;;  %6628 = vmatprep.subr.bf16.mxu1 %v6527_v28  ;;  %6669 = vmatprep.subr.bf16.mxu0 %v6529_v51 }
 0x560   :  { %v7330_v23 = vadd.f32 %v5873_v32, %v10059_v63  ;;  %v7394_v45 = vadd.f32 %v6259_v14, %v10062_v34  ;;  %v5875_v50 = vpop.f32.mrb[203].mxu0  ;;  %v6261_v9 = vpop.f32.mrb[203].mxu1  ;;  %6629 = vmatpush1.bf16.xpose.msra.mxu1 %v6526_v11  ;;  %6670 = vmatpush1.bf16.xpose.msra.mxu0 %v6528_v41  ;;  %v6410_v40 = vmax.f32 %v7328_v8, 0.0  ;;  %v6412_v18 = vmax.f32 %v7392_v25, 0.0 }
 0x561   :  { %v7331_v56 = vadd.f32 %v5875_v50, %v10065_v37  ;;  %v7395_v31 = vadd.f32 %v6261_v9, %v10068_v38  ;;  %v6411_v6 = vmax.f32 %v7329_v26, 0.0  ;;  %v6413_v55 = vmax.f32 %v7393_v17, 0.0 }
 0x562   :  { %v6414_v22 = vmax.f32 %v7330_v23, 0.0  ;;  %v6416_v21 = vmax.f32 %v7394_v45, 0.0 }
 0x563   :  { %v6415_v43 = vmax.f32 %v7331_v56, 0.0  ;;  %v6417_v58 = vmax.f32 %v7395_v31, 0.0 }
 0x564   :  { %v6530_v52 = vpack.c.bf16 %v6414_v22, %v6410_v40  ;;  %v6532_v3 = vpack.c.bf16 %v6416_v21, %v6412_v18 }
 0x565   :  { %v6531_v13 = vpack.c.bf16 %v6415_v43, %v6411_v6  ;;  %v6533_v29 = vpack.c.bf16 %v6417_v58, %v6413_v55  ;;  %v5879_v19 = vpop.f32.mrb[204].mxu0  ;;  %v6265_v4 = vpop.f32.mrb[204].mxu1 }
 0x566   :  { %v7332_v15 = vadd.f32 %v5879_v19, %v10059_v63  ;;  %v7396_v54 = vadd.f32 %v6265_v4, %v10062_v34  ;;  %v5881_v24 = vpop.f32.mrb[205].mxu0  ;;  %v6267_v60 = vpop.f32.mrb[205].mxu1 }
 0x567   :  { %v7333_v53 = vadd.f32 %v5881_v24, %v10065_v37  ;;  %v7397_v36 = vadd.f32 %v6267_v60, %v10068_v38  ;;  %v5883_v5 = vpop.f32.mrb[206].mxu0  ;;  %v6269_v10 = vpop.f32.mrb[206].mxu1  ;;  %6630 = vmatprep.subr.bf16.mxu1 %v6531_v13  ;;  %6671 = vmatprep.subr.bf16.mxu0 %v6533_v29 }
 0x568   :  { %v7334_v12 = vadd.f32 %v5883_v5, %v10059_v63  ;;  %v7398_v39 = vadd.f32 %v6269_v10, %v10062_v34  ;;  %v5885_v46 = vpop.f32.mrb[207].mxu0  ;;  %v6271_v62 = vpop.f32.mrb[207].mxu1  ;;  %6631 = vmatpush1.bf16.xpose.msra.mxu1 %v6530_v52  ;;  %6672 = vmatpush1.bf16.xpose.msra.mxu0 %v6532_v3  ;;  %v6418_v7 = vmax.f32 %v7332_v15, 0.0  ;;  %v6420_v44 = vmax.f32 %v7396_v54, 0.0 }
 0x569   :  { %v7335_v47 = vadd.f32 %v5885_v46, %v10065_v37  ;;  %v7399_v48 = vadd.f32 %v6271_v62, %v10068_v38  ;;  %v6419_v33 = vmax.f32 %v7333_v53, 0.0  ;;  %v6421_v57 = vmax.f32 %v7397_v36, 0.0 }
 0x56a   :  { %v6422_v16 = vmax.f32 %v7334_v12, 0.0  ;;  %v6424_v42 = vmax.f32 %v7398_v39, 0.0 }
 0x56b   :  { %v6423_v1 = vmax.f32 %v7335_v47, 0.0  ;;  %v6425_v49 = vmax.f32 %v7399_v48, 0.0 }
 0x56c   :  { %v6534_v30 = vpack.c.bf16 %v6422_v16, %v6418_v7  ;;  %v6536_v11 = vpack.c.bf16 %v6424_v42, %v6420_v44 }
 0x56d   :  { %v6535_v41 = vpack.c.bf16 %v6423_v1, %v6419_v33  ;;  %v6537_v28 = vpack.c.bf16 %v6425_v49, %v6421_v57  ;;  %v5889_v51 = vpop.f32.mrb[208].mxu0  ;;  %v6275_v35 = vpop.f32.mrb[208].mxu1 }
 0x56e   :  { %v7336_v27 = vadd.f32 %v5889_v51, %v10059_v63  ;;  %v7400_v8 = vadd.f32 %v6275_v35, %v10062_v34  ;;  %v5891_v25 = vpop.f32.mrb[209].mxu0  ;;  %v6277_v61 = vpop.f32.mrb[209].mxu1 }
 0x56f   :  { %v7337_v0 = vadd.f32 %v5891_v25, %v10065_v37  ;;  %v7401_v26 = vadd.f32 %v6277_v61, %v10068_v38  ;;  %v5893_v17 = vpop.f32.mrb[210].mxu0  ;;  %v6279_v32 = vpop.f32.mrb[210].mxu1  ;;  %6632 = vmatprep.subr.bf16.mxu1 %v6535_v41  ;;  %6673 = vmatprep.subr.bf16.mxu0 %v6537_v28 }
 0x570   :  { %v7338_v14 = vadd.f32 %v5893_v17, %v10059_v63  ;;  %v7402_v23 = vadd.f32 %v6279_v32, %v10062_v34  ;;  %v5895_v45 = vpop.f32.mrb[211].mxu0  ;;  %v6281_v50 = vpop.f32.mrb[211].mxu1  ;;  %6633 = vmatpush1.bf16.xpose.msra.mxu1 %v6534_v30  ;;  %6674 = vmatpush1.bf16.xpose.msra.mxu0 %v6536_v11  ;;  %v6426_v31 = vmax.f32 %v7336_v27, 0.0  ;;  %v6428_v40 = vmax.f32 %v7400_v8, 0.0 }
 0x571   :  { %v7339_v9 = vadd.f32 %v5895_v45, %v10065_v37  ;;  %v7403_v56 = vadd.f32 %v6281_v50, %v10068_v38  ;;  %v6427_v21 = vmax.f32 %v7337_v0, 0.0  ;;  %v6429_v6 = vmax.f32 %v7401_v26, 0.0 }
 0x572   :  { %v6430_v18 = vmax.f32 %v7338_v14, 0.0  ;;  %v6432_v22 = vmax.f32 %v7402_v23, 0.0 }
 0x573   :  { %v6431_v55 = vmax.f32 %v7339_v9, 0.0  ;;  %v6433_v43 = vmax.f32 %v7403_v56, 0.0 }
 0x574   :  { %v6538_v58 = vpack.c.bf16 %v6430_v18, %v6426_v31  ;;  %v6540_v52 = vpack.c.bf16 %v6432_v22, %v6428_v40 }
 0x575   :  { %v6539_v3 = vpack.c.bf16 %v6431_v55, %v6427_v21  ;;  %v6541_v13 = vpack.c.bf16 %v6433_v43, %v6429_v6  ;;  %v5899_v29 = vpop.f32.mrb[212].mxu0  ;;  %v6285_v19 = vpop.f32.mrb[212].mxu1 }
 0x576   :  { %v7340_v4 = vadd.f32 %v5899_v29, %v10059_v63  ;;  %v7404_v15 = vadd.f32 %v6285_v19, %v10062_v34  ;;  %v5901_v54 = vpop.f32.mrb[213].mxu0  ;;  %v6287_v24 = vpop.f32.mrb[213].mxu1 }
 0x577   :  { %v7341_v60 = vadd.f32 %v5901_v54, %v10065_v37  ;;  %v7405_v53 = vadd.f32 %v6287_v24, %v10068_v38  ;;  %v5903_v36 = vpop.f32.mrb[214].mxu0  ;;  %v6289_v5 = vpop.f32.mrb[214].mxu1  ;;  %6634 = vmatprep.subr.bf16.mxu1 %v6539_v3  ;;  %6675 = vmatprep.subr.bf16.mxu0 %v6541_v13 }
 0x578   :  { %v7342_v10 = vadd.f32 %v5903_v36, %v10059_v63  ;;  %v7406_v12 = vadd.f32 %v6289_v5, %v10062_v34  ;;  %v5905_v39 = vpop.f32.mrb[215].mxu0  ;;  %v6291_v46 = vpop.f32.mrb[215].mxu1  ;;  %6635 = vmatpush1.bf16.xpose.msra.mxu1 %v6538_v58  ;;  %6676 = vmatpush1.bf16.xpose.msra.mxu0 %v6540_v52  ;;  %v6434_v48 = vmax.f32 %v7340_v4, 0.0  ;;  %v6436_v7 = vmax.f32 %v7404_v15, 0.0 }
 0x579   :  { %v7343_v62 = vadd.f32 %v5905_v39, %v10065_v37  ;;  %v7407_v47 = vadd.f32 %v6291_v46, %v10068_v38  ;;  %v6435_v42 = vmax.f32 %v7341_v60, 0.0  ;;  %v6437_v33 = vmax.f32 %v7405_v53, 0.0 }
 0x57a   :  { %v6438_v44 = vmax.f32 %v7342_v10, 0.0  ;;  %v6440_v16 = vmax.f32 %v7406_v12, 0.0 }
 0x57b   :  { %v6439_v57 = vmax.f32 %v7343_v62, 0.0  ;;  %v6441_v1 = vmax.f32 %v7407_v47, 0.0 }
 0x57c   :  { %v6542_v49 = vpack.c.bf16 %v6438_v44, %v6434_v48  ;;  %v6544_v30 = vpack.c.bf16 %v6440_v16, %v6436_v7 }
 0x57d   :  { %v6543_v11 = vpack.c.bf16 %v6439_v57, %v6435_v42  ;;  %v6545_v41 = vpack.c.bf16 %v6441_v1, %v6437_v33  ;;  %v5909_v28 = vpop.f32.mrb[216].mxu0  ;;  %v6295_v51 = vpop.f32.mrb[216].mxu1 }
 0x57e   :  { %v7344_v35 = vadd.f32 %v5909_v28, %v10059_v63  ;;  %v7408_v27 = vadd.f32 %v6295_v51, %v10062_v34  ;;  %v5911_v8 = vpop.f32.mrb[217].mxu0  ;;  %v6297_v25 = vpop.f32.mrb[217].mxu1 }
 0x57f   :  { %v7345_v61 = vadd.f32 %v5911_v8, %v10065_v37  ;;  %v7409_v0 = vadd.f32 %v6297_v25, %v10068_v38  ;;  %v5913_v26 = vpop.f32.mrb[218].mxu0  ;;  %v6299_v17 = vpop.f32.mrb[218].mxu1  ;;  %6636 = vmatprep.subr.bf16.mxu1 %v6543_v11  ;;  %6677 = vmatprep.subr.bf16.mxu0 %v6545_v41 }
 0x580   :  { %v7346_v32 = vadd.f32 %v5913_v26, %v10059_v63  ;;  %v7410_v14 = vadd.f32 %v6299_v17, %v10062_v34  ;;  %v5915_v23 = vpop.f32.mrb[219].mxu0  ;;  %v6301_v45 = vpop.f32.mrb[219].mxu1  ;;  %6637 = vmatpush1.bf16.xpose.msra.mxu1 %v6542_v49  ;;  %6678 = vmatpush1.bf16.xpose.msra.mxu0 %v6544_v30  ;;  %v6442_v56 = vmax.f32 %v7344_v35, 0.0  ;;  %v6444_v31 = vmax.f32 %v7408_v27, 0.0 }
 0x581   :  { %v7347_v50 = vadd.f32 %v5915_v23, %v10065_v37  ;;  %v7411_v9 = vadd.f32 %v6301_v45, %v10068_v38  ;;  %v6443_v22 = vmax.f32 %v7345_v61, 0.0  ;;  %v6445_v21 = vmax.f32 %v7409_v0, 0.0 }
 0x582   :  { %v6446_v40 = vmax.f32 %v7346_v32, 0.0  ;;  %v6448_v18 = vmax.f32 %v7410_v14, 0.0 }
 0x583   :  { %v6447_v6 = vmax.f32 %v7347_v50, 0.0  ;;  %v6449_v55 = vmax.f32 %v7411_v9, 0.0 }
 0x584   :  { %v6546_v43 = vpack.c.bf16 %v6446_v40, %v6442_v56  ;;  %v6548_v58 = vpack.c.bf16 %v6448_v18, %v6444_v31 }
 0x585   :  { %v6547_v52 = vpack.c.bf16 %v6447_v6, %v6443_v22  ;;  %v6549_v3 = vpack.c.bf16 %v6449_v55, %v6445_v21  ;;  %v5919_v13 = vpop.f32.mrb[220].mxu0  ;;  %v6305_v29 = vpop.f32.mrb[220].mxu1 }
 0x586   :  { %v7348_v19 = vadd.f32 %v5919_v13, %v10059_v63  ;;  %v7412_v4 = vadd.f32 %v6305_v29, %v10062_v34  ;;  %v5921_v15 = vpop.f32.mrb[221].mxu0  ;;  %v6307_v54 = vpop.f32.mrb[221].mxu1 }
 0x587   :  { %v7349_v24 = vadd.f32 %v5921_v15, %v10065_v37  ;;  %v7413_v60 = vadd.f32 %v6307_v54, %v10068_v38  ;;  %v5923_v53 = vpop.f32.mrb[222].mxu0  ;;  %v6309_v36 = vpop.f32.mrb[222].mxu1  ;;  %6638 = vmatprep.subr.bf16.mxu1 %v6547_v52  ;;  %6679 = vmatprep.subr.bf16.mxu0 %v6549_v3 }
 0x588   :  { %v7350_v5 = vadd.f32 %v5923_v53, %v10059_v63  ;;  %v7414_v10 = vadd.f32 %v6309_v36, %v10062_v34  ;;  %v5925_v12 = vpop.f32.mrb[223].mxu0  ;;  %v6311_v39 = vpop.f32.mrb[223].mxu1  ;;  %6639 = vmatpush1.bf16.xpose.msra.mxu1 %v6546_v43  ;;  %6680 = vmatpush1.bf16.xpose.msra.mxu0 %v6548_v58  ;;  %v6450_v47 = vmax.f32 %v7348_v19, 0.0  ;;  %v6452_v48 = vmax.f32 %v7412_v4, 0.0 }
 0x589   :  { %v7351_v46 = vadd.f32 %v5925_v12, %v10065_v37  ;;  %v7415_v62 = vadd.f32 %v6311_v39, %v10068_v38  ;;  %v6451_v16 = vmax.f32 %v7349_v24, 0.0  ;;  %v6453_v42 = vmax.f32 %v7413_v60, 0.0 }
 0x58a   :  { %v6454_v7 = vmax.f32 %v7350_v5, 0.0  ;;  %v6456_v44 = vmax.f32 %v7414_v10, 0.0 }
 0x58b   :  { %v6455_v33 = vmax.f32 %v7351_v46, 0.0  ;;  %v6457_v57 = vmax.f32 %v7415_v62, 0.0 }
 0x58c   :  { %v6550_v1 = vpack.c.bf16 %v6454_v7, %v6450_v47  ;;  %v6552_v49 = vpack.c.bf16 %v6456_v44, %v6452_v48 }
 0x58d   :  { %v6551_v30 = vpack.c.bf16 %v6455_v33, %v6451_v16  ;;  %v6553_v11 = vpack.c.bf16 %v6457_v57, %v6453_v42  ;;  %v5929_v41 = vpop.f32.mrb[224].mxu0  ;;  %v6315_v28 = vpop.f32.mrb[224].mxu1 }
 0x58e   :  { %v7352_v51 = vadd.f32 %v5929_v41, %v10059_v63  ;;  %v7416_v35 = vadd.f32 %v6315_v28, %v10062_v34  ;;  %v5931_v27 = vpop.f32.mrb[225].mxu0  ;;  %v6317_v8 = vpop.f32.mrb[225].mxu1 }
 0x58f   :  { %v7353_v25 = vadd.f32 %v5931_v27, %v10065_v37  ;;  %v7417_v61 = vadd.f32 %v6317_v8, %v10068_v38  ;;  %v5933_v0 = vpop.f32.mrb[226].mxu0  ;;  %v6319_v26 = vpop.f32.mrb[226].mxu1  ;;  %6640 = vmatprep.subr.bf16.mxu1 %v6551_v30  ;;  %6681 = vmatprep.subr.bf16.mxu0 %v6553_v11 }
 0x590   :  { %v7354_v17 = vadd.f32 %v5933_v0, %v10059_v63  ;;  %v7418_v32 = vadd.f32 %v6319_v26, %v10062_v34  ;;  %v5935_v14 = vpop.f32.mrb[227].mxu0  ;;  %v6321_v23 = vpop.f32.mrb[227].mxu1  ;;  %6641 = vmatpush1.bf16.xpose.msra.mxu1 %v6550_v1  ;;  %6682 = vmatpush1.bf16.xpose.msra.mxu0 %v6552_v49  ;;  %v6458_v9 = vmax.f32 %v7352_v51, 0.0  ;;  %v6460_v56 = vmax.f32 %v7416_v35, 0.0 }
 0x591   :  { %v7355_v45 = vadd.f32 %v5935_v14, %v10065_v37  ;;  %v7419_v50 = vadd.f32 %v6321_v23, %v10068_v38  ;;  %v6459_v18 = vmax.f32 %v7353_v25, 0.0  ;;  %v6461_v22 = vmax.f32 %v7417_v61, 0.0 }
 0x592   :  { %v6462_v31 = vmax.f32 %v7354_v17, 0.0  ;;  %v6464_v40 = vmax.f32 %v7418_v32, 0.0 }
 0x593   :  { %v6463_v21 = vmax.f32 %v7355_v45, 0.0  ;;  %v6465_v6 = vmax.f32 %v7419_v50, 0.0 }
 0x594   :  { %v6554_v55 = vpack.c.bf16 %v6462_v31, %v6458_v9  ;;  %v6556_v43 = vpack.c.bf16 %v6464_v40, %v6460_v56 }
 0x595   :  { %v6555_v58 = vpack.c.bf16 %v6463_v21, %v6459_v18  ;;  %v6557_v52 = vpack.c.bf16 %v6465_v6, %v6461_v22  ;;  %v5939_v3 = vpop.f32.mrb[228].mxu0  ;;  %v6325_v13 = vpop.f32.mrb[228].mxu1 }
 0x596   :  { %v7356_v29 = vadd.f32 %v5939_v3, %v10059_v63  ;;  %v7420_v19 = vadd.f32 %v6325_v13, %v10062_v34  ;;  %v5941_v4 = vpop.f32.mrb[229].mxu0  ;;  %v6327_v15 = vpop.f32.mrb[229].mxu1 }
 0x597   :  { %v7357_v54 = vadd.f32 %v5941_v4, %v10065_v37  ;;  %v7421_v24 = vadd.f32 %v6327_v15, %v10068_v38  ;;  %v5943_v60 = vpop.f32.mrb[230].mxu0  ;;  %v6329_v53 = vpop.f32.mrb[230].mxu1  ;;  %6642 = vmatprep.subr.bf16.mxu1 %v6555_v58  ;;  %6683 = vmatprep.subr.bf16.mxu0 %v6557_v52 }
 0x598   :  { %v7358_v36 = vadd.f32 %v5943_v60, %v10059_v63  ;;  %v7422_v5 = vadd.f32 %v6329_v53, %v10062_v34  ;;  %v5945_v10 = vpop.f32.mrb[231].mxu0  ;;  %v6331_v12 = vpop.f32.mrb[231].mxu1  ;;  %6643 = vmatpush1.bf16.xpose.msra.mxu1 %v6554_v55  ;;  %6684 = vmatpush1.bf16.xpose.msra.mxu0 %v6556_v43  ;;  %v6466_v62 = vmax.f32 %v7356_v29, 0.0  ;;  %v6468_v47 = vmax.f32 %v7420_v19, 0.0 }
 0x599   :  { %v7359_v39 = vadd.f32 %v5945_v10, %v10065_v37  ;;  %v7423_v46 = vadd.f32 %v6331_v12, %v10068_v38  ;;  %v6467_v44 = vmax.f32 %v7357_v54, 0.0  ;;  %v6469_v16 = vmax.f32 %v7421_v24, 0.0 }
 0x59a   :  { %v6470_v48 = vmax.f32 %v7358_v36, 0.0  ;;  %v6472_v7 = vmax.f32 %v7422_v5, 0.0 }
 0x59b   :  { %v6471_v42 = vmax.f32 %v7359_v39, 0.0  ;;  %v6473_v33 = vmax.f32 %v7423_v46, 0.0 }
 0x59c   :  { %v6558_v57 = vpack.c.bf16 %v6470_v48, %v6466_v62  ;;  %v6560_v1 = vpack.c.bf16 %v6472_v7, %v6468_v47 }
 0x59d   :  { %v6559_v49 = vpack.c.bf16 %v6471_v42, %v6467_v44  ;;  %v6561_v30 = vpack.c.bf16 %v6473_v33, %v6469_v16  ;;  %v5949_v11 = vpop.f32.mrb[232].mxu0  ;;  %v6335_v41 = vpop.f32.mrb[232].mxu1 }
 0x59e   :  { %v7360_v28 = vadd.f32 %v5949_v11, %v10059_v63  ;;  %v7424_v51 = vadd.f32 %v6335_v41, %v10062_v34  ;;  %v5951_v35 = vpop.f32.mrb[233].mxu0  ;;  %v6337_v27 = vpop.f32.mrb[233].mxu1 }
 0x59f   :  { %v7361_v8 = vadd.f32 %v5951_v35, %v10065_v37  ;;  %v7425_v25 = vadd.f32 %v6337_v27, %v10068_v38  ;;  %v5953_v61 = vpop.f32.mrb[234].mxu0  ;;  %v6339_v0 = vpop.f32.mrb[234].mxu1  ;;  %6644 = vmatprep.subr.bf16.mxu1 %v6559_v49  ;;  %6685 = vmatprep.subr.bf16.mxu0 %v6561_v30 }
 0x5a0   :  { %v7362_v26 = vadd.f32 %v5953_v61, %v10059_v63  ;;  %v7426_v17 = vadd.f32 %v6339_v0, %v10062_v34  ;;  %v5955_v32 = vpop.f32.mrb[235].mxu0  ;;  %v6341_v14 = vpop.f32.mrb[235].mxu1  ;;  %6645 = vmatpush1.bf16.xpose.msra.mxu1 %v6558_v57  ;;  %6686 = vmatpush1.bf16.xpose.msra.mxu0 %v6560_v1  ;;  %v6474_v50 = vmax.f32 %v7360_v28, 0.0  ;;  %v6476_v9 = vmax.f32 %v7424_v51, 0.0 }
 0x5a1   :  { %v7363_v23 = vadd.f32 %v5955_v32, %v10065_v37  ;;  %v7427_v45 = vadd.f32 %v6341_v14, %v10068_v38  ;;  %v6475_v40 = vmax.f32 %v7361_v8, 0.0  ;;  %v6477_v18 = vmax.f32 %v7425_v25, 0.0 }
 0x5a2   :  { %v6478_v56 = vmax.f32 %v7362_v26, 0.0  ;;  %v6480_v31 = vmax.f32 %v7426_v17, 0.0 }
 0x5a3   :  { %v6479_v22 = vmax.f32 %v7363_v23, 0.0  ;;  %v6481_v21 = vmax.f32 %v7427_v45, 0.0 }
 0x5a4   :  { %v6562_v6 = vpack.c.bf16 %v6478_v56, %v6474_v50  ;;  %v6564_v55 = vpack.c.bf16 %v6480_v31, %v6476_v9 }
 0x5a5   :  { %v6563_v43 = vpack.c.bf16 %v6479_v22, %v6475_v40  ;;  %v6565_v58 = vpack.c.bf16 %v6481_v21, %v6477_v18  ;;  %v5959_v52 = vpop.f32.mrb[236].mxu0  ;;  %v6345_v3 = vpop.f32.mrb[236].mxu1 }
 0x5a6   :  { %v7364_v13 = vadd.f32 %v5959_v52, %v10059_v63  ;;  %v7428_v29 = vadd.f32 %v6345_v3, %v10062_v34  ;;  %v5961_v19 = vpop.f32.mrb[237].mxu0  ;;  %v6347_v4 = vpop.f32.mrb[237].mxu1 }
 0x5a7   :  { %v7365_v15 = vadd.f32 %v5961_v19, %v10065_v37  ;;  %v7429_v54 = vadd.f32 %v6347_v4, %v10068_v38  ;;  %v5963_v24 = vpop.f32.mrb[238].mxu0  ;;  %v6349_v60 = vpop.f32.mrb[238].mxu1  ;;  %6646 = vmatprep.subr.bf16.mxu1 %v6563_v43  ;;  %6687 = vmatprep.subr.bf16.mxu0 %v6565_v58 }
 0x5a8   :  { %v7366_v53 = vadd.f32 %v5963_v24, %v10059_v63  ;;  %v7430_v36 = vadd.f32 %v6349_v60, %v10062_v34  ;;  %v5965_v5 = vpop.f32.mrb[239].mxu0  ;;  %v6351_v10 = vpop.f32.mrb[239].mxu1  ;;  %6647 = vmatpush1.bf16.xpose.msra.mxu1 %v6562_v6  ;;  %6688 = vmatpush1.bf16.xpose.msra.mxu0 %v6564_v55  ;;  %v6482_v46 = vmax.f32 %v7364_v13, 0.0  ;;  %v6484_v62 = vmax.f32 %v7428_v29, 0.0 }
 0x5a9   :  { %v7367_v12 = vadd.f32 %v5965_v5, %v10065_v37  ;;  %v7431_v39 = vadd.f32 %v6351_v10, %v10068_v38  ;;  %v6483_v7 = vmax.f32 %v7365_v15, 0.0  ;;  %v6485_v44 = vmax.f32 %v7429_v54, 0.0 }
 0x5aa   :  { %v6486_v47 = vmax.f32 %v7366_v53, 0.0  ;;  %v6488_v48 = vmax.f32 %v7430_v36, 0.0 }
 0x5ab   :  { %v6487_v16 = vmax.f32 %v7367_v12, 0.0  ;;  %v6489_v42 = vmax.f32 %v7431_v39, 0.0 }
 0x5ac   :  { %v6566_v33 = vpack.c.bf16 %v6486_v47, %v6482_v46  ;;  %v6568_v57 = vpack.c.bf16 %v6488_v48, %v6484_v62 }
 0x5ad   :  { %v6567_v1 = vpack.c.bf16 %v6487_v16, %v6483_v7  ;;  %v6569_v49 = vpack.c.bf16 %v6489_v42, %v6485_v44  ;;  %v5969_v30 = vpop.f32.mrb[240].mxu0  ;;  %v6355_v11 = vpop.f32.mrb[240].mxu1 }
 0x5ae   :  { %v7368_v41 = vadd.f32 %v5969_v30, %v10059_v63  ;;  %v7432_v28 = vadd.f32 %v6355_v11, %v10062_v34  ;;  %v5971_v51 = vpop.f32.mrb[241].mxu0  ;;  %v6357_v35 = vpop.f32.mrb[241].mxu1 }
 0x5af   :  { %v7369_v27 = vadd.f32 %v5971_v51, %v10065_v37  ;;  %v7433_v8 = vadd.f32 %v6357_v35, %v10068_v38  ;;  %v5973_v25 = vpop.f32.mrb[242].mxu0  ;;  %v6359_v61 = vpop.f32.mrb[242].mxu1  ;;  %6648 = vmatprep.subr.bf16.mxu1 %v6567_v1  ;;  %6689 = vmatprep.subr.bf16.mxu0 %v6569_v49 }
 0x5b0   :  { %v7370_v0 = vadd.f32 %v5973_v25, %v10059_v63  ;;  %v7434_v26 = vadd.f32 %v6359_v61, %v10062_v34  ;;  %v5975_v17 = vpop.f32.mrb[243].mxu0  ;;  %v6361_v32 = vpop.f32.mrb[243].mxu1  ;;  %6649 = vmatpush1.bf16.xpose.msra.mxu1 %v6566_v33  ;;  %6690 = vmatpush1.bf16.xpose.msra.mxu0 %v6568_v57  ;;  %v6490_v45 = vmax.f32 %v7368_v41, 0.0  ;;  %v6492_v50 = vmax.f32 %v7432_v28, 0.0 }
 0x5b1   :  { %v7371_v14 = vadd.f32 %v5975_v17, %v10065_v37  ;;  %v7435_v23 = vadd.f32 %v6361_v32, %v10068_v38  ;;  %v6491_v31 = vmax.f32 %v7369_v27, 0.0  ;;  %v6493_v40 = vmax.f32 %v7433_v8, 0.0 }
 0x5b2   :  { %v6494_v9 = vmax.f32 %v7370_v0, 0.0  ;;  %v6496_v56 = vmax.f32 %v7434_v26, 0.0 }
 0x5b3   :  { %v6495_v18 = vmax.f32 %v7371_v14, 0.0  ;;  %v6497_v22 = vmax.f32 %v7435_v23, 0.0 }
 0x5b4   :  { %v6570_v21 = vpack.c.bf16 %v6494_v9, %v6490_v45  ;;  %v6572_v6 = vpack.c.bf16 %v6496_v56, %v6492_v50 }
 0x5b5   :  { %v6571_v55 = vpack.c.bf16 %v6495_v18, %v6491_v31  ;;  %v6573_v43 = vpack.c.bf16 %v6497_v22, %v6493_v40  ;;  %v5979_v58 = vpop.f32.mrb[244].mxu0  ;;  %v6365_v52 = vpop.f32.mrb[244].mxu1 }
 0x5b6   :  { %v7372_v3 = vadd.f32 %v5979_v58, %v10059_v63  ;;  %v7436_v13 = vadd.f32 %v6365_v52, %v10062_v34  ;;  %v5981_v29 = vpop.f32.mrb[245].mxu0  ;;  %v6367_v19 = vpop.f32.mrb[245].mxu1 }
 0x5b7   :  { %v7373_v4 = vadd.f32 %v5981_v29, %v10065_v37  ;;  %v7437_v15 = vadd.f32 %v6367_v19, %v10068_v38  ;;  %v5983_v54 = vpop.f32.mrb[246].mxu0  ;;  %v6369_v24 = vpop.f32.mrb[246].mxu1  ;;  %6650 = vmatprep.subr.bf16.mxu1 %v6571_v55  ;;  %6691 = vmatprep.subr.bf16.mxu0 %v6573_v43 }
 0x5b8   :  { %v7374_v60 = vadd.f32 %v5983_v54, %v10059_v63  ;;  %v7438_v53 = vadd.f32 %v6369_v24, %v10062_v34  ;;  %v5985_v36 = vpop.f32.mrb[247].mxu0  ;;  %v6371_v5 = vpop.f32.mrb[247].mxu1  ;;  %6651 = vmatpush1.bf16.xpose.msra.mxu1 %v6570_v21  ;;  %6692 = vmatpush1.bf16.xpose.msra.mxu0 %v6572_v6  ;;  %v6498_v39 = vmax.f32 %v7372_v3, 0.0  ;;  %v6500_v46 = vmax.f32 %v7436_v13, 0.0 }
 0x5b9   :  { %v7375_v10 = vadd.f32 %v5985_v36, %v10065_v37  ;;  %v7439_v12 = vadd.f32 %v6371_v5, %v10068_v38  ;;  %v6499_v48 = vmax.f32 %v7373_v4, 0.0  ;;  %v6501_v7 = vmax.f32 %v7437_v15, 0.0 }
 0x5ba   :  { %v6502_v62 = vmax.f32 %v7374_v60, 0.0  ;;  %v6504_v47 = vmax.f32 %v7438_v53, 0.0 }
 0x5bb   :  { %v6503_v44 = vmax.f32 %v7375_v10, 0.0  ;;  %v6505_v16 = vmax.f32 %v7439_v12, 0.0 }
 0x5bc   :  { %v6574_v42 = vpack.c.bf16 %v6502_v62, %v6498_v39  ;;  %v6576_v33 = vpack.c.bf16 %v6504_v47, %v6500_v46 }
 0x5bd   :  { %v6575_v57 = vpack.c.bf16 %v6503_v44, %v6499_v48  ;;  %v6577_v1 = vpack.c.bf16 %v6505_v16, %v6501_v7  ;;  %v5989_v49 = vpop.f32.mrb[248].mxu0  ;;  %v6375_v30 = vpop.f32.mrb[248].mxu1 }
 0x5be   :  { %v7376_v11 = vadd.f32 %v5989_v49, %v10059_v63  ;;  %v7440_v41 = vadd.f32 %v6375_v30, %v10062_v34  ;;  %v5991_v28 = vpop.f32.mrb[249].mxu0  ;;  %v6377_v51 = vpop.f32.mrb[249].mxu1 }
 0x5bf   :  { %v7377_v35 = vadd.f32 %v5991_v28, %v10065_v37  ;;  %v7441_v27 = vadd.f32 %v6377_v51, %v10068_v38  ;;  %v5993_v8 = vpop.f32.mrb[250].mxu0  ;;  %v6379_v25 = vpop.f32.mrb[250].mxu1  ;;  %6652 = vmatprep.subr.bf16.mxu1 %v6575_v57  ;;  %6693 = vmatprep.subr.bf16.mxu0 %v6577_v1 }
 0x5c0   :  { %v7378_v61 = vadd.f32 %v5993_v8, %v10059_v63  ;;  %v7442_v0 = vadd.f32 %v6379_v25, %v10062_v34  ;;  %v5995_v26 = vpop.f32.mrb[251].mxu0  ;;  %v6381_v17 = vpop.f32.mrb[251].mxu1  ;;  %6653 = vmatpush1.bf16.xpose.msra.mxu1 %v6574_v42  ;;  %6694 = vmatpush1.bf16.xpose.msra.mxu0 %v6576_v33  ;;  %v6506_v23 = vmax.f32 %v7376_v11, 0.0  ;;  %v6508_v45 = vmax.f32 %v7440_v41, 0.0 }
 0x5c1   :  { %v7379_v32 = vadd.f32 %v5995_v26, %v10065_v37  ;;  %v7443_v14 = vadd.f32 %v6381_v17, %v10068_v38  ;;  %v6507_v56 = vmax.f32 %v7377_v35, 0.0  ;;  %v6509_v31 = vmax.f32 %v7441_v27, 0.0 }
 0x5c2   :  { %v6510_v50 = vmax.f32 %v7378_v61, 0.0  ;;  %v6512_v9 = vmax.f32 %v7442_v0, 0.0  ;;  %v6612_v33 = vrot.slane %v10081_v20, %v10086_v2  ;;  %v10240_v26 = vlaneseq }
 0x5c3   :  { %v6511_v40 = vmax.f32 %v7379_v32, 0.0  ;;  %v6513_v18 = vmax.f32 %v7443_v14, 0.0 }
 0x5c4   :  { %v6578_v22 = vpack.c.bf16 %v6510_v50, %v6506_v23  ;;  %v6580_v21 = vpack.c.bf16 %v6512_v9, %v6508_v45  ;;  %vm6728_vm3 = vcmp.lt.s32.totalorder %v10240_v26, 256 }
 0x5c5   :  { %v6579_v6 = vpack.c.bf16 %v6511_v40, %v6507_v56  ;;  %v6581_v55 = vpack.c.bf16 %v6513_v18, %v6509_v31  ;;  %v5999_v43 = vpop.f32.mrb[252].mxu0  ;;  %v6385_v58 = vpop.f32.mrb[252].mxu1 }
 0x5c6   :  { %v7380_v52 = vadd.f32 %v5999_v43, %v10059_v63  ;;  %v7444_v3 = vadd.f32 %v6385_v58, %v10062_v34  ;;  %v6001_v13 = vpop.f32.mrb[253].mxu0  ;;  %v6387_v29 = vpop.f32.mrb[253].mxu1 }
 0x5c7   :  { %v7381_v19 = vadd.f32 %v6001_v13, %v10065_v37  ;;  %v7445_v4 = vadd.f32 %v6387_v29, %v10068_v38  ;;  %v6003_v15 = vpop.f32.mrb[254].mxu0  ;;  %v6389_v54 = vpop.f32.mrb[254].mxu1  ;;  %6654 = vmatprep.subr.bf16.mxu1 %v6579_v6  ;;  %6695 = vmatprep.subr.bf16.mxu0 %v6581_v55 }
 0x5c8   :  { %v7382_v24 = vadd.f32 %v6003_v15, %v10059_v63  ;;  %v7446_v60 = vadd.f32 %v6389_v54, %v10062_v34  ;;  %v6005_v53 = vpop.f32.mrb[255].mxu0  ;;  %v6391_v36 = vpop.f32.mrb[255].mxu1  ;;  %6655 = vmatpush1.bf16.xpose.msra.mxu1 %v6578_v22  ;;  %6696 = vmatpush1.bf16.xpose.msra.mxu0 %v6580_v21  ;;  %v6514_v12 = vmax.f32 %v7380_v52, 0.0  ;;  %v6516_v39 = vmax.f32 %v7444_v3, 0.0 }
 0x5c9   :  { %v7383_v5 = vadd.f32 %v6005_v53, %v10065_v37  ;;  %v7447_v10 = vadd.f32 %v6391_v36, %v10068_v38  ;;  %v6515_v47 = vmax.f32 %v7381_v19, 0.0  ;;  %v6517_v48 = vmax.f32 %v7445_v4, 0.0  ;;  %v6591_v38 = vpop.permute.xlu0 %6590 }
 0x5ca   :  { %v6518_v46 = vmax.f32 %v7382_v24, 0.0  ;;  %v6520_v62 = vmax.f32 %v7446_v60, 0.0  ;;  %v6620_v37 = vcombine.high %v6612_v33, %v6612_v33  ;;  %v6596_v57 = vrot.slane %v6591_v38, %v8936_v59 }
 0x5cb   :  { %v6519_v7 = vmax.f32 %v7383_v5, 0.0  ;;  %v6521_v44 = vmax.f32 %v7447_v10, 0.0 }
 0x5cc   :  { %v6582_v16 = vpack.c.bf16 %v6518_v46, %v6514_v12  ;;  %v6584_v63 = vpack.c.bf16 %v6520_v62, %v6516_v39 }
 0x5cd   :  { %v6583_v42 = vpack.c.bf16 %v6519_v7, %v6515_v47  ;;  %v6585_v34 = vpack.c.bf16 %v6521_v44, %v6517_v48 }
 0x5cf   :  { %6656 = vmatprep.subr.bf16.mxu1 %v6583_v42  ;;  %6697 = vmatprep.subr.bf16.mxu0 %v6585_v34 }
 0x5d0   :  { %6657 = vmatpush1.bf16.xpose.msra.mxu1 %v6582_v16  ;;  %6698 = vmatpush1.bf16.xpose.msra.mxu0 %v6584_v63 }
 0x5d7   :  { %6659 = vmatmul.mubr.bf16.vlgmr.msra.gmra.mrb[0].mxu1 %v6612_v33  ;;  %6700 = vmatmul.mubr.bf16.vlgmr.msra.gmra.mrb[0].mxu0 %v6620_v37 }
 0x6aa   :  { %v6660_v1 = vpop.f32.mrb[0].mxu1  ;;  %v6701_v49 = vpop.f32.mrb[0].mxu0 }
 0x6ab   :  { %v6661_v30 = vadd.f32 %v6660_v1, %v6596_v57  ;;  %v6662_v11 = vpop.f32.mrb[1].mxu1  ;;  %v6703_v41 = vpop.f32.mrb[1].mxu0 }
 0x6ac   :  { %v6663_v28 = vadd.f32 %v6662_v11, %v6596_v57  ;;  %v6664_v51 = vpop.f32.mrb[2].mxu1  ;;  %v6705_v35 = vpop.f32.mrb[2].mxu0 }
 0x6ad   :  { %v6702_v27 = vadd.f32 %v6701_v49, %v6661_v30  ;;  %v6665_v8 = vpop.f32.mrb[3].mxu1  ;;  %v6706_v25 = vpop.f32.mrb[3].mxu0 }
 0x6ae   :  { %v6704_v20 = vadd.f32 %v6703_v41, %v6663_v28 }
 0x6b0   :  { %v6710_v61 = vcombine.low %v6702_v27, %v6704_v20 }
 0x6b2   :  { %v6717_v0 = vrot.slane %v6710_v61, %v10086_v2 }
 0x6b4   :  { %v6724_v17 = vrot.slane %v6717_v0, %v10086_v2 }
 0x6b6   :  { %6730 = vst.msk [vmem:[%s10231_s13] sm:$0x3] %vm6728_vm3, %v6724_v17 }
 0x6b7   :  { %6735 = vsyncpa [#allocation4], 1 }
 0x6b8   :  { %6736 = vsyncpa [#allocation6], 1 }

</bundles_post_ra>
